<compile_context>
chip_gen: v7x
topology: tpu7x:2x2x1
jax: 0.10.0
libtpu: 0.0.40
codegen_flags: <defaults>
</compile_context>

<pallas_src>
import jax
import jax.numpy as jnp
from jax import lax
from jax.experimental import pallas as pl
from jax.experimental.pallas import tpu as pltpu

BN_EPS = 1e-5


# ----------------------------------------------------------------------------
# Static structure shared by wrapper, kernel factory and init
# ----------------------------------------------------------------------------
def _plan(L):
    """Mirror torch's `while num_seq > 2:` ResnetBlock stacking.

    Returns (pool_plan [(l_in, l_out), ...], num_seq)."""
    pool_plan = []
    cur = L
    while cur > 2:
        l_out = (cur - 2) // 2 + 1          # ConstantPad1d((0,1)) + MaxPool1d(3, 2)
        pool_plan.append((cur, l_out))
        cur = l_out
    return pool_plan, cur


def _cat(parts, axis):
    return parts[0] if len(parts) == 1 else jnp.concatenate(parts, axis=axis)


# ----------------------------------------------------------------------------
# Weight preparation: eval-mode BN folding + packing into two VMEM slabs
# ----------------------------------------------------------------------------
def _bn_affine(bn):
    s = bn["gamma"] / jnp.sqrt(bn["var"] + BN_EPS)
    t = bn["beta"] - bn["mean"] * s
    return s.astype(jnp.float32)[None, :], t.astype(jnp.float32)[None, :]


def _fold_mat_bn(w_in_out, b, bn):
    """Fold `y = x @ w + b` followed by a BN affine into (w', b')  [f32]."""
    s, t = _bn_affine(bn)
    return (w_in_out.astype(jnp.float32) * s), (b.astype(jnp.float32)[None, :] * s + t)


def _conv_mat(w):
    """Conv1d weight (Cout, Cin, 3) -> matmul weight (3*Cin, Cout), tap-major rows."""
    cout, cin, k = w.shape
    return jnp.transpose(w, (2, 1, 0)).reshape(k * cin, cout).astype(jnp.float32)


def _pack_slab(entries, width, dtype, row_align):
    """Stack 2-D (rows, cols <= width) blocks into one (R, width) slab.

    Folding / padding is done in f32; the cast to `dtype` happens last.
    Returns (slab, layout) with layout[name] = (row_offset, rows, cols)."""
    layout, parts, off = {}, [], 0
    for name, a in entries:
        a = jnp.asarray(a, jnp.float32)
        if a.ndim == 1:
            a = a[None, :]
        r, c = a.shape
        assert c <= width, (name, c, width)
        pad_r = (-r) % row_align
        parts.append(jnp.pad(a, ((0, pad_r), (0, width - c))))
        layout[name] = (off, r, c)
        off += r + pad_r
    return jnp.concatenate(parts, axis=0).astype(dtype), layout


def _prepare(p, compute_dtype):
    V, E = p["embedding"].shape
    F = p["region_conv_w"].shape[0]
    L = p["glob_conv_w"].shape[2]
    H = p["pair_l1_w"].shape[0]
    C = p["fc1_w"].shape[0]
    pool_plan, num_seq = _plan(L)
    assert len(pool_plan) == len(p["resnet"]), "resnet depth mismatch"

    mats, vecs = [], []
    mats.append(("emb", p["embedding"]))
    w, b = _fold_mat_bn(_conv_mat(p["region_conv_w"]), p["region_conv_b"], p["region_bn"])
    mats.append(("w_reg", w)); vecs.append(("b_reg", b))
    s, t = _bn_affine(p["cb_bn1"]); vecs += [("cb_s1", s), ("cb_t1", t)]
    w, b = _fold_mat_bn(_conv_mat(p["cb_w1"]), p["cb_b1"], p["cb_bn2"])
    mats.append(("cb_w1", w)); vecs.append(("cb_b1", b))
    mats.append(("cb_w2", _conv_mat(p["cb_w2"]))); vecs.append(("cb_b2", p["cb_b2"]))
    for i, blk in enumerate(p["resnet"]):
        s, t = _bn_affine(blk["bn1"]); vecs += [(f"r{i}_s", s), (f"r{i}_t", t)]
        w, b = _fold_mat_bn(_conv_mat(blk["w1"]), blk["b1"], blk["bn2"])
        mats.append((f"r{i}_w1", w)); vecs.append((f"r{i}_b1", b))
        mats.append((f"r{i}_w2", _conv_mat(blk["w2"]))); vecs.append((f"r{i}_b2", blk["b2"]))
    w, b = _fold_mat_bn(p["main_l_w"].T, p["main_l_b"], p["main_bn"])
    mats.append(("w_main", w)); vecs.append(("b_main", b))
    # global_embedding Conv1d(E->F, kernel_size=L): position-major (L*E, F) weight
    w_glob = jnp.transpose(p["glob_conv_w"], (2, 1, 0)).reshape(L * E, F)
    w, b = _fold_mat_bn(w_glob, p["glob_conv_b"], p["glob_bn"])
    mats.append(("w_glob", w)); vecs.append(("b_glob", b))
    w, b = _fold_mat_bn(p["pair_l1_w"].T, p["pair_l1_b"], p["pair_bn"])
    mats.append(("w_p1", w)); vecs.append(("b_p1", b))
    mats.append(("w_p2", p["pair_l2_w"].T)); vecs.append(("b_p2", p["pair_l2_b"]))
    w, b = _fold_mat_bn(p["fc1_w"].T, p["fc1_b"], p["fc_bn"])
    mats.append(("w_f1", w)); vecs.append(("b_f1", b))
    mats.append(("w_f2", p["fc2_w"].T)); vecs.append(("b_f2", p["fc2_b"]))

    width = max(E, F, H, C)
    # 16-row alignment keeps every slab slice tile-aligned for both f32 and bf16.
    wmat, mlay = _pack_slab(mats, width, compute_dtype, row_align=16)
    wvec, vlay = _pack_slab(vecs, width, jnp.float32, row_align=1)
    dims = dict(V=V, E=E, F=F, L=L, H=H, C=C, num_seq=num_seq, pool_plan=tuple(pool_plan))
    return wmat, wvec, mlay, vlay, dims


# ----------------------------------------------------------------------------
# The fused kernel (one grid step = one batch tile, whole network in VMEM)
# ----------------------------------------------------------------------------
def _make_kernel(B_t, dims, mlay, vlay, compute_dtype):
    V, E, F, L, H, C = (dims[k] for k in ("V", "E", "F", "L", "H", "C"))
    num_seq, pool_plan = dims["num_seq"], dims["pool_plan"]
    R = B_t * L
    cdt, f32 = compute_dtype, jnp.float32

    def kernel(tok_main_ref, tok_pair_ref, wmat_ref, wvec_ref, out_ref):
        def mat(name):                       # static slab slice (rows, cols)
            off, r, c = mlay[name]
            return wmat_ref[pl.ds(off, r), pl.ds(0, c)]

        def vec(name):                       # (1, cols) f32 bias / BN-affine row
            off, _, c = vlay[name]
            return wvec_ref[pl.ds(off, 1), pl.ds(0, c)]

        def shift_up(x, s):                  # row r <- x[r + s]   (zeros shifted in)
            return jnp.concatenate([x[s:, :], jnp.zeros((s, x.shape[1]), x.dtype)], axis=0)

        def shift_down(x, s):                # row r <- x[r - s]
            return jnp.concatenate([jnp.zeros((s, x.shape[1]), x.dtype),
                                    x[:x.shape[0] - s, :]], axis=0)

        # Row position inside its sample (rows are sample-major: r = b*L + l),
        # built from iotas -- no host-side mask constants, no integer mod.
        pos = _cat([lax.broadcasted_iota(jnp.int32, (L, 1), 0)] * B_t, axis=0)

        def conv3(x, wname, bname, s, l_cur):
            """Conv1d(k=3, pad=1) on the dilated layout: valid rows at multiples
            of `s` inside each sample, valid length `l_cur`.  One MXU matmul."""
            m_l = (pos >= s).astype(f32)
            m_r = (pos < (l_cur - 1) * s).astype(f32)
            col = jnp.concatenate([shift_down(x, s) * m_l, x, shift_up(x, s) * m_r], axis=1)
            return jnp.dot(col.astype(cdt), mat(wname), preferred_element_type=f32) + vec(bname)

        def pool3s2(x, s, l_cur):
            """ConstantPad1d((0,1)) + MaxPool1d(3, 2): output stays in place, i.e.
            the result is valid at dilation 2*s (no compaction, no gathers)."""
            x1 = shift_up(x, s)
            x2 = shift_up(x, 2 * s) * (pos < (l_cur - 2) * s).astype(f32)
            return jnp.maximum(jnp.maximum(x, x1), x2)

        emb_w = mat("emb")                                          # (V, E), compute dtype

        # ---------------- main feature path (X[0]) ----------------
        tok = tok_main_ref[...]                                     # (B_t*L, 1) int32
        vcol = lax.broadcasted_iota(jnp.int32, (R, V), 1)
        onehot = (vcol == tok).astype(cdt)
        # NOTE: one-hot embedding is fine for a small vocabulary; for large V
        # switch this to a DMA gather of the embedding rows instead.
        x = jnp.dot(onehot, emb_w, preferred_element_type=f32)      # (R, E)

        x = jnp.maximum(conv3(x, "w_reg", "b_reg", 1, L), 0.0)      # region_embedding(+BN)+ReLU
        h = jnp.maximum(x * vec("cb_s1") + vec("cb_t1"), 0.0)       # conv_block
        h = jnp.maximum(conv3(h, "cb_w1", "cb_b1", 1, L), 0.0)
        x = conv3(h, "cb_w2", "cb_b2", 1, L)

        s = 1
        for i, (l_in, l_out) in enumerate(pool_plan):               # ResnetBlocks (unrolled)
            sc = pool3s2(x, s, l_in)
            s *= 2
            h = jnp.maximum(sc * vec(f"r{i}_s") + vec(f"r{i}_t"), 0.0)
            h = jnp.maximum(conv3(h, f"r{i}_w1", f"r{i}_b1", s, l_out), 0.0)
            h = conv3(h, f"r{i}_w2", f"r{i}_b2", s, l_out)
            x = h + sc

        # out_main: pick the num_seq surviving rows (b*L + l*s), flatten, Linear(+BN)+ReLU
        samples = []
        for b in range(B_t):
            picks = [x[b * L + l * s:b * L + l * s + 1, :] for l in range(num_seq)]
            samples.append(_cat(picks, axis=1))                     # (1, num_seq*F)
        flat = _cat(samples, axis=0)                                # (B_t, num_seq*F)
        out_main = jnp.maximum(
            jnp.dot(flat.astype(cdt), mat("w_main"), preferred_element_type=f32) + vec("b_main"),
            0.0)                                                    # (B_t, H)

        # ---------------- pair path (X[1] & X[2], stacked along rows) ----------------
        tp = tok_pair_ref[...]                                      # (B_t, 2L) int32
        vcolp = lax.broadcasted_iota(jnp.int32, (2 * B_t, V), 1)
        w_glob = mat("w_glob")                                      # (L*E, F)
        g = jnp.zeros((2 * B_t, F), f32)
        for l in range(L):                                          # Conv1d(kernel=sent_len)
            tok_l = jnp.concatenate([tp[:, l:l + 1], tp[:, L + l:L + l + 1]], axis=0)
            oh = (vcolp == tok_l).astype(cdt)
            e_l = jnp.dot(oh, emb_w, preferred_element_type=f32)    # (2B_t, E) embedding @ pos l
            g = g + jnp.dot(e_l.astype(cdt), w_glob[l * E:(l + 1) * E, :],
                            preferred_element_type=f32)
        g = jnp.maximum(g + vec("b_glob"), 0.0)                     # (+folded BN) + ReLU
        h = jnp.maximum(jnp.dot(g.astype(cdt), mat("w_p1"), preferred_element_type=f32)
                        + vec("b_p1"), 0.0)
        pair = jnp.dot(h.astype(cdt), mat("w_p2"), preferred_element_type=f32) + vec("b_p2")

        # ---------------- out_fc head ----------------
        feat = jnp.concatenate([out_main, pair[:B_t, :], pair[B_t:, :]], axis=1)  # (B_t, 3H)
        z = jnp.maximum(jnp.dot(feat.astype(cdt), mat("w_f1"), preferred_element_type=f32)
                        + vec("b_f1"), 0.0)
        out = jnp.dot(z.astype(cdt), mat("w_f2"), preferred_element_type=f32) + vec("b_f2")
        out_ref[...] = out.astype(out_ref.dtype)

    return kernel


# ----------------------------------------------------------------------------
# Forward-pass builder: ONE pallas_call for the whole network
# ----------------------------------------------------------------------------
def build_dpcnn_forward(params, *, compute_dtype=jnp.float32):
    """Fold BN (eval mode), pack weights into two slabs, return a jitted forward(X)."""
    wmat, wvec, mlay, vlay, dims = _prepare(params, compute_dtype)
    L, C = dims["L"], dims["C"]

    @jax.jit
    def forward(tok0, tok1, tok2, wmat_, wvec_):
        B = tok0.shape[0]
        assert tok0.shape == tok1.shape == tok2.shape == (B, L)
        # Split the batch across a parallel grid axis only when the resulting
        # blocks stay (8,128)-compliant -- on v7x this lets Mosaic shard the
        # work over both TensorCores; at small B it is a single grid step.
        bt = B // 2 if (B % 16 == 0) else B
        kernel = _make_kernel(bt, dims, mlay, vlay, compute_dtype)

        tok_main = tok0.reshape(B * L, 1).astype(jnp.int32)
        tok_pair = jnp.concatenate([tok1, tok2], axis=1).astype(jnp.int32)   # (B, 2L)

        # Total resident bytes (two slabs + per-tile activations) are a few
        # hundred KiB at these sizes -- far below even v7x's 64 MiB VMEM.  Set
        # vmem_limit_bytes in CompilerParams if the config is scaled up.
        return pl.pallas_call(
            kernel,
            out_shape=jax.ShapeDtypeStruct((B, C), jnp.float32),
            grid=(B // bt,),
            in_specs=[
                pl.BlockSpec((bt * L, 1), lambda i: (i, 0)),
                pl.BlockSpec((bt, 2 * L), lambda i: (i, 0)),
                pl.BlockSpec(wmat_.shape, lambda i: (0, 0)),
                pl.BlockSpec(wvec_.shape, lambda i: (0, 0)),
            ],
            out_specs=pl.BlockSpec((bt, C), lambda i: (i, 0)),
            compiler_params=pltpu.CompilerParams(dimension_semantics=("parallel",)),
        )(tok_main, tok_pair, wmat_, wvec_)

    def apply(X):
        return forward(X[0], X[1], X[2], wmat, wvec)

    return apply


# ----------------------------------------------------------------------------
# Parameter init (matches the torch module's shapes; eval-mode BN stats)
# ----------------------------------------------------------------------------
def init_params(key, cfg):
    ks = iter(jax.random.split(key, 128))

    def normal(shape, s=0.1):
        return (s * jax.random.normal(next(ks), shape)).astype(jnp.float32)

    def bn(n):
        return {"gamma": (1.0 + 0.1 * jax.random.normal(next(ks), (n,))).astype(jnp.float32),
                "beta": normal((n,)),
                "mean": normal((n,)),
                "var": (0.5 + jax.random.uniform(next(ks), (n,))).astype(jnp.float32)}

    V, E, F = cfg["input_size"], cfg["embedding_dim"], cfg["num_filters"]
    L, H, C = cfg["sent_len"], cfg["n_hidden"], cfg["num_classes"]
    pool_plan, num_seq = _plan(L)

    p = {}
    p["embedding"] = normal((V, E), 1.0)
    p["glob_conv_w"] = normal((F, E, L)); p["glob_conv_b"] = normal((F,))
    p["glob_bn"] = bn(F)
    p["pair_l1_w"] = normal((H, F)); p["pair_l1_b"] = normal((H,))
    p["pair_bn"] = bn(H)
    p["pair_l2_w"] = normal((H, H)); p["pair_l2_b"] = normal((H,))
    p["region_conv_w"] = normal((F, E, 3)); p["region_conv_b"] = normal((F,))
    p["region_bn"] = bn(F)
    p["cb_bn1"] = bn(F); p["cb_w1"] = normal((F, F, 3)); p["cb_b1"] = normal((F,))
    p["cb_bn2"] = bn(F); p["cb_w2"] = normal((F, F, 3)); p["cb_b2"] = normal((F,))
    p["resnet"] = [{"bn1": bn(F), "w1": normal((F, F, 3)), "b1": normal((F,)),
                    "bn2": bn(F), "w2": normal((F, F, 3)), "b2": normal((F,))}
                   for _ in pool_plan]
    p["main_l_w"] = normal((H, F * num_seq)); p["main_l_b"] = normal((H,))
    p["main_bn"] = bn(H)
    p["fc1_w"] = normal((C, 3 * H)); p["fc1_b"] = normal((C,))
    p["fc_bn"] = bn(C)
    p["fc2_w"] = normal((C, C)); p["fc2_b"] = normal((C,))
    return p


# ----------------------------------------------------------------------------
# Pure-JAX (XLA) reference mirroring the torch module in eval mode
# ----------------------------------------------------------------------------
def _reference_forward(p, X):
    def bn(x, q):
        s = q["gamma"] / jnp.sqrt(q["var"] + BN_EPS)
        return x * s + (q["beta"] - q["mean"] * s)

    def conv3(x, w, b):                       # x: (B, L, Cin), w: (Cout, Cin, 3)
        xp = jnp.pad(x, ((0, 0), (1, 1), (0, 0)))
        wt = jnp.transpose(w, (2, 1, 0))      # (3, Cin, Cout)
        Lc = x.shape[1]
        y = xp[:, 0:Lc] @ wt[0] + xp[:, 1:Lc + 1] @ wt[1] + xp[:, 2:Lc + 2] @ wt[2]
        return y + b

    def feature(tok):
        x = jnp.take(p["embedding"], tok, axis=0)                      # (B, L, E)
        x = jnp.maximum(bn(conv3(x, p["region_conv_w"], p["region_conv_b"]),
                           p["region_bn"]), 0.0)
        h = jnp.maximum(bn(x, p["cb_bn1"]), 0.0)
        h = conv3(h, p["cb_w1"], p["cb_b1"])
        h = jnp.maximum(bn(h, p["cb_bn2"]), 0.0)
        x = conv3(h, p["cb_w2"], p["cb_b2"])
        for blk in p["resnet"]:
            l_in = x.shape[1]
            xp = jnp.pad(x, ((0, 0), (0, 1), (0, 0)))
            l_out = (l_in - 2) // 2 + 1
            sc = jnp.stack([jnp.max(xp[:, 2 * j:2 * j + 3, :], axis=1)
                            for j in range(l_out)], axis=1)
            h = jnp.maximum(bn(sc, blk["bn1"]), 0.0)
            h = conv3(h, blk["w1"], blk["b1"])
            h = jnp.maximum(bn(h, blk["bn2"]), 0.0)
            h = conv3(h, blk["w2"], blk["b2"])
            x = h + sc
        flat = x.reshape(tok.shape[0], -1)
        y = flat @ p["main_l_w"].T + p["main_l_b"]
        return jnp.maximum(bn(y, p["main_bn"]), 0.0)

    def pair(tok):
        x = jnp.take(p["embedding"], tok, axis=0)                      # (B, L, E)
        Bq, Lq, Eq = x.shape
        wflat = jnp.transpose(p["glob_conv_w"], (2, 1, 0)).reshape(Lq * Eq, -1)
        g = x.reshape(Bq, Lq * Eq) @ wflat + p["glob_conv_b"]
        g = jnp.maximum(bn(g, p["glob_bn"]), 0.0)
        h = g @ p["pair_l1_w"].T + p["pair_l1_b"]
        h = jnp.maximum(bn(h, p["pair_bn"]), 0.0)
        return h @ p["pair_l2_w"].T + p["pair_l2_b"]

    out = jnp.concatenate([feature(X[0]), pair(X[1]), pair(X[2])], axis=1)
    z = out @ p["fc1_w"].T + p["fc1_b"]
    z = jnp.maximum(bn(z, p["fc_bn"]), 0.0)
    return z @ p["fc2_w"].T + p["fc2_b"]


# ----------------------------------------------------------------------------
if __name__ == "__main__":
    cfg = dict(input_size=20, embedding_dim=8, num_filters=32, sent_len=16,
               n_hidden=32, num_classes=4, dropout=0.1)
    key = jax.random.PRNGKey(0)
    pkey, dkey = jax.random.split(key)
    params = init_params(pkey, cfg)

    B = 2
    tok_keys = jax.random.split(dkey, 3)
    # X is a sequence of 3 token-id tensors, each (B, sent_len)
    X = [jax.random.randint(tok_keys[i], (B, cfg["sent_len"]), 0,
                            cfg["input_size"], dtype=jnp.int32)
         for i in range(3)]

    fwd = build_dpcnn_forward(params)                     # f32 compute path
    out = jax.block_until_ready(fwd(X))
    assert out.shape == (B, cfg["num_classes"]), out.shape

    ref = jax.block_until_ready(_reference_forward(params, X))
    err = float(jnp.max(jnp.abs(out - ref)))
    assert err < 5e-3, f"kernel vs reference mismatch: max abs err = {err}"

    # bf16 MXU-operand variant (v6e/v7x fast path); elementwise math stays f32.
    fwd_bf16 = build_dpcnn_forward(params, compute_dtype=jnp.bfloat16)
    out_bf16 = jax.block_until_ready(fwd_bf16(X))
    err_bf16 = float(jnp.max(jnp.abs(out_bf16 - ref)))
    assert err_bf16 < 1e-1, f"bf16 kernel drifted: max abs err = {err_bf16}"

    print("KERNEL_OK")
</pallas_src>

<mosaic_0001>
module attributes {stable_mosaic.version = 11 : i64} {
  func.func @kernel(%arg0: i32, %arg1: memref<32x1xi32, #tpu.memory_space<vmem>>, %arg2: memref<2x32xi32, #tpu.memory_space<vmem>>, %arg3: memref<1200x32xf32, #tpu.memory_space<vmem>>, %arg4: memref<23x32xf32, #tpu.memory_space<vmem>>, %arg5: memref<2x4xf32, #tpu.memory_space<vmem>>) attributes {dimension_semantics = [#tpu.dimension_semantics<parallel>], iteration_bounds = array<i64: 1>, scalar_prefetch = 0 : i64, scratch_operands = 0 : i64, tpu.core_type = #tpu.core_type<tc>, window_params = [{transform_indices = @transform_0, window_bounds = array<i64: 32, 1>}, {transform_indices = @transform_1, window_bounds = array<i64: 2, 32>}, {pipeline_mode = #tpu.pipeline_mode<synchronous>, transform_indices = @transform_2, window_bounds = array<i64: 1200, 32>}, {pipeline_mode = #tpu.pipeline_mode<synchronous>, transform_indices = @transform_3, window_bounds = array<i64: 23, 32>}, {transform_indices = @transform_4, window_bounds = array<i64: 2, 4>}]} {
    %0 = tpu.iota {dimensions = array<i32: 0>} : vector<16x1xi32>
    %1 = tpu.concatenate %0, %0 in 0 : vector<16x1xi32>, vector<16x1xi32> -> vector<32x1xi32>
    %c0 = arith.constant 0 : index
    %c0_0 = arith.constant 0 : index
    %2 = vector.load %arg3[%c0, %c0_0] : memref<1200x32xf32, #tpu.memory_space<vmem>>, vector<20x8xf32>
    %c0_1 = arith.constant 0 : index
    %c0_2 = arith.constant 0 : index
    %3 = vector.load %arg1[%c0_1, %c0_2] : memref<32x1xi32, #tpu.memory_space<vmem>>, vector<32x1xi32>
    %4 = tpu.iota {dimensions = array<i32: 1>} : vector<32x20xi32>
    %5 = vector.broadcast %3 : vector<32x1xi32> to vector<32x20xi32>
    %6 = arith.cmpi eq, %4, %5 : vector<32x20xi32>
    %7 = arith.extui %6 : vector<32x20xi1> to vector<32x20xi32>
    %8 = arith.sitofp %7 : vector<32x20xi32> to vector<32x20xf32>
    %cst = arith.constant dense<0.000000e+00> : vector<32x8xf32>
    %9 = tpu.matmul %8, %2, %cst {dimension_numbers = #tpu.dot_dimension_numbers<[1], [0], [0], [1], [0, 0, 1, 1], [], []>} : vector<32x20xf32>, vector<20x8xf32>, vector<32x8xf32> -> vector<32x8xf32>
    %c1_i32 = arith.constant 1 : i32
    %10 = vector.broadcast %c1_i32 : i32 to vector<32x1xi32>
    %11 = arith.cmpi sge, %1, %10 : vector<32x1xi32>
    %12 = arith.extui %11 : vector<32x1xi1> to vector<32x1xi32>
    %13 = arith.sitofp %12 : vector<32x1xi32> to vector<32x1xf32>
    %c15_i32 = arith.constant 15 : i32
    %14 = vector.broadcast %c15_i32 : i32 to vector<32x1xi32>
    %15 = arith.cmpi slt, %1, %14 : vector<32x1xi32>
    %16 = arith.extui %15 : vector<32x1xi1> to vector<32x1xi32>
    %17 = arith.sitofp %16 : vector<32x1xi32> to vector<32x1xf32>
    %cst_3 = arith.constant 0.000000e+00 : f32
    %18 = vector.broadcast %cst_3 : f32 to vector<1x8xf32>
    %19 = vector.extract_strided_slice %9 {offsets = [0, 0], sizes = [31, 8], strides = [1, 1]} : vector<32x8xf32> to vector<31x8xf32>
    %20 = tpu.concatenate %18, %19 in 0 : vector<1x8xf32>, vector<31x8xf32> -> vector<32x8xf32>
    %21 = vector.broadcast %13 : vector<32x1xf32> to vector<32x8xf32>
    %22 = arith.mulf %20, %21 : vector<32x8xf32>
    %23 = vector.extract_strided_slice %9 {offsets = [1, 0], sizes = [31, 8], strides = [1, 1]} : vector<32x8xf32> to vector<31x8xf32>
    %cst_4 = arith.constant 0.000000e+00 : f32
    %24 = vector.broadcast %cst_4 : f32 to vector<1x8xf32>
    %25 = tpu.concatenate %23, %24 in 0 : vector<31x8xf32>, vector<1x8xf32> -> vector<32x8xf32>
    %26 = vector.broadcast %17 : vector<32x1xf32> to vector<32x8xf32>
    %27 = arith.mulf %25, %26 : vector<32x8xf32>
    %28 = tpu.concatenate %22, %9, %27 in 1 : vector<32x8xf32>, vector<32x8xf32>, vector<32x8xf32> -> vector<32x24xf32>
    %c32 = arith.constant 32 : index
    %c0_5 = arith.constant 0 : index
    %29 = vector.load %arg3[%c32, %c0_5] : memref<1200x32xf32, #tpu.memory_space<vmem>>, vector<24x32xf32>
    %cst_6 = arith.constant dense<0.000000e+00> : vector<32x32xf32>
    %30 = tpu.matmul %28, %29, %cst_6 {dimension_numbers = #tpu.dot_dimension_numbers<[1], [0], [0], [1], [0, 0, 1, 1], [], []>} : vector<32x24xf32>, vector<24x32xf32>, vector<32x32xf32> -> vector<32x32xf32>
    %c0_7 = arith.constant 0 : index
    %c0_8 = arith.constant 0 : index
    %31 = vector.load %arg4[%c0_7, %c0_8] : memref<23x32xf32, #tpu.memory_space<vmem>>, vector<1x32xf32>
    %32 = vector.broadcast %31 : vector<1x32xf32> to vector<32x32xf32>
    %33 = arith.addf %30, %32 : vector<32x32xf32>
    %cst_9 = arith.constant 0.000000e+00 : f32
    %34 = vector.broadcast %cst_9 : f32 to vector<32x32xf32>
    %35 = arith.maximumf %33, %34 : vector<32x32xf32>
    %c1 = arith.constant 1 : index
    %c0_10 = arith.constant 0 : index
    %36 = vector.load %arg4[%c1, %c0_10] : memref<23x32xf32, #tpu.memory_space<vmem>>, vector<1x32xf32>
    %37 = vector.broadcast %36 : vector<1x32xf32> to vector<32x32xf32>
    %38 = arith.mulf %35, %37 : vector<32x32xf32>
    %c2 = arith.constant 2 : index
    %c0_11 = arith.constant 0 : index
    %39 = vector.load %arg4[%c2, %c0_11] : memref<23x32xf32, #tpu.memory_space<vmem>>, vector<1x32xf32>
    %40 = vector.broadcast %39 : vector<1x32xf32> to vector<32x32xf32>
    %41 = arith.addf %38, %40 : vector<32x32xf32>
    %cst_12 = arith.constant 0.000000e+00 : f32
    %42 = vector.broadcast %cst_12 : f32 to vector<32x32xf32>
    %43 = arith.maximumf %41, %42 : vector<32x32xf32>
    %c1_i32_13 = arith.constant 1 : i32
    %44 = vector.broadcast %c1_i32_13 : i32 to vector<32x1xi32>
    %45 = arith.cmpi sge, %1, %44 : vector<32x1xi32>
    %46 = arith.extui %45 : vector<32x1xi1> to vector<32x1xi32>
    %47 = arith.sitofp %46 : vector<32x1xi32> to vector<32x1xf32>
    %c15_i32_14 = arith.constant 15 : i32
    %48 = vector.broadcast %c15_i32_14 : i32 to vector<32x1xi32>
    %49 = arith.cmpi slt, %1, %48 : vector<32x1xi32>
    %50 = arith.extui %49 : vector<32x1xi1> to vector<32x1xi32>
    %51 = arith.sitofp %50 : vector<32x1xi32> to vector<32x1xf32>
    %cst_15 = arith.constant 0.000000e+00 : f32
    %52 = vector.broadcast %cst_15 : f32 to vector<1x32xf32>
    %53 = vector.extract_strided_slice %43 {offsets = [0, 0], sizes = [31, 32], strides = [1, 1]} : vector<32x32xf32> to vector<31x32xf32>
    %54 = tpu.concatenate %52, %53 in 0 : vector<1x32xf32>, vector<31x32xf32> -> vector<32x32xf32>
    %55 = vector.broadcast %47 : vector<32x1xf32> to vector<32x32xf32>
    %56 = arith.mulf %54, %55 : vector<32x32xf32>
    %57 = vector.extract_strided_slice %43 {offsets = [1, 0], sizes = [31, 32], strides = [1, 1]} : vector<32x32xf32> to vector<31x32xf32>
    %cst_16 = arith.constant 0.000000e+00 : f32
    %58 = vector.broadcast %cst_16 : f32 to vector<1x32xf32>
    %59 = tpu.concatenate %57, %58 in 0 : vector<31x32xf32>, vector<1x32xf32> -> vector<32x32xf32>
    %60 = vector.broadcast %51 : vector<32x1xf32> to vector<32x32xf32>
    %61 = arith.mulf %59, %60 : vector<32x32xf32>
    %62 = tpu.concatenate %56, %43, %61 in 1 : vector<32x32xf32>, vector<32x32xf32>, vector<32x32xf32> -> vector<32x96xf32>
    %c64 = arith.constant 64 : index
    %c0_17 = arith.constant 0 : index
    %63 = vector.load %arg3[%c64, %c0_17] : memref<1200x32xf32, #tpu.memory_space<vmem>>, vector<96x32xf32>
    %cst_18 = arith.constant dense<0.000000e+00> : vector<32x32xf32>
    %64 = tpu.matmul %62, %63, %cst_18 {dimension_numbers = #tpu.dot_dimension_numbers<[1], [0], [0], [1], [0, 0, 1, 1], [], []>} : vector<32x96xf32>, vector<96x32xf32>, vector<32x32xf32> -> vector<32x32xf32>
    %c3 = arith.constant 3 : index
    %c0_19 = arith.constant 0 : index
    %65 = vector.load %arg4[%c3, %c0_19] : memref<23x32xf32, #tpu.memory_space<vmem>>, vector<1x32xf32>
    %66 = vector.broadcast %65 : vector<1x32xf32> to vector<32x32xf32>
    %67 = arith.addf %64, %66 : vector<32x32xf32>
    %cst_20 = arith.constant 0.000000e+00 : f32
    %68 = vector.broadcast %cst_20 : f32 to vector<32x32xf32>
    %69 = arith.maximumf %67, %68 : vector<32x32xf32>
    %c1_i32_21 = arith.constant 1 : i32
    %70 = vector.broadcast %c1_i32_21 : i32 to vector<32x1xi32>
    %71 = arith.cmpi sge, %1, %70 : vector<32x1xi32>
    %72 = arith.extui %71 : vector<32x1xi1> to vector<32x1xi32>
    %73 = arith.sitofp %72 : vector<32x1xi32> to vector<32x1xf32>
    %c15_i32_22 = arith.constant 15 : i32
    %74 = vector.broadcast %c15_i32_22 : i32 to vector<32x1xi32>
    %75 = arith.cmpi slt, %1, %74 : vector<32x1xi32>
    %76 = arith.extui %75 : vector<32x1xi1> to vector<32x1xi32>
    %77 = arith.sitofp %76 : vector<32x1xi32> to vector<32x1xf32>
    %cst_23 = arith.constant 0.000000e+00 : f32
    %78 = vector.broadcast %cst_23 : f32 to vector<1x32xf32>
    %79 = vector.extract_strided_slice %69 {offsets = [0, 0], sizes = [31, 32], strides = [1, 1]} : vector<32x32xf32> to vector<31x32xf32>
    %80 = tpu.concatenate %78, %79 in 0 : vector<1x32xf32>, vector<31x32xf32> -> vector<32x32xf32>
    %81 = vector.broadcast %73 : vector<32x1xf32> to vector<32x32xf32>
    %82 = arith.mulf %80, %81 : vector<32x32xf32>
    %83 = vector.extract_strided_slice %69 {offsets = [1, 0], sizes = [31, 32], strides = [1, 1]} : vector<32x32xf32> to vector<31x32xf32>
    %cst_24 = arith.constant 0.000000e+00 : f32
    %84 = vector.broadcast %cst_24 : f32 to vector<1x32xf32>
    %85 = tpu.concatenate %83, %84 in 0 : vector<31x32xf32>, vector<1x32xf32> -> vector<32x32xf32>
    %86 = vector.broadcast %77 : vector<32x1xf32> to vector<32x32xf32>
    %87 = arith.mulf %85, %86 : vector<32x32xf32>
    %88 = tpu.concatenate %82, %69, %87 in 1 : vector<32x32xf32>, vector<32x32xf32>, vector<32x32xf32> -> vector<32x96xf32>
    %c160 = arith.constant 160 : index
    %c0_25 = arith.constant 0 : index
    %89 = vector.load %arg3[%c160, %c0_25] : memref<1200x32xf32, #tpu.memory_space<vmem>>, vector<96x32xf32>
    %cst_26 = arith.constant dense<0.000000e+00> : vector<32x32xf32>
    %90 = tpu.matmul %88, %89, %cst_26 {dimension_numbers = #tpu.dot_dimension_numbers<[1], [0], [0], [1], [0, 0, 1, 1], [], []>} : vector<32x96xf32>, vector<96x32xf32>, vector<32x32xf32> -> vector<32x32xf32>
    %c4 = arith.constant 4 : index
    %c0_27 = arith.constant 0 : index
    %91 = vector.load %arg4[%c4, %c0_27] : memref<23x32xf32, #tpu.memory_space<vmem>>, vector<1x32xf32>
    %92 = vector.broadcast %91 : vector<1x32xf32> to vector<32x32xf32>
    %93 = arith.addf %90, %92 : vector<32x32xf32>
    %94 = vector.extract_strided_slice %93 {offsets = [1, 0], sizes = [31, 32], strides = [1, 1]} : vector<32x32xf32> to vector<31x32xf32>
    %cst_28 = arith.constant 0.000000e+00 : f32
    %95 = vector.broadcast %cst_28 : f32 to vector<1x32xf32>
    %96 = tpu.concatenate %94, %95 in 0 : vector<31x32xf32>, vector<1x32xf32> -> vector<32x32xf32>
    %97 = vector.extract_strided_slice %93 {offsets = [2, 0], sizes = [30, 32], strides = [1, 1]} : vector<32x32xf32> to vector<30x32xf32>
    %cst_29 = arith.constant 0.000000e+00 : f32
    %98 = vector.broadcast %cst_29 : f32 to vector<2x32xf32>
    %99 = tpu.concatenate %97, %98 in 0 : vector<30x32xf32>, vector<2x32xf32> -> vector<32x32xf32>
    %c14_i32 = arith.constant 14 : i32
    %100 = vector.broadcast %c14_i32 : i32 to vector<32x1xi32>
    %101 = arith.cmpi slt, %1, %100 : vector<32x1xi32>
    %102 = arith.extui %101 : vector<32x1xi1> to vector<32x1xi32>
    %103 = arith.sitofp %102 : vector<32x1xi32> to vector<32x1xf32>
    %104 = vector.broadcast %103 : vector<32x1xf32> to vector<32x32xf32>
    %105 = arith.mulf %99, %104 : vector<32x32xf32>
    %106 = arith.maximumf %93, %96 : vector<32x32xf32>
    %107 = arith.maximumf %106, %105 : vector<32x32xf32>
    %c5 = arith.constant 5 : index
    %c0_30 = arith.constant 0 : index
    %108 = vector.load %arg4[%c5, %c0_30] : memref<23x32xf32, #tpu.memory_space<vmem>>, vector<1x32xf32>
    %109 = vector.broadcast %108 : vector<1x32xf32> to vector<32x32xf32>
    %110 = arith.mulf %107, %109 : vector<32x32xf32>
    %c6 = arith.constant 6 : index
    %c0_31 = arith.constant 0 : index
    %111 = vector.load %arg4[%c6, %c0_31] : memref<23x32xf32, #tpu.memory_space<vmem>>, vector<1x32xf32>
    %112 = vector.broadcast %111 : vector<1x32xf32> to vector<32x32xf32>
    %113 = arith.addf %110, %112 : vector<32x32xf32>
    %cst_32 = arith.constant 0.000000e+00 : f32
    %114 = vector.broadcast %cst_32 : f32 to vector<32x32xf32>
    %115 = arith.maximumf %113, %114 : vector<32x32xf32>
    %c2_i32 = arith.constant 2 : i32
    %116 = vector.broadcast %c2_i32 : i32 to vector<32x1xi32>
    %117 = arith.cmpi sge, %1, %116 : vector<32x1xi32>
    %118 = arith.extui %117 : vector<32x1xi1> to vector<32x1xi32>
    %119 = arith.sitofp %118 : vector<32x1xi32> to vector<32x1xf32>
    %c14_i32_33 = arith.constant 14 : i32
    %120 = vector.broadcast %c14_i32_33 : i32 to vector<32x1xi32>
    %121 = arith.cmpi slt, %1, %120 : vector<32x1xi32>
    %122 = arith.extui %121 : vector<32x1xi1> to vector<32x1xi32>
    %123 = arith.sitofp %122 : vector<32x1xi32> to vector<32x1xf32>
    %cst_34 = arith.constant 0.000000e+00 : f32
    %124 = vector.broadcast %cst_34 : f32 to vector<2x32xf32>
    %125 = vector.extract_strided_slice %115 {offsets = [0, 0], sizes = [30, 32], strides = [1, 1]} : vector<32x32xf32> to vector<30x32xf32>
    %126 = tpu.concatenate %124, %125 in 0 : vector<2x32xf32>, vector<30x32xf32> -> vector<32x32xf32>
    %127 = vector.broadcast %119 : vector<32x1xf32> to vector<32x32xf32>
    %128 = arith.mulf %126, %127 : vector<32x32xf32>
    %129 = vector.extract_strided_slice %115 {offsets = [2, 0], sizes = [30, 32], strides = [1, 1]} : vector<32x32xf32> to vector<30x32xf32>
    %cst_35 = arith.constant 0.000000e+00 : f32
    %130 = vector.broadcast %cst_35 : f32 to vector<2x32xf32>
    %131 = tpu.concatenate %129, %130 in 0 : vector<30x32xf32>, vector<2x32xf32> -> vector<32x32xf32>
    %132 = vector.broadcast %123 : vector<32x1xf32> to vector<32x32xf32>
    %133 = arith.mulf %131, %132 : vector<32x32xf32>
    %134 = tpu.concatenate %128, %115, %133 in 1 : vector<32x32xf32>, vector<32x32xf32>, vector<32x32xf32> -> vector<32x96xf32>
    %c256 = arith.constant 256 : index
    %c0_36 = arith.constant 0 : index
    %135 = vector.load %arg3[%c256, %c0_36] : memref<1200x32xf32, #tpu.memory_space<vmem>>, vector<96x32xf32>
    %cst_37 = arith.constant dense<0.000000e+00> : vector<32x32xf32>
    %136 = tpu.matmul %134, %135, %cst_37 {dimension_numbers = #tpu.dot_dimension_numbers<[1], [0], [0], [1], [0, 0, 1, 1], [], []>} : vector<32x96xf32>, vector<96x32xf32>, vector<32x32xf32> -> vector<32x32xf32>
    %c7 = arith.constant 7 : index
    %c0_38 = arith.constant 0 : index
    %137 = vector.load %arg4[%c7, %c0_38] : memref<23x32xf32, #tpu.memory_space<vmem>>, vector<1x32xf32>
    %138 = vector.broadcast %137 : vector<1x32xf32> to vector<32x32xf32>
    %139 = arith.addf %136, %138 : vector<32x32xf32>
    %cst_39 = arith.constant 0.000000e+00 : f32
    %140 = vector.broadcast %cst_39 : f32 to vector<32x32xf32>
    %141 = arith.maximumf %139, %140 : vector<32x32xf32>
    %c2_i32_40 = arith.constant 2 : i32
    %142 = vector.broadcast %c2_i32_40 : i32 to vector<32x1xi32>
    %143 = arith.cmpi sge, %1, %142 : vector<32x1xi32>
    %144 = arith.extui %143 : vector<32x1xi1> to vector<32x1xi32>
    %145 = arith.sitofp %144 : vector<32x1xi32> to vector<32x1xf32>
    %c14_i32_41 = arith.constant 14 : i32
    %146 = vector.broadcast %c14_i32_41 : i32 to vector<32x1xi32>
    %147 = arith.cmpi slt, %1, %146 : vector<32x1xi32>
    %148 = arith.extui %147 : vector<32x1xi1> to vector<32x1xi32>
    %149 = arith.sitofp %148 : vector<32x1xi32> to vector<32x1xf32>
    %cst_42 = arith.constant 0.000000e+00 : f32
    %150 = vector.broadcast %cst_42 : f32 to vector<2x32xf32>
    %151 = vector.extract_strided_slice %141 {offsets = [0, 0], sizes = [30, 32], strides = [1, 1]} : vector<32x32xf32> to vector<30x32xf32>
    %152 = tpu.concatenate %150, %151 in 0 : vector<2x32xf32>, vector<30x32xf32> -> vector<32x32xf32>
    %153 = vector.broadcast %145 : vector<32x1xf32> to vector<32x32xf32>
    %154 = arith.mulf %152, %153 : vector<32x32xf32>
    %155 = vector.extract_strided_slice %141 {offsets = [2, 0], sizes = [30, 32], strides = [1, 1]} : vector<32x32xf32> to vector<30x32xf32>
    %cst_43 = arith.constant 0.000000e+00 : f32
    %156 = vector.broadcast %cst_43 : f32 to vector<2x32xf32>
    %157 = tpu.concatenate %155, %156 in 0 : vector<30x32xf32>, vector<2x32xf32> -> vector<32x32xf32>
    %158 = vector.broadcast %149 : vector<32x1xf32> to vector<32x32xf32>
    %159 = arith.mulf %157, %158 : vector<32x32xf32>
    %160 = tpu.concatenate %154, %141, %159 in 1 : vector<32x32xf32>, vector<32x32xf32>, vector<32x32xf32> -> vector<32x96xf32>
    %c352 = arith.constant 352 : index
    %c0_44 = arith.constant 0 : index
    %161 = vector.load %arg3[%c352, %c0_44] : memref<1200x32xf32, #tpu.memory_space<vmem>>, vector<96x32xf32>
    %cst_45 = arith.constant dense<0.000000e+00> : vector<32x32xf32>
    %162 = tpu.matmul %160, %161, %cst_45 {dimension_numbers = #tpu.dot_dimension_numbers<[1], [0], [0], [1], [0, 0, 1, 1], [], []>} : vector<32x96xf32>, vector<96x32xf32>, vector<32x32xf32> -> vector<32x32xf32>
    %c8 = arith.constant 8 : index
    %c0_46 = arith.constant 0 : index
    %163 = vector.load %arg4[%c8, %c0_46] : memref<23x32xf32, #tpu.memory_space<vmem>>, vector<1x32xf32>
    %164 = vector.broadcast %163 : vector<1x32xf32> to vector<32x32xf32>
    %165 = arith.addf %162, %164 : vector<32x32xf32>
    %166 = arith.addf %165, %107 : vector<32x32xf32>
    %167 = vector.extract_strided_slice %166 {offsets = [2, 0], sizes = [30, 32], strides = [1, 1]} : vector<32x32xf32> to vector<30x32xf32>
    %cst_47 = arith.constant 0.000000e+00 : f32
    %168 = vector.broadcast %cst_47 : f32 to vector<2x32xf32>
    %169 = tpu.concatenate %167, %168 in 0 : vector<30x32xf32>, vector<2x32xf32> -> vector<32x32xf32>
    %170 = vector.extract_strided_slice %166 {offsets = [4, 0], sizes = [28, 32], strides = [1, 1]} : vector<32x32xf32> to vector<28x32xf32>
    %cst_48 = arith.constant 0.000000e+00 : f32
    %171 = vector.broadcast %cst_48 : f32 to vector<4x32xf32>
    %172 = tpu.concatenate %170, %171 in 0 : vector<28x32xf32>, vector<4x32xf32> -> vector<32x32xf32>
    %c12_i32 = arith.constant 12 : i32
    %173 = vector.broadcast %c12_i32 : i32 to vector<32x1xi32>
    %174 = arith.cmpi slt, %1, %173 : vector<32x1xi32>
    %175 = arith.extui %174 : vector<32x1xi1> to vector<32x1xi32>
    %176 = arith.sitofp %175 : vector<32x1xi32> to vector<32x1xf32>
    %177 = vector.broadcast %176 : vector<32x1xf32> to vector<32x32xf32>
    %178 = arith.mulf %172, %177 : vector<32x32xf32>
    %179 = arith.maximumf %166, %169 : vector<32x32xf32>
    %180 = arith.maximumf %179, %178 : vector<32x32xf32>
    %c9 = arith.constant 9 : index
    %c0_49 = arith.constant 0 : index
    %181 = vector.load %arg4[%c9, %c0_49] : memref<23x32xf32, #tpu.memory_space<vmem>>, vector<1x32xf32>
    %182 = vector.broadcast %181 : vector<1x32xf32> to vector<32x32xf32>
    %183 = arith.mulf %180, %182 : vector<32x32xf32>
    %c10 = arith.constant 10 : index
    %c0_50 = arith.constant 0 : index
    %184 = vector.load %arg4[%c10, %c0_50] : memref<23x32xf32, #tpu.memory_space<vmem>>, vector<1x32xf32>
    %185 = vector.broadcast %184 : vector<1x32xf32> to vector<32x32xf32>
    %186 = arith.addf %183, %185 : vector<32x32xf32>
    %cst_51 = arith.constant 0.000000e+00 : f32
    %187 = vector.broadcast %cst_51 : f32 to vector<32x32xf32>
    %188 = arith.maximumf %186, %187 : vector<32x32xf32>
    %c4_i32 = arith.constant 4 : i32
    %189 = vector.broadcast %c4_i32 : i32 to vector<32x1xi32>
    %190 = arith.cmpi sge, %1, %189 : vector<32x1xi32>
    %191 = arith.extui %190 : vector<32x1xi1> to vector<32x1xi32>
    %192 = arith.sitofp %191 : vector<32x1xi32> to vector<32x1xf32>
    %c12_i32_52 = arith.constant 12 : i32
    %193 = vector.broadcast %c12_i32_52 : i32 to vector<32x1xi32>
    %194 = arith.cmpi slt, %1, %193 : vector<32x1xi32>
    %195 = arith.extui %194 : vector<32x1xi1> to vector<32x1xi32>
    %196 = arith.sitofp %195 : vector<32x1xi32> to vector<32x1xf32>
    %cst_53 = arith.constant 0.000000e+00 : f32
    %197 = vector.broadcast %cst_53 : f32 to vector<4x32xf32>
    %198 = vector.extract_strided_slice %188 {offsets = [0, 0], sizes = [28, 32], strides = [1, 1]} : vector<32x32xf32> to vector<28x32xf32>
    %199 = tpu.concatenate %197, %198 in 0 : vector<4x32xf32>, vector<28x32xf32> -> vector<32x32xf32>
    %200 = vector.broadcast %192 : vector<32x1xf32> to vector<32x32xf32>
    %201 = arith.mulf %199, %200 : vector<32x32xf32>
    %202 = vector.extract_strided_slice %188 {offsets = [4, 0], sizes = [28, 32], strides = [1, 1]} : vector<32x32xf32> to vector<28x32xf32>
    %cst_54 = arith.constant 0.000000e+00 : f32
    %203 = vector.broadcast %cst_54 : f32 to vector<4x32xf32>
    %204 = tpu.concatenate %202, %203 in 0 : vector<28x32xf32>, vector<4x32xf32> -> vector<32x32xf32>
    %205 = vector.broadcast %196 : vector<32x1xf32> to vector<32x32xf32>
    %206 = arith.mulf %204, %205 : vector<32x32xf32>
    %207 = tpu.concatenate %201, %188, %206 in 1 : vector<32x32xf32>, vector<32x32xf32>, vector<32x32xf32> -> vector<32x96xf32>
    %c448 = arith.constant 448 : index
    %c0_55 = arith.constant 0 : index
    %208 = vector.load %arg3[%c448, %c0_55] : memref<1200x32xf32, #tpu.memory_space<vmem>>, vector<96x32xf32>
    %cst_56 = arith.constant dense<0.000000e+00> : vector<32x32xf32>
    %209 = tpu.matmul %207, %208, %cst_56 {dimension_numbers = #tpu.dot_dimension_numbers<[1], [0], [0], [1], [0, 0, 1, 1], [], []>} : vector<32x96xf32>, vector<96x32xf32>, vector<32x32xf32> -> vector<32x32xf32>
    %c11 = arith.constant 11 : index
    %c0_57 = arith.constant 0 : index
    %210 = vector.load %arg4[%c11, %c0_57] : memref<23x32xf32, #tpu.memory_space<vmem>>, vector<1x32xf32>
    %211 = vector.broadcast %210 : vector<1x32xf32> to vector<32x32xf32>
    %212 = arith.addf %209, %211 : vector<32x32xf32>
    %cst_58 = arith.constant 0.000000e+00 : f32
    %213 = vector.broadcast %cst_58 : f32 to vector<32x32xf32>
    %214 = arith.maximumf %212, %213 : vector<32x32xf32>
    %c4_i32_59 = arith.constant 4 : i32
    %215 = vector.broadcast %c4_i32_59 : i32 to vector<32x1xi32>
    %216 = arith.cmpi sge, %1, %215 : vector<32x1xi32>
    %217 = arith.extui %216 : vector<32x1xi1> to vector<32x1xi32>
    %218 = arith.sitofp %217 : vector<32x1xi32> to vector<32x1xf32>
    %c12_i32_60 = arith.constant 12 : i32
    %219 = vector.broadcast %c12_i32_60 : i32 to vector<32x1xi32>
    %220 = arith.cmpi slt, %1, %219 : vector<32x1xi32>
    %221 = arith.extui %220 : vector<32x1xi1> to vector<32x1xi32>
    %222 = arith.sitofp %221 : vector<32x1xi32> to vector<32x1xf32>
    %cst_61 = arith.constant 0.000000e+00 : f32
    %223 = vector.broadcast %cst_61 : f32 to vector<4x32xf32>
    %224 = vector.extract_strided_slice %214 {offsets = [0, 0], sizes = [28, 32], strides = [1, 1]} : vector<32x32xf32> to vector<28x32xf32>
    %225 = tpu.concatenate %223, %224 in 0 : vector<4x32xf32>, vector<28x32xf32> -> vector<32x32xf32>
    %226 = vector.broadcast %218 : vector<32x1xf32> to vector<32x32xf32>
    %227 = arith.mulf %225, %226 : vector<32x32xf32>
    %228 = vector.extract_strided_slice %214 {offsets = [4, 0], sizes = [28, 32], strides = [1, 1]} : vector<32x32xf32> to vector<28x32xf32>
    %cst_62 = arith.constant 0.000000e+00 : f32
    %229 = vector.broadcast %cst_62 : f32 to vector<4x32xf32>
    %230 = tpu.concatenate %228, %229 in 0 : vector<28x32xf32>, vector<4x32xf32> -> vector<32x32xf32>
    %231 = vector.broadcast %222 : vector<32x1xf32> to vector<32x32xf32>
    %232 = arith.mulf %230, %231 : vector<32x32xf32>
    %233 = tpu.concatenate %227, %214, %232 in 1 : vector<32x32xf32>, vector<32x32xf32>, vector<32x32xf32> -> vector<32x96xf32>
    %c544 = arith.constant 544 : index
    %c0_63 = arith.constant 0 : index
    %234 = vector.load %arg3[%c544, %c0_63] : memref<1200x32xf32, #tpu.memory_space<vmem>>, vector<96x32xf32>
    %cst_64 = arith.constant dense<0.000000e+00> : vector<32x32xf32>
    %235 = tpu.matmul %233, %234, %cst_64 {dimension_numbers = #tpu.dot_dimension_numbers<[1], [0], [0], [1], [0, 0, 1, 1], [], []>} : vector<32x96xf32>, vector<96x32xf32>, vector<32x32xf32> -> vector<32x32xf32>
    %c12 = arith.constant 12 : index
    %c0_65 = arith.constant 0 : index
    %236 = vector.load %arg4[%c12, %c0_65] : memref<23x32xf32, #tpu.memory_space<vmem>>, vector<1x32xf32>
    %237 = vector.broadcast %236 : vector<1x32xf32> to vector<32x32xf32>
    %238 = arith.addf %235, %237 : vector<32x32xf32>
    %239 = arith.addf %238, %180 : vector<32x32xf32>
    %240 = vector.extract_strided_slice %239 {offsets = [4, 0], sizes = [28, 32], strides = [1, 1]} : vector<32x32xf32> to vector<28x32xf32>
    %cst_66 = arith.constant 0.000000e+00 : f32
    %241 = vector.broadcast %cst_66 : f32 to vector<4x32xf32>
    %242 = tpu.concatenate %240, %241 in 0 : vector<28x32xf32>, vector<4x32xf32> -> vector<32x32xf32>
    %243 = vector.extract_strided_slice %239 {offsets = [8, 0], sizes = [24, 32], strides = [1, 1]} : vector<32x32xf32> to vector<24x32xf32>
    %cst_67 = arith.constant 0.000000e+00 : f32
    %244 = vector.broadcast %cst_67 : f32 to vector<8x32xf32>
    %245 = tpu.concatenate %243, %244 in 0 : vector<24x32xf32>, vector<8x32xf32> -> vector<32x32xf32>
    %c8_i32 = arith.constant 8 : i32
    %246 = vector.broadcast %c8_i32 : i32 to vector<32x1xi32>
    %247 = arith.cmpi slt, %1, %246 : vector<32x1xi32>
    %248 = arith.extui %247 : vector<32x1xi1> to vector<32x1xi32>
    %249 = arith.sitofp %248 : vector<32x1xi32> to vector<32x1xf32>
    %250 = vector.broadcast %249 : vector<32x1xf32> to vector<32x32xf32>
    %251 = arith.mulf %245, %250 : vector<32x32xf32>
    %252 = arith.maximumf %239, %242 : vector<32x32xf32>
    %253 = arith.maximumf %252, %251 : vector<32x32xf32>
    %c13 = arith.constant 13 : index
    %c0_68 = arith.constant 0 : index
    %254 = vector.load %arg4[%c13, %c0_68] : memref<23x32xf32, #tpu.memory_space<vmem>>, vector<1x32xf32>
    %255 = vector.broadcast %254 : vector<1x32xf32> to vector<32x32xf32>
    %256 = arith.mulf %253, %255 : vector<32x32xf32>
    %c14 = arith.constant 14 : index
    %c0_69 = arith.constant 0 : index
    %257 = vector.load %arg4[%c14, %c0_69] : memref<23x32xf32, #tpu.memory_space<vmem>>, vector<1x32xf32>
    %258 = vector.broadcast %257 : vector<1x32xf32> to vector<32x32xf32>
    %259 = arith.addf %256, %258 : vector<32x32xf32>
    %cst_70 = arith.constant 0.000000e+00 : f32
    %260 = vector.broadcast %cst_70 : f32 to vector<32x32xf32>
    %261 = arith.maximumf %259, %260 : vector<32x32xf32>
    %c8_i32_71 = arith.constant 8 : i32
    %262 = vector.broadcast %c8_i32_71 : i32 to vector<32x1xi32>
    %263 = arith.cmpi sge, %1, %262 : vector<32x1xi32>
    %264 = arith.extui %263 : vector<32x1xi1> to vector<32x1xi32>
    %265 = arith.sitofp %264 : vector<32x1xi32> to vector<32x1xf32>
    %c8_i32_72 = arith.constant 8 : i32
    %266 = vector.broadcast %c8_i32_72 : i32 to vector<32x1xi32>
    %267 = arith.cmpi slt, %1, %266 : vector<32x1xi32>
    %268 = arith.extui %267 : vector<32x1xi1> to vector<32x1xi32>
    %269 = arith.sitofp %268 : vector<32x1xi32> to vector<32x1xf32>
    %cst_73 = arith.constant 0.000000e+00 : f32
    %270 = vector.broadcast %cst_73 : f32 to vector<8x32xf32>
    %271 = vector.extract_strided_slice %261 {offsets = [0, 0], sizes = [24, 32], strides = [1, 1]} : vector<32x32xf32> to vector<24x32xf32>
    %272 = tpu.concatenate %270, %271 in 0 : vector<8x32xf32>, vector<24x32xf32> -> vector<32x32xf32>
    %273 = vector.broadcast %265 : vector<32x1xf32> to vector<32x32xf32>
    %274 = arith.mulf %272, %273 : vector<32x32xf32>
    %275 = vector.extract_strided_slice %261 {offsets = [8, 0], sizes = [24, 32], strides = [1, 1]} : vector<32x32xf32> to vector<24x32xf32>
    %cst_74 = arith.constant 0.000000e+00 : f32
    %276 = vector.broadcast %cst_74 : f32 to vector<8x32xf32>
    %277 = tpu.concatenate %275, %276 in 0 : vector<24x32xf32>, vector<8x32xf32> -> vector<32x32xf32>
    %278 = vector.broadcast %269 : vector<32x1xf32> to vector<32x32xf32>
    %279 = arith.mulf %277, %278 : vector<32x32xf32>
    %280 = tpu.concatenate %274, %261, %279 in 1 : vector<32x32xf32>, vector<32x32xf32>, vector<32x32xf32> -> vector<32x96xf32>
    %c640 = arith.constant 640 : index
    %c0_75 = arith.constant 0 : index
    %281 = vector.load %arg3[%c640, %c0_75] : memref<1200x32xf32, #tpu.memory_space<vmem>>, vector<96x32xf32>
    %cst_76 = arith.constant dense<0.000000e+00> : vector<32x32xf32>
    %282 = tpu.matmul %280, %281, %cst_76 {dimension_numbers = #tpu.dot_dimension_numbers<[1], [0], [0], [1], [0, 0, 1, 1], [], []>} : vector<32x96xf32>, vector<96x32xf32>, vector<32x32xf32> -> vector<32x32xf32>
    %c15 = arith.constant 15 : index
    %c0_77 = arith.constant 0 : index
    %283 = vector.load %arg4[%c15, %c0_77] : memref<23x32xf32, #tpu.memory_space<vmem>>, vector<1x32xf32>
    %284 = vector.broadcast %283 : vector<1x32xf32> to vector<32x32xf32>
    %285 = arith.addf %282, %284 : vector<32x32xf32>
    %cst_78 = arith.constant 0.000000e+00 : f32
    %286 = vector.broadcast %cst_78 : f32 to vector<32x32xf32>
    %287 = arith.maximumf %285, %286 : vector<32x32xf32>
    %c8_i32_79 = arith.constant 8 : i32
    %288 = vector.broadcast %c8_i32_79 : i32 to vector<32x1xi32>
    %289 = arith.cmpi sge, %1, %288 : vector<32x1xi32>
    %290 = arith.extui %289 : vector<32x1xi1> to vector<32x1xi32>
    %291 = arith.sitofp %290 : vector<32x1xi32> to vector<32x1xf32>
    %c8_i32_80 = arith.constant 8 : i32
    %292 = vector.broadcast %c8_i32_80 : i32 to vector<32x1xi32>
    %293 = arith.cmpi slt, %1, %292 : vector<32x1xi32>
    %294 = arith.extui %293 : vector<32x1xi1> to vector<32x1xi32>
    %295 = arith.sitofp %294 : vector<32x1xi32> to vector<32x1xf32>
    %cst_81 = arith.constant 0.000000e+00 : f32
    %296 = vector.broadcast %cst_81 : f32 to vector<8x32xf32>
    %297 = vector.extract_strided_slice %287 {offsets = [0, 0], sizes = [24, 32], strides = [1, 1]} : vector<32x32xf32> to vector<24x32xf32>
    %298 = tpu.concatenate %296, %297 in 0 : vector<8x32xf32>, vector<24x32xf32> -> vector<32x32xf32>
    %299 = vector.broadcast %291 : vector<32x1xf32> to vector<32x32xf32>
    %300 = arith.mulf %298, %299 : vector<32x32xf32>
    %301 = vector.extract_strided_slice %287 {offsets = [8, 0], sizes = [24, 32], strides = [1, 1]} : vector<32x32xf32> to vector<24x32xf32>
    %cst_82 = arith.constant 0.000000e+00 : f32
    %302 = vector.broadcast %cst_82 : f32 to vector<8x32xf32>
    %303 = tpu.concatenate %301, %302 in 0 : vector<24x32xf32>, vector<8x32xf32> -> vector<32x32xf32>
    %304 = vector.broadcast %295 : vector<32x1xf32> to vector<32x32xf32>
    %305 = arith.mulf %303, %304 : vector<32x32xf32>
    %306 = tpu.concatenate %300, %287, %305 in 1 : vector<32x32xf32>, vector<32x32xf32>, vector<32x32xf32> -> vector<32x96xf32>
    %c736 = arith.constant 736 : index
    %c0_83 = arith.constant 0 : index
    %307 = vector.load %arg3[%c736, %c0_83] : memref<1200x32xf32, #tpu.memory_space<vmem>>, vector<96x32xf32>
    %cst_84 = arith.constant dense<0.000000e+00> : vector<32x32xf32>
    %308 = tpu.matmul %306, %307, %cst_84 {dimension_numbers = #tpu.dot_dimension_numbers<[1], [0], [0], [1], [0, 0, 1, 1], [], []>} : vector<32x96xf32>, vector<96x32xf32>, vector<32x32xf32> -> vector<32x32xf32>
    %c16 = arith.constant 16 : index
    %c0_85 = arith.constant 0 : index
    %309 = vector.load %arg4[%c16, %c0_85] : memref<23x32xf32, #tpu.memory_space<vmem>>, vector<1x32xf32>
    %310 = vector.broadcast %309 : vector<1x32xf32> to vector<32x32xf32>
    %311 = arith.addf %308, %310 : vector<32x32xf32>
    %312 = arith.addf %311, %253 : vector<32x32xf32>
    %313 = vector.extract_strided_slice %312 {offsets = [0, 0], sizes = [1, 32], strides = [1, 1]} : vector<32x32xf32> to vector<1x32xf32>
    %314 = vector.extract_strided_slice %312 {offsets = [8, 0], sizes = [1, 32], strides = [1, 1]} : vector<32x32xf32> to vector<1x32xf32>
    %315 = tpu.concatenate %313, %314 in 1 : vector<1x32xf32>, vector<1x32xf32> -> vector<1x64xf32>
    %316 = vector.extract_strided_slice %312 {offsets = [16, 0], sizes = [1, 32], strides = [1, 1]} : vector<32x32xf32> to vector<1x32xf32>
    %317 = vector.extract_strided_slice %312 {offsets = [24, 0], sizes = [1, 32], strides = [1, 1]} : vector<32x32xf32> to vector<1x32xf32>
    %318 = tpu.concatenate %316, %317 in 1 : vector<1x32xf32>, vector<1x32xf32> -> vector<1x64xf32>
    %319 = tpu.concatenate %315, %318 in 0 : vector<1x64xf32>, vector<1x64xf32> -> vector<2x64xf32>
    %c832 = arith.constant 832 : index
    %c0_86 = arith.constant 0 : index
    %320 = vector.load %arg3[%c832, %c0_86] : memref<1200x32xf32, #tpu.memory_space<vmem>>, vector<64x32xf32>
    %cst_87 = arith.constant dense<0.000000e+00> : vector<2x32xf32>
    %321 = tpu.matmul %319, %320, %cst_87 {dimension_numbers = #tpu.dot_dimension_numbers<[1], [0], [0], [1], [0, 0, 1, 1], [], []>} : vector<2x64xf32>, vector<64x32xf32>, vector<2x32xf32> -> vector<2x32xf32>
    %c17 = arith.constant 17 : index
    %c0_88 = arith.constant 0 : index
    %322 = vector.load %arg4[%c17, %c0_88] : memref<23x32xf32, #tpu.memory_space<vmem>>, vector<1x32xf32>
    %323 = vector.broadcast %322 : vector<1x32xf32> to vector<2x32xf32>
    %324 = arith.addf %321, %323 : vector<2x32xf32>
    %cst_89 = arith.constant 0.000000e+00 : f32
    %325 = vector.broadcast %cst_89 : f32 to vector<2x32xf32>
    %326 = arith.maximumf %324, %325 : vector<2x32xf32>
    %c0_90 = arith.constant 0 : index
    %c0_91 = arith.constant 0 : index
    %327 = vector.load %arg2[%c0_90, %c0_91] : memref<2x32xi32, #tpu.memory_space<vmem>>, vector<2x32xi32>
    %328 = tpu.iota {dimensions = array<i32: 1>} : vector<4x20xi32>
    %c896 = arith.constant 896 : index
    %c0_92 = arith.constant 0 : index
    %329 = vector.load %arg3[%c896, %c0_92] : memref<1200x32xf32, #tpu.memory_space<vmem>>, vector<128x32xf32>
    %cst_93 = arith.constant 0.000000e+00 : f32
    %330 = vector.broadcast %cst_93 : f32 to vector<4x32xf32>
    %331 = vector.extract_strided_slice %327 {offsets = [0, 0], sizes = [2, 1], strides = [1, 1]} : vector<2x32xi32> to vector<2x1xi32>
    %332 = vector.extract_strided_slice %327 {offsets = [0, 16], sizes = [2, 1], strides = [1, 1]} : vector<2x32xi32> to vector<2x1xi32>
    %333 = tpu.concatenate %331, %332 in 0 : vector<2x1xi32>, vector<2x1xi32> -> vector<4x1xi32>
    %334 = vector.broadcast %333 : vector<4x1xi32> to vector<4x20xi32>
    %335 = arith.cmpi eq, %328, %334 : vector<4x20xi32>
    %336 = arith.extui %335 : vector<4x20xi1> to vector<4x20xi32>
    %337 = arith.sitofp %336 : vector<4x20xi32> to vector<4x20xf32>
    %cst_94 = arith.constant dense<0.000000e+00> : vector<4x8xf32>
    %338 = tpu.matmul %337, %2, %cst_94 {dimension_numbers = #tpu.dot_dimension_numbers<[1], [0], [0], [1], [0, 0, 1, 1], [], []>} : vector<4x20xf32>, vector<20x8xf32>, vector<4x8xf32> -> vector<4x8xf32>
    %339 = vector.extract_strided_slice %329 {offsets = [0, 0], sizes = [8, 32], strides = [1, 1]} : vector<128x32xf32> to vector<8x32xf32>
    %cst_95 = arith.constant dense<0.000000e+00> : vector<4x32xf32>
    %340 = tpu.matmul %338, %339, %cst_95 {dimension_numbers = #tpu.dot_dimension_numbers<[1], [0], [0], [1], [0, 0, 1, 1], [], []>} : vector<4x8xf32>, vector<8x32xf32>, vector<4x32xf32> -> vector<4x32xf32>
    %341 = arith.addf %330, %340 : vector<4x32xf32>
    %342 = vector.extract_strided_slice %327 {offsets = [0, 1], sizes = [2, 1], strides = [1, 1]} : vector<2x32xi32> to vector<2x1xi32>
    %343 = vector.extract_strided_slice %327 {offsets = [0, 17], sizes = [2, 1], strides = [1, 1]} : vector<2x32xi32> to vector<2x1xi32>
    %344 = tpu.concatenate %342, %343 in 0 : vector<2x1xi32>, vector<2x1xi32> -> vector<4x1xi32>
    %345 = vector.broadcast %344 : vector<4x1xi32> to vector<4x20xi32>
    %346 = arith.cmpi eq, %328, %345 : vector<4x20xi32>
    %347 = arith.extui %346 : vector<4x20xi1> to vector<4x20xi32>
    %348 = arith.sitofp %347 : vector<4x20xi32> to vector<4x20xf32>
    %cst_96 = arith.constant dense<0.000000e+00> : vector<4x8xf32>
    %349 = tpu.matmul %348, %2, %cst_96 {dimension_numbers = #tpu.dot_dimension_numbers<[1], [0], [0], [1], [0, 0, 1, 1], [], []>} : vector<4x20xf32>, vector<20x8xf32>, vector<4x8xf32> -> vector<4x8xf32>
    %350 = vector.extract_strided_slice %329 {offsets = [8, 0], sizes = [8, 32], strides = [1, 1]} : vector<128x32xf32> to vector<8x32xf32>
    %cst_97 = arith.constant dense<0.000000e+00> : vector<4x32xf32>
    %351 = tpu.matmul %349, %350, %cst_97 {dimension_numbers = #tpu.dot_dimension_numbers<[1], [0], [0], [1], [0, 0, 1, 1], [], []>} : vector<4x8xf32>, vector<8x32xf32>, vector<4x32xf32> -> vector<4x32xf32>
    %352 = arith.addf %341, %351 : vector<4x32xf32>
    %353 = vector.extract_strided_slice %327 {offsets = [0, 2], sizes = [2, 1], strides = [1, 1]} : vector<2x32xi32> to vector<2x1xi32>
    %354 = vector.extract_strided_slice %327 {offsets = [0, 18], sizes = [2, 1], strides = [1, 1]} : vector<2x32xi32> to vector<2x1xi32>
    %355 = tpu.concatenate %353, %354 in 0 : vector<2x1xi32>, vector<2x1xi32> -> vector<4x1xi32>
    %356 = vector.broadcast %355 : vector<4x1xi32> to vector<4x20xi32>
    %357 = arith.cmpi eq, %328, %356 : vector<4x20xi32>
    %358 = arith.extui %357 : vector<4x20xi1> to vector<4x20xi32>
    %359 = arith.sitofp %358 : vector<4x20xi32> to vector<4x20xf32>
    %cst_98 = arith.constant dense<0.000000e+00> : vector<4x8xf32>
    %360 = tpu.matmul %359, %2, %cst_98 {dimension_numbers = #tpu.dot_dimension_numbers<[1], [0], [0], [1], [0, 0, 1, 1], [], []>} : vector<4x20xf32>, vector<20x8xf32>, vector<4x8xf32> -> vector<4x8xf32>
    %361 = vector.extract_strided_slice %329 {offsets = [16, 0], sizes = [8, 32], strides = [1, 1]} : vector<128x32xf32> to vector<8x32xf32>
    %cst_99 = arith.constant dense<0.000000e+00> : vector<4x32xf32>
    %362 = tpu.matmul %360, %361, %cst_99 {dimension_numbers = #tpu.dot_dimension_numbers<[1], [0], [0], [1], [0, 0, 1, 1], [], []>} : vector<4x8xf32>, vector<8x32xf32>, vector<4x32xf32> -> vector<4x32xf32>
    %363 = arith.addf %352, %362 : vector<4x32xf32>
    %364 = vector.extract_strided_slice %327 {offsets = [0, 3], sizes = [2, 1], strides = [1, 1]} : vector<2x32xi32> to vector<2x1xi32>
    %365 = vector.extract_strided_slice %327 {offsets = [0, 19], sizes = [2, 1], strides = [1, 1]} : vector<2x32xi32> to vector<2x1xi32>
    %366 = tpu.concatenate %364, %365 in 0 : vector<2x1xi32>, vector<2x1xi32> -> vector<4x1xi32>
    %367 = vector.broadcast %366 : vector<4x1xi32> to vector<4x20xi32>
    %368 = arith.cmpi eq, %328, %367 : vector<4x20xi32>
    %369 = arith.extui %368 : vector<4x20xi1> to vector<4x20xi32>
    %370 = arith.sitofp %369 : vector<4x20xi32> to vector<4x20xf32>
    %cst_100 = arith.constant dense<0.000000e+00> : vector<4x8xf32>
    %371 = tpu.matmul %370, %2, %cst_100 {dimension_numbers = #tpu.dot_dimension_numbers<[1], [0], [0], [1], [0, 0, 1, 1], [], []>} : vector<4x20xf32>, vector<20x8xf32>, vector<4x8xf32> -> vector<4x8xf32>
    %372 = vector.extract_strided_slice %329 {offsets = [24, 0], sizes = [8, 32], strides = [1, 1]} : vector<128x32xf32> to vector<8x32xf32>
    %cst_101 = arith.constant dense<0.000000e+00> : vector<4x32xf32>
    %373 = tpu.matmul %371, %372, %cst_101 {dimension_numbers = #tpu.dot_dimension_numbers<[1], [0], [0], [1], [0, 0, 1, 1], [], []>} : vector<4x8xf32>, vector<8x32xf32>, vector<4x32xf32> -> vector<4x32xf32>
    %374 = arith.addf %363, %373 : vector<4x32xf32>
    %375 = vector.extract_strided_slice %327 {offsets = [0, 4], sizes = [2, 1], strides = [1, 1]} : vector<2x32xi32> to vector<2x1xi32>
    %376 = vector.extract_strided_slice %327 {offsets = [0, 20], sizes = [2, 1], strides = [1, 1]} : vector<2x32xi32> to vector<2x1xi32>
    %377 = tpu.concatenate %375, %376 in 0 : vector<2x1xi32>, vector<2x1xi32> -> vector<4x1xi32>
    %378 = vector.broadcast %377 : vector<4x1xi32> to vector<4x20xi32>
    %379 = arith.cmpi eq, %328, %378 : vector<4x20xi32>
    %380 = arith.extui %379 : vector<4x20xi1> to vector<4x20xi32>
    %381 = arith.sitofp %380 : vector<4x20xi32> to vector<4x20xf32>
    %cst_102 = arith.constant dense<0.000000e+00> : vector<4x8xf32>
    %382 = tpu.matmul %381, %2, %cst_102 {dimension_numbers = #tpu.dot_dimension_numbers<[1], [0], [0], [1], [0, 0, 1, 1], [], []>} : vector<4x20xf32>, vector<20x8xf32>, vector<4x8xf32> -> vector<4x8xf32>
    %383 = vector.extract_strided_slice %329 {offsets = [32, 0], sizes = [8, 32], strides = [1, 1]} : vector<128x32xf32> to vector<8x32xf32>
    %cst_103 = arith.constant dense<0.000000e+00> : vector<4x32xf32>
    %384 = tpu.matmul %382, %383, %cst_103 {dimension_numbers = #tpu.dot_dimension_numbers<[1], [0], [0], [1], [0, 0, 1, 1], [], []>} : vector<4x8xf32>, vector<8x32xf32>, vector<4x32xf32> -> vector<4x32xf32>
    %385 = arith.addf %374, %384 : vector<4x32xf32>
    %386 = vector.extract_strided_slice %327 {offsets = [0, 5], sizes = [2, 1], strides = [1, 1]} : vector<2x32xi32> to vector<2x1xi32>
    %387 = vector.extract_strided_slice %327 {offsets = [0, 21], sizes = [2, 1], strides = [1, 1]} : vector<2x32xi32> to vector<2x1xi32>
    %388 = tpu.concatenate %386, %387 in 0 : vector<2x1xi32>, vector<2x1xi32> -> vector<4x1xi32>
    %389 = vector.broadcast %388 : vector<4x1xi32> to vector<4x20xi32>
    %390 = arith.cmpi eq, %328, %389 : vector<4x20xi32>
    %391 = arith.extui %390 : vector<4x20xi1> to vector<4x20xi32>
    %392 = arith.sitofp %391 : vector<4x20xi32> to vector<4x20xf32>
    %cst_104 = arith.constant dense<0.000000e+00> : vector<4x8xf32>
    %393 = tpu.matmul %392, %2, %cst_104 {dimension_numbers = #tpu.dot_dimension_numbers<[1], [0], [0], [1], [0, 0, 1, 1], [], []>} : vector<4x20xf32>, vector<20x8xf32>, vector<4x8xf32> -> vector<4x8xf32>
    %394 = vector.extract_strided_slice %329 {offsets = [40, 0], sizes = [8, 32], strides = [1, 1]} : vector<128x32xf32> to vector<8x32xf32>
    %cst_105 = arith.constant dense<0.000000e+00> : vector<4x32xf32>
    %395 = tpu.matmul %393, %394, %cst_105 {dimension_numbers = #tpu.dot_dimension_numbers<[1], [0], [0], [1], [0, 0, 1, 1], [], []>} : vector<4x8xf32>, vector<8x32xf32>, vector<4x32xf32> -> vector<4x32xf32>
    %396 = arith.addf %385, %395 : vector<4x32xf32>
    %397 = vector.extract_strided_slice %327 {offsets = [0, 6], sizes = [2, 1], strides = [1, 1]} : vector<2x32xi32> to vector<2x1xi32>
    %398 = vector.extract_strided_slice %327 {offsets = [0, 22], sizes = [2, 1], strides = [1, 1]} : vector<2x32xi32> to vector<2x1xi32>
    %399 = tpu.concatenate %397, %398 in 0 : vector<2x1xi32>, vector<2x1xi32> -> vector<4x1xi32>
    %400 = vector.broadcast %399 : vector<4x1xi32> to vector<4x20xi32>
    %401 = arith.cmpi eq, %328, %400 : vector<4x20xi32>
    %402 = arith.extui %401 : vector<4x20xi1> to vector<4x20xi32>
    %403 = arith.sitofp %402 : vector<4x20xi32> to vector<4x20xf32>
    %cst_106 = arith.constant dense<0.000000e+00> : vector<4x8xf32>
    %404 = tpu.matmul %403, %2, %cst_106 {dimension_numbers = #tpu.dot_dimension_numbers<[1], [0], [0], [1], [0, 0, 1, 1], [], []>} : vector<4x20xf32>, vector<20x8xf32>, vector<4x8xf32> -> vector<4x8xf32>
    %405 = vector.extract_strided_slice %329 {offsets = [48, 0], sizes = [8, 32], strides = [1, 1]} : vector<128x32xf32> to vector<8x32xf32>
    %cst_107 = arith.constant dense<0.000000e+00> : vector<4x32xf32>
    %406 = tpu.matmul %404, %405, %cst_107 {dimension_numbers = #tpu.dot_dimension_numbers<[1], [0], [0], [1], [0, 0, 1, 1], [], []>} : vector<4x8xf32>, vector<8x32xf32>, vector<4x32xf32> -> vector<4x32xf32>
    %407 = arith.addf %396, %406 : vector<4x32xf32>
    %408 = vector.extract_strided_slice %327 {offsets = [0, 7], sizes = [2, 1], strides = [1, 1]} : vector<2x32xi32> to vector<2x1xi32>
    %409 = vector.extract_strided_slice %327 {offsets = [0, 23], sizes = [2, 1], strides = [1, 1]} : vector<2x32xi32> to vector<2x1xi32>
    %410 = tpu.concatenate %408, %409 in 0 : vector<2x1xi32>, vector<2x1xi32> -> vector<4x1xi32>
    %411 = vector.broadcast %410 : vector<4x1xi32> to vector<4x20xi32>
    %412 = arith.cmpi eq, %328, %411 : vector<4x20xi32>
    %413 = arith.extui %412 : vector<4x20xi1> to vector<4x20xi32>
    %414 = arith.sitofp %413 : vector<4x20xi32> to vector<4x20xf32>
    %cst_108 = arith.constant dense<0.000000e+00> : vector<4x8xf32>
    %415 = tpu.matmul %414, %2, %cst_108 {dimension_numbers = #tpu.dot_dimension_numbers<[1], [0], [0], [1], [0, 0, 1, 1], [], []>} : vector<4x20xf32>, vector<20x8xf32>, vector<4x8xf32> -> vector<4x8xf32>
    %416 = vector.extract_strided_slice %329 {offsets = [56, 0], sizes = [8, 32], strides = [1, 1]} : vector<128x32xf32> to vector<8x32xf32>
    %cst_109 = arith.constant dense<0.000000e+00> : vector<4x32xf32>
    %417 = tpu.matmul %415, %416, %cst_109 {dimension_numbers = #tpu.dot_dimension_numbers<[1], [0], [0], [1], [0, 0, 1, 1], [], []>} : vector<4x8xf32>, vector<8x32xf32>, vector<4x32xf32> -> vector<4x32xf32>
    %418 = arith.addf %407, %417 : vector<4x32xf32>
    %419 = vector.extract_strided_slice %327 {offsets = [0, 8], sizes = [2, 1], strides = [1, 1]} : vector<2x32xi32> to vector<2x1xi32>
    %420 = vector.extract_strided_slice %327 {offsets = [0, 24], sizes = [2, 1], strides = [1, 1]} : vector<2x32xi32> to vector<2x1xi32>
    %421 = tpu.concatenate %419, %420 in 0 : vector<2x1xi32>, vector<2x1xi32> -> vector<4x1xi32>
    %422 = vector.broadcast %421 : vector<4x1xi32> to vector<4x20xi32>
    %423 = arith.cmpi eq, %328, %422 : vector<4x20xi32>
    %424 = arith.extui %423 : vector<4x20xi1> to vector<4x20xi32>
    %425 = arith.sitofp %424 : vector<4x20xi32> to vector<4x20xf32>
    %cst_110 = arith.constant dense<0.000000e+00> : vector<4x8xf32>
    %426 = tpu.matmul %425, %2, %cst_110 {dimension_numbers = #tpu.dot_dimension_numbers<[1], [0], [0], [1], [0, 0, 1, 1], [], []>} : vector<4x20xf32>, vector<20x8xf32>, vector<4x8xf32> -> vector<4x8xf32>
    %427 = vector.extract_strided_slice %329 {offsets = [64, 0], sizes = [8, 32], strides = [1, 1]} : vector<128x32xf32> to vector<8x32xf32>
    %cst_111 = arith.constant dense<0.000000e+00> : vector<4x32xf32>
    %428 = tpu.matmul %426, %427, %cst_111 {dimension_numbers = #tpu.dot_dimension_numbers<[1], [0], [0], [1], [0, 0, 1, 1], [], []>} : vector<4x8xf32>, vector<8x32xf32>, vector<4x32xf32> -> vector<4x32xf32>
    %429 = arith.addf %418, %428 : vector<4x32xf32>
    %430 = vector.extract_strided_slice %327 {offsets = [0, 9], sizes = [2, 1], strides = [1, 1]} : vector<2x32xi32> to vector<2x1xi32>
    %431 = vector.extract_strided_slice %327 {offsets = [0, 25], sizes = [2, 1], strides = [1, 1]} : vector<2x32xi32> to vector<2x1xi32>
    %432 = tpu.concatenate %430, %431 in 0 : vector<2x1xi32>, vector<2x1xi32> -> vector<4x1xi32>
    %433 = vector.broadcast %432 : vector<4x1xi32> to vector<4x20xi32>
    %434 = arith.cmpi eq, %328, %433 : vector<4x20xi32>
    %435 = arith.extui %434 : vector<4x20xi1> to vector<4x20xi32>
    %436 = arith.sitofp %435 : vector<4x20xi32> to vector<4x20xf32>
    %cst_112 = arith.constant dense<0.000000e+00> : vector<4x8xf32>
    %437 = tpu.matmul %436, %2, %cst_112 {dimension_numbers = #tpu.dot_dimension_numbers<[1], [0], [0], [1], [0, 0, 1, 1], [], []>} : vector<4x20xf32>, vector<20x8xf32>, vector<4x8xf32> -> vector<4x8xf32>
    %438 = vector.extract_strided_slice %329 {offsets = [72, 0], sizes = [8, 32], strides = [1, 1]} : vector<128x32xf32> to vector<8x32xf32>
    %cst_113 = arith.constant dense<0.000000e+00> : vector<4x32xf32>
    %439 = tpu.matmul %437, %438, %cst_113 {dimension_numbers = #tpu.dot_dimension_numbers<[1], [0], [0], [1], [0, 0, 1, 1], [], []>} : vector<4x8xf32>, vector<8x32xf32>, vector<4x32xf32> -> vector<4x32xf32>
    %440 = arith.addf %429, %439 : vector<4x32xf32>
    %441 = vector.extract_strided_slice %327 {offsets = [0, 10], sizes = [2, 1], strides = [1, 1]} : vector<2x32xi32> to vector<2x1xi32>
    %442 = vector.extract_strided_slice %327 {offsets = [0, 26], sizes = [2, 1], strides = [1, 1]} : vector<2x32xi32> to vector<2x1xi32>
    %443 = tpu.concatenate %441, %442 in 0 : vector<2x1xi32>, vector<2x1xi32> -> vector<4x1xi32>
    %444 = vector.broadcast %443 : vector<4x1xi32> to vector<4x20xi32>
    %445 = arith.cmpi eq, %328, %444 : vector<4x20xi32>
    %446 = arith.extui %445 : vector<4x20xi1> to vector<4x20xi32>
    %447 = arith.sitofp %446 : vector<4x20xi32> to vector<4x20xf32>
    %cst_114 = arith.constant dense<0.000000e+00> : vector<4x8xf32>
    %448 = tpu.matmul %447, %2, %cst_114 {dimension_numbers = #tpu.dot_dimension_numbers<[1], [0], [0], [1], [0, 0, 1, 1], [], []>} : vector<4x20xf32>, vector<20x8xf32>, vector<4x8xf32> -> vector<4x8xf32>
    %449 = vector.extract_strided_slice %329 {offsets = [80, 0], sizes = [8, 32], strides = [1, 1]} : vector<128x32xf32> to vector<8x32xf32>
    %cst_115 = arith.constant dense<0.000000e+00> : vector<4x32xf32>
    %450 = tpu.matmul %448, %449, %cst_115 {dimension_numbers = #tpu.dot_dimension_numbers<[1], [0], [0], [1], [0, 0, 1, 1], [], []>} : vector<4x8xf32>, vector<8x32xf32>, vector<4x32xf32> -> vector<4x32xf32>
    %451 = arith.addf %440, %450 : vector<4x32xf32>
    %452 = vector.extract_strided_slice %327 {offsets = [0, 11], sizes = [2, 1], strides = [1, 1]} : vector<2x32xi32> to vector<2x1xi32>
    %453 = vector.extract_strided_slice %327 {offsets = [0, 27], sizes = [2, 1], strides = [1, 1]} : vector<2x32xi32> to vector<2x1xi32>
    %454 = tpu.concatenate %452, %453 in 0 : vector<2x1xi32>, vector<2x1xi32> -> vector<4x1xi32>
    %455 = vector.broadcast %454 : vector<4x1xi32> to vector<4x20xi32>
    %456 = arith.cmpi eq, %328, %455 : vector<4x20xi32>
    %457 = arith.extui %456 : vector<4x20xi1> to vector<4x20xi32>
    %458 = arith.sitofp %457 : vector<4x20xi32> to vector<4x20xf32>
    %cst_116 = arith.constant dense<0.000000e+00> : vector<4x8xf32>
    %459 = tpu.matmul %458, %2, %cst_116 {dimension_numbers = #tpu.dot_dimension_numbers<[1], [0], [0], [1], [0, 0, 1, 1], [], []>} : vector<4x20xf32>, vector<20x8xf32>, vector<4x8xf32> -> vector<4x8xf32>
    %460 = vector.extract_strided_slice %329 {offsets = [88, 0], sizes = [8, 32], strides = [1, 1]} : vector<128x32xf32> to vector<8x32xf32>
    %cst_117 = arith.constant dense<0.000000e+00> : vector<4x32xf32>
    %461 = tpu.matmul %459, %460, %cst_117 {dimension_numbers = #tpu.dot_dimension_numbers<[1], [0], [0], [1], [0, 0, 1, 1], [], []>} : vector<4x8xf32>, vector<8x32xf32>, vector<4x32xf32> -> vector<4x32xf32>
    %462 = arith.addf %451, %461 : vector<4x32xf32>
    %463 = vector.extract_strided_slice %327 {offsets = [0, 12], sizes = [2, 1], strides = [1, 1]} : vector<2x32xi32> to vector<2x1xi32>
    %464 = vector.extract_strided_slice %327 {offsets = [0, 28], sizes = [2, 1], strides = [1, 1]} : vector<2x32xi32> to vector<2x1xi32>
    %465 = tpu.concatenate %463, %464 in 0 : vector<2x1xi32>, vector<2x1xi32> -> vector<4x1xi32>
    %466 = vector.broadcast %465 : vector<4x1xi32> to vector<4x20xi32>
    %467 = arith.cmpi eq, %328, %466 : vector<4x20xi32>
    %468 = arith.extui %467 : vector<4x20xi1> to vector<4x20xi32>
    %469 = arith.sitofp %468 : vector<4x20xi32> to vector<4x20xf32>
    %cst_118 = arith.constant dense<0.000000e+00> : vector<4x8xf32>
    %470 = tpu.matmul %469, %2, %cst_118 {dimension_numbers = #tpu.dot_dimension_numbers<[1], [0], [0], [1], [0, 0, 1, 1], [], []>} : vector<4x20xf32>, vector<20x8xf32>, vector<4x8xf32> -> vector<4x8xf32>
    %471 = vector.extract_strided_slice %329 {offsets = [96, 0], sizes = [8, 32], strides = [1, 1]} : vector<128x32xf32> to vector<8x32xf32>
    %cst_119 = arith.constant dense<0.000000e+00> : vector<4x32xf32>
    %472 = tpu.matmul %470, %471, %cst_119 {dimension_numbers = #tpu.dot_dimension_numbers<[1], [0], [0], [1], [0, 0, 1, 1], [], []>} : vector<4x8xf32>, vector<8x32xf32>, vector<4x32xf32> -> vector<4x32xf32>
    %473 = arith.addf %462, %472 : vector<4x32xf32>
    %474 = vector.extract_strided_slice %327 {offsets = [0, 13], sizes = [2, 1], strides = [1, 1]} : vector<2x32xi32> to vector<2x1xi32>
    %475 = vector.extract_strided_slice %327 {offsets = [0, 29], sizes = [2, 1], strides = [1, 1]} : vector<2x32xi32> to vector<2x1xi32>
    %476 = tpu.concatenate %474, %475 in 0 : vector<2x1xi32>, vector<2x1xi32> -> vector<4x1xi32>
    %477 = vector.broadcast %476 : vector<4x1xi32> to vector<4x20xi32>
    %478 = arith.cmpi eq, %328, %477 : vector<4x20xi32>
    %479 = arith.extui %478 : vector<4x20xi1> to vector<4x20xi32>
    %480 = arith.sitofp %479 : vector<4x20xi32> to vector<4x20xf32>
    %cst_120 = arith.constant dense<0.000000e+00> : vector<4x8xf32>
    %481 = tpu.matmul %480, %2, %cst_120 {dimension_numbers = #tpu.dot_dimension_numbers<[1], [0], [0], [1], [0, 0, 1, 1], [], []>} : vector<4x20xf32>, vector<20x8xf32>, vector<4x8xf32> -> vector<4x8xf32>
    %482 = vector.extract_strided_slice %329 {offsets = [104, 0], sizes = [8, 32], strides = [1, 1]} : vector<128x32xf32> to vector<8x32xf32>
    %cst_121 = arith.constant dense<0.000000e+00> : vector<4x32xf32>
    %483 = tpu.matmul %481, %482, %cst_121 {dimension_numbers = #tpu.dot_dimension_numbers<[1], [0], [0], [1], [0, 0, 1, 1], [], []>} : vector<4x8xf32>, vector<8x32xf32>, vector<4x32xf32> -> vector<4x32xf32>
    %484 = arith.addf %473, %483 : vector<4x32xf32>
    %485 = vector.extract_strided_slice %327 {offsets = [0, 14], sizes = [2, 1], strides = [1, 1]} : vector<2x32xi32> to vector<2x1xi32>
    %486 = vector.extract_strided_slice %327 {offsets = [0, 30], sizes = [2, 1], strides = [1, 1]} : vector<2x32xi32> to vector<2x1xi32>
    %487 = tpu.concatenate %485, %486 in 0 : vector<2x1xi32>, vector<2x1xi32> -> vector<4x1xi32>
    %488 = vector.broadcast %487 : vector<4x1xi32> to vector<4x20xi32>
    %489 = arith.cmpi eq, %328, %488 : vector<4x20xi32>
    %490 = arith.extui %489 : vector<4x20xi1> to vector<4x20xi32>
    %491 = arith.sitofp %490 : vector<4x20xi32> to vector<4x20xf32>
    %cst_122 = arith.constant dense<0.000000e+00> : vector<4x8xf32>
    %492 = tpu.matmul %491, %2, %cst_122 {dimension_numbers = #tpu.dot_dimension_numbers<[1], [0], [0], [1], [0, 0, 1, 1], [], []>} : vector<4x20xf32>, vector<20x8xf32>, vector<4x8xf32> -> vector<4x8xf32>
    %493 = vector.extract_strided_slice %329 {offsets = [112, 0], sizes = [8, 32], strides = [1, 1]} : vector<128x32xf32> to vector<8x32xf32>
    %cst_123 = arith.constant dense<0.000000e+00> : vector<4x32xf32>
    %494 = tpu.matmul %492, %493, %cst_123 {dimension_numbers = #tpu.dot_dimension_numbers<[1], [0], [0], [1], [0, 0, 1, 1], [], []>} : vector<4x8xf32>, vector<8x32xf32>, vector<4x32xf32> -> vector<4x32xf32>
    %495 = arith.addf %484, %494 : vector<4x32xf32>
    %496 = vector.extract_strided_slice %327 {offsets = [0, 15], sizes = [2, 1], strides = [1, 1]} : vector<2x32xi32> to vector<2x1xi32>
    %497 = vector.extract_strided_slice %327 {offsets = [0, 31], sizes = [2, 1], strides = [1, 1]} : vector<2x32xi32> to vector<2x1xi32>
    %498 = tpu.concatenate %496, %497 in 0 : vector<2x1xi32>, vector<2x1xi32> -> vector<4x1xi32>
    %499 = vector.broadcast %498 : vector<4x1xi32> to vector<4x20xi32>
    %500 = arith.cmpi eq, %328, %499 : vector<4x20xi32>
    %501 = arith.extui %500 : vector<4x20xi1> to vector<4x20xi32>
    %502 = arith.sitofp %501 : vector<4x20xi32> to vector<4x20xf32>
    %cst_124 = arith.constant dense<0.000000e+00> : vector<4x8xf32>
    %503 = tpu.matmul %502, %2, %cst_124 {dimension_numbers = #tpu.dot_dimension_numbers<[1], [0], [0], [1], [0, 0, 1, 1], [], []>} : vector<4x20xf32>, vector<20x8xf32>, vector<4x8xf32> -> vector<4x8xf32>
    %504 = vector.extract_strided_slice %329 {offsets = [120, 0], sizes = [8, 32], strides = [1, 1]} : vector<128x32xf32> to vector<8x32xf32>
    %cst_125 = arith.constant dense<0.000000e+00> : vector<4x32xf32>
    %505 = tpu.matmul %503, %504, %cst_125 {dimension_numbers = #tpu.dot_dimension_numbers<[1], [0], [0], [1], [0, 0, 1, 1], [], []>} : vector<4x8xf32>, vector<8x32xf32>, vector<4x32xf32> -> vector<4x32xf32>
    %506 = arith.addf %495, %505 : vector<4x32xf32>
    %c18 = arith.constant 18 : index
    %c0_126 = arith.constant 0 : index
    %507 = vector.load %arg4[%c18, %c0_126] : memref<23x32xf32, #tpu.memory_space<vmem>>, vector<1x32xf32>
    %508 = vector.broadcast %507 : vector<1x32xf32> to vector<4x32xf32>
    %509 = arith.addf %506, %508 : vector<4x32xf32>
    %cst_127 = arith.constant 0.000000e+00 : f32
    %510 = vector.broadcast %cst_127 : f32 to vector<4x32xf32>
    %511 = arith.maximumf %509, %510 : vector<4x32xf32>
    %c1024 = arith.constant 1024 : index
    %c0_128 = arith.constant 0 : index
    %512 = vector.load %arg3[%c1024, %c0_128] : memref<1200x32xf32, #tpu.memory_space<vmem>>, vector<32x32xf32>
    %cst_129 = arith.constant dense<0.000000e+00> : vector<4x32xf32>
    %513 = tpu.matmul %511, %512, %cst_129 {dimension_numbers = #tpu.dot_dimension_numbers<[1], [0], [0], [1], [0, 0, 1, 1], [], []>} : vector<4x32xf32>, vector<32x32xf32>, vector<4x32xf32> -> vector<4x32xf32>
    %c19 = arith.constant 19 : index
    %c0_130 = arith.constant 0 : index
    %514 = vector.load %arg4[%c19, %c0_130] : memref<23x32xf32, #tpu.memory_space<vmem>>, vector<1x32xf32>
    %515 = vector.broadcast %514 : vector<1x32xf32> to vector<4x32xf32>
    %516 = arith.addf %513, %515 : vector<4x32xf32>
    %cst_131 = arith.constant 0.000000e+00 : f32
    %517 = vector.broadcast %cst_131 : f32 to vector<4x32xf32>
    %518 = arith.maximumf %516, %517 : vector<4x32xf32>
    %c1056 = arith.constant 1056 : index
    %c0_132 = arith.constant 0 : index
    %519 = vector.load %arg3[%c1056, %c0_132] : memref<1200x32xf32, #tpu.memory_space<vmem>>, vector<32x32xf32>
    %cst_133 = arith.constant dense<0.000000e+00> : vector<4x32xf32>
    %520 = tpu.matmul %518, %519, %cst_133 {dimension_numbers = #tpu.dot_dimension_numbers<[1], [0], [0], [1], [0, 0, 1, 1], [], []>} : vector<4x32xf32>, vector<32x32xf32>, vector<4x32xf32> -> vector<4x32xf32>
    %c20 = arith.constant 20 : index
    %c0_134 = arith.constant 0 : index
    %521 = vector.load %arg4[%c20, %c0_134] : memref<23x32xf32, #tpu.memory_space<vmem>>, vector<1x32xf32>
    %522 = vector.broadcast %521 : vector<1x32xf32> to vector<4x32xf32>
    %523 = arith.addf %520, %522 : vector<4x32xf32>
    %524 = vector.extract_strided_slice %523 {offsets = [0, 0], sizes = [2, 32], strides = [1, 1]} : vector<4x32xf32> to vector<2x32xf32>
    %525 = vector.extract_strided_slice %523 {offsets = [2, 0], sizes = [2, 32], strides = [1, 1]} : vector<4x32xf32> to vector<2x32xf32>
    %526 = tpu.concatenate %326, %524, %525 in 1 : vector<2x32xf32>, vector<2x32xf32>, vector<2x32xf32> -> vector<2x96xf32>
    %c1088 = arith.constant 1088 : index
    %c0_135 = arith.constant 0 : index
    %527 = vector.load %arg3[%c1088, %c0_135] : memref<1200x32xf32, #tpu.memory_space<vmem>>, vector<96x4xf32>
    %cst_136 = arith.constant dense<0.000000e+00> : vector<2x4xf32>
    %528 = tpu.matmul %526, %527, %cst_136 {dimension_numbers = #tpu.dot_dimension_numbers<[1], [0], [0], [1], [0, 0, 1, 1], [], []>} : vector<2x96xf32>, vector<96x4xf32>, vector<2x4xf32> -> vector<2x4xf32>
    %c21 = arith.constant 21 : index
    %c0_137 = arith.constant 0 : index
    %529 = vector.load %arg4[%c21, %c0_137] : memref<23x32xf32, #tpu.memory_space<vmem>>, vector<1x4xf32>
    %530 = vector.broadcast %529 : vector<1x4xf32> to vector<2x4xf32>
    %531 = arith.addf %528, %530 : vector<2x4xf32>
    %cst_138 = arith.constant 0.000000e+00 : f32
    %532 = vector.broadcast %cst_138 : f32 to vector<2x4xf32>
    %533 = arith.maximumf %531, %532 : vector<2x4xf32>
    %c1184 = arith.constant 1184 : index
    %c0_139 = arith.constant 0 : index
    %534 = vector.load %arg3[%c1184, %c0_139] : memref<1200x32xf32, #tpu.memory_space<vmem>>, vector<4x4xf32>
    %cst_140 = arith.constant dense<0.000000e+00> : vector<2x4xf32>
    %535 = tpu.matmul %533, %534, %cst_140 {dimension_numbers = #tpu.dot_dimension_numbers<[1], [0], [0], [1], [0, 0, 1, 1], [], []>} : vector<2x4xf32>, vector<4x4xf32>, vector<2x4xf32> -> vector<2x4xf32>
    %c22 = arith.constant 22 : index
    %c0_141 = arith.constant 0 : index
    %536 = vector.load %arg4[%c22, %c0_141] : memref<23x32xf32, #tpu.memory_space<vmem>>, vector<1x4xf32>
    %537 = vector.broadcast %536 : vector<1x4xf32> to vector<2x4xf32>
    %538 = arith.addf %535, %537 : vector<2x4xf32>
    %c0_142 = arith.constant 0 : index
    %c0_143 = arith.constant 0 : index
    %539 = vector.load %arg5[%c0_142, %c0_143] : memref<2x4xf32, #tpu.memory_space<vmem>>, vector<2x4xf32>
    tpu.vector_store %arg5[%c0_142, %c0_143], %538 {strides = array<i32>} : memref<2x4xf32, #tpu.memory_space<vmem>>, vector<2x4xf32>,
    return
  }
  func.func @transform_0(%arg0: i32) -> (i32, i32) {
    %c0_i32 = arith.constant 0 : i32
    %c0_i32_0 = arith.constant 0 : i32
    return %arg0, %c0_i32 : i32, i32
  }
  func.func @transform_1(%arg0: i32) -> (i32, i32) {
    %c0_i32 = arith.constant 0 : i32
    %c0_i32_0 = arith.constant 0 : i32
    return %arg0, %c0_i32 : i32, i32
  }
  func.func @transform_2(%arg0: i32) -> (i32, i32) {
    %c0_i32 = arith.constant 0 : i32
    %c0_i32_0 = arith.constant 0 : i32
    %c0_i32_1 = arith.constant 0 : i32
    return %c0_i32, %c0_i32_0 : i32, i32
  }
  func.func @transform_3(%arg0: i32) -> (i32, i32) {
    %c0_i32 = arith.constant 0 : i32
    %c0_i32_0 = arith.constant 0 : i32
    %c0_i32_1 = arith.constant 0 : i32
    return %c0_i32, %c0_i32_0 : i32, i32
  }
  func.func @transform_4(%arg0: i32) -> (i32, i32) {
    %c0_i32 = arith.constant 0 : i32
    %c0_i32_0 = arith.constant 0 : i32
    return %arg0, %c0_i32 : i32, i32
  }
}

</mosaic_0001>

<bundles_post_ra>
// kernel: forward.1
= control target key start
LH: loop header
LB: loop body
LE: loop exit
PB: predicated region body
PF: predicated region fallthrough
CT: control target
= control target key end

     0   :  { %v18_v2 = vlaneseq  ;;  %v6427_v3 = vmov 0   ;;  %s7760_s0 = inlined_call_operand.vmem [shape: s32[32,1], index: 0, kind: input, shape index: {}]   ;;  %s7761_s1 = inlined_call_operand.vmem [shape: s32[2,32], index: 1, kind: input, shape index: {}]   ;;  %s7762_s2 = inlined_call_operand.vmem [shape: f32[1200,32], index: 2, kind: input, shape index: {}]   ;;  %s7763_s3 = inlined_call_operand.vmem [shape: f32[23,32], index: 3, kind: input, shape index: {}]   ;;  %s7764_s4 = inlined_call_operand.hbm [shape: f32[2,4], index: 4, kind: output, shape index: {}]  }
   0x1   :  { %v26_v0 = vld [vmem:[%s7760_s0 + $0x10] sm:$0xff]  ;;  %v24_v1 = vld [vmem:[%s7760_s0] sm:$0xff]  ;;  %6346 = vset.pattern.permute.xlu1 %v6427_v3  ;;  %6345 = vset.pattern.permute.xlu0 %v6427_v3  ;;  %v22_v5 = vld [vmem:[%s7762_s2 + $0x8] sm:$0xff] }
   0x2   :  { %v21_v4 = vld [vmem:[%s7762_s2] sm:$0xff]  ;;  %37 = vperm.xlu1 %6346, %v26_v0   ;;  %31 = vperm.xlu0 %6345, %v24_v1   ;;  %v6490_v6 = vshrl.u32 %v18_v2, 7 }
   0x3   :  { %v6492_v7 = vpack.c.bf16 %v22_v5, %v21_v4 }
   0x4   :  { %9 = vsyncpa [#allocation3], 0  ;;  %v27_v8 = vld [vmem:[%s7760_s0 + $0x18] sm:$0xff]  ;;  %v25_v9 = vld [vmem:[%s7760_s0 + $0x8] sm:$0xff]  ;;  %vm156_vm0 = vcmp.ge.s32.totalorder %v6490_v6, 1  ;;  %v6502_v10 = vadd.s32 8, %v6490_v6 }
   0x5   :  { %6030 = vmatprep.subr.bf16.mxu0 %v6492_v7  ;;  %v6428_v11 = vmov 0.0   ;;  %v23_v13 = vld [vmem:[%s7762_s2 + $0x10] sm:$0xf]  ;;  %vm67_vm1 = vcmask 1043456   ;;  %v6429_v14 = vmov 1.0   ;;  %v6516_v18 = vand.u32 127, %v18_v2 }
   0x6   :  { %v5061_v12 = vsel %vm156_vm0, 1.0, %v6428_v11  ;;  %6032 = vmatpush3.bf16.msra.mxu0 %v6492_v7  ;;  %40 = vperm.xlu1 %6346, %v27_v8   ;;  %vm163_vm2 = vcmp.lt.s32.totalorder %v6502_v10, 15  ;;  %vm54_vm3 = vcmask 162816   ;;  %v264_v27 = vld [vmem:[%s7762_s2 + $0x20] sm:$0xff]  ;;  %v265_v28 = vld [vmem:[%s7762_s2 + $0x28] sm:$0xff]  ;;  %v266_v30 = vld [vmem:[%s7762_s2 + $0x30] sm:$0xff] }
   0x7   :  { %34 = vperm.xlu0 %6345, %v25_v9   ;;  %v6352_v15 = vpack.i.bf16 %v6429_v14, %v5061_v12  ;;  %v5062_v16 = vsel %vm163_vm2, 1.0, %v6428_v11  ;;  %5472 = vmatprep.subr.msk.mxu0 %vm67_vm1, %v23_v13  ;;  %v6033_v29 = vpack.c.bf16 %v265_v28, %v264_v27  ;;  %vm172_vm8 = vcmask 1040384   ;;  %s6430_s8 = smov 8   ;;  %s6431_s9 = smov 16   ;;  %v473_v27 = vld [vmem:[%s7762_s2 + $0x58] sm:$0xff] }
   0x8   :  { %v6347_v17 = vpack.i.bf16 %v5062_v16, %v6429_v14  ;;  %vm199_vm9 = vcmask 1046528   ;;  %vm254_vm10 = vcmask 64512   ;;  %vm259_vm11 = vcmask 130048   ;;  %s6432_s13 = smov 32   ;;  %s6433_s14 = smov 64  }
   0x9   :  { %6034 = vmatprep.subr.bf16.mxu1 %v6033_v29  ;;  %vm272_vm12 = vcmask 195584   ;;  %vm460_vm13 = vcmask 261120   ;;  %vm465_vm14 = vcmask 523264   ;;  %vm487_vm15 = vcmask 785408  }
   0xa   :  { %5473 = vmatpush3.msk.msra.mxu0 %vm67_vm1, %v23_v13  ;;  %6353 = vperm.xlu1 %6346, %v6352_v15   ;;  %vm805_vm0 = vcmp.lt.s32.totalorder %v6502_v10, 14  ;;  %vm854_vm2 = vcmp.ge.s32.totalorder %v6490_v6, 2 }
   0xb   :  { %6348 = vperm.xlu0 %6345, %v6347_v17   ;;  %6036 = vmatpush3.bf16.msra.mxu1 %v6033_v29  ;;  %v474_v29 = vld [vmem:[%s7762_s2 + $0x60] sm:$0xff] }
   0xc   :  { %5484 = vmatprep.subr.mxu1 %v266_v30 }
   0xf   :  { %5485 = vmatpush3.msra.mxu1 %v266_v30  ;;  %v475_v30 = vld [vmem:[%s7762_s2 + $0x68] sm:$0xff] }
  0x81   :  { %v38_v19 = vpop.permute.xlu1 %37  ;;  %v32_v20 = vpop.permute.xlu0 %31 }
  0x82   :  { %vm42_vm4 = vcmp.eq.s32.totalorder %v6516_v18, %v32_v20  ;;  %vm44_vm5 = vcmp.eq.s32.totalorder %v6516_v18, %v38_v19 }
  0x83   :  { %v5052_v21 = vsel %vm42_vm4, 1.0, %v6428_v11  ;;  %v5054_v24 = vsel %vm44_vm5, 1.0, %v6428_v11  ;;  %vm791_vm4 = vcmask 1045504   ;;  %vm864_vm5 = vcmask 1041408  }
  0x84   :  { %5474 = vmatprep.mubr.msk.f32.mxu0 %vm54_vm3, %v5052_v21 }
  0x85   :  { %v41_v22 = vpop.permute.xlu1 %40 }
  0x86   :  { %v35_v23 = vpop.permute.xlu0 %34  ;;  %vm45_vm7 = vcmp.eq.s32.totalorder %v6516_v18, %v41_v22 }
  0x87   :  { %vm43_vm6 = vcmp.eq.s32.totalorder %v6516_v18, %v35_v23  ;;  %v5055_v26 = vsel %vm45_vm7, 1.0, %v6428_v11  ;;  %v470_v23 = vld [vmem:[%s7762_s2 + $0x40] sm:$0xff]  ;;  %vm1329_vm7 = vcmp.ge.s32.totalorder %v6490_v6, 4 }
  0x88   :  { %v5053_v25 = vsel %vm43_vm6, 1.0, %v6428_v11  ;;  %vm1280_vm6 = vcmp.lt.s32.totalorder %v6502_v10, 12 }
  0x89   :  { %5475 = vmatmul.mubr.msk.f32.vlgmr.msra.gmra.mrb[0].mxu0 %vm54_vm3, %v5053_v25  ;;  %v6354_v57 = vpop.permute.xlu1 %6353  ;;  %v472_v25 = vld [vmem:[%s7762_s2 + $0x50] sm:$0xff]  ;;  %v5094_v10 = vsel %vm1280_vm6, 1.0, %v6428_v11 }
  0x8a   :  { %5477 = vmatprep.mubr.msk.f32.mxu0 %vm54_vm3, %v5054_v24  ;;  %v6349_v37 = vpop.permute.xlu0 %6348  ;;  %v6555_v61 = vunpack.i.l.bf16 %v6354_v57  ;;  %v6557_v63 = vunpack.i.h.bf16 %v6354_v57  ;;  %v471_v24 = vld [vmem:[%s7762_s2 + $0x48] sm:$0xff]  ;;  %v6041_v28 = vpack.c.bf16 %v473_v27, %v472_v25  ;;  %v6367_v6 = vpack.i.bf16 %v5094_v10, %v6429_v14 }
  0x8b   :  { %v6541_v44 = vunpack.i.l.bf16 %v6349_v37  ;;  %v6543_v47 = vunpack.i.h.bf16 %v6349_v37  ;;  %v479_v37 = vld [vmem:[%s7762_s2 + $0x88] sm:$0xff] }
  0x8d   :  { %5478 = vmatmul.mubr.msk.f32.gmra.mrb[2].mxu0 %vm54_vm3, %v5055_v26  ;;  %v6037_v26 = vpack.c.bf16 %v471_v24, %v470_v23 }
  0x8f   :  { %6038 = vmatprep.subr.bf16.mxu0 %v6037_v26 }
  0x90   :  { %6040 = vmatpush3.bf16.msra.mxu0 %v6037_v26 }
  0x91   :  { %6042 = vmatprep.subr.bf16.mxu0 %v6041_v28 }
  0x94   :  { %6044 = vmatpush3.bf16.msra.mxu0 %v6041_v28 }
 0x15c   :  { %v5476_v31 = vpop.f32.mrb[0].mxu0 }
 0x15d   :  { %v174_v32 = vrot.slane %v5476_v31, 7  ;;  %v201_v33 = vrot.slane %v5476_v31, 1  ;;  %v137_v34 = vpop.f32.mrb[1].mxu0  ;;  %228 = vrot.lane.b32.xlu1 %v5476_v31, %s6430_s8  ;;  %v6045_v31 = vpack.c.bf16 %v475_v30, %v474_v29 }
 0x15e   :  { %v173_v35 = vrot.slane %v137_v34, 7  ;;  %v200_v36 = vrot.slane %v137_v34, 1  ;;  %226 = vrot.lane.b32.xlu0 %v137_v34, %s6430_s8 }
 0x15f   :  { %6046 = vmatprep.subr.bf16.mxu0 %v6045_v31 }
 0x160   :  { %v5479_v38 = vpop.f32.mrb[2].mxu0  ;;  %v202_v39 = vsel %vm199_vm9, %v200_v36, %v201_v33  ;;  %v175_v40 = vsel %vm172_vm8, %v173_v35, %v174_v32  ;;  %v184_v60 = vsel %vm172_vm8, 0.0, %v173_v35  ;;  %6048 = vmatpush3.bf16.msra.mxu0 %v6045_v31  ;;  %v5063_v35 = vld [vmem:[%s7763_s3] ss:$0 sm:$0xff] }
 0x161   :  { %v178_v41 = vrot.slane %v5479_v38, 7  ;;  %v205_v42 = vrot.slane %v5479_v38, 1  ;;  %v147_v43 = vpop.f32.mrb[3].mxu0  ;;  %232 = vrot.lane.b32.xlu1 %v5479_v38, %s6430_s8  ;;  %v222_v48 = vmul.f32 %v6541_v44, %v202_v39  ;;  %v195_v1 = vmul.f32 %v6555_v61, %v184_v60  ;;  %v478_v36 = vld [vmem:[%s7762_s2 + $0x80] sm:$0xff] }
 0x162   :  { %v176_v45 = vrot.slane %v147_v43, 7  ;;  %v203_v46 = vrot.slane %v147_v43, 1  ;;  %230 = vrot.lane.b32.xlu0 %v147_v43, %s6430_s8  ;;  %v196_v2 = vmul.f32 %v6557_v63, %v175_v40  ;;  %v6053_v39 = vpack.c.bf16 %v479_v37, %v478_v36  ;;  %s6434_s8 = smov 112  }
 0x163   :  { %v211_v54 = vsel %vm199_vm9, %v205_v42, 0.0 }
 0x164   :  { %v204_v49 = vsel %vm199_vm9, %v201_v33, %v203_v46  ;;  %v206_v50 = vsel %vm199_vm9, %v203_v46, %v205_v42  ;;  %v179_v51 = vsel %vm172_vm8, %v176_v45, %v178_v41  ;;  %v177_v53 = vsel %vm172_vm8, %v174_v32, %v176_v45  ;;  %v476_v32 = vld [vmem:[%s7762_s2 + $0x70] sm:$0xff]  ;;  %v477_v33 = vld [vmem:[%s7762_s2 + $0x78] sm:$0xff]  ;;  %v5068_v42 = vld [vmem:[%s7763_s3 + $0x1] ss:$0 sm:$0xff] }
 0x165   :  { %v223_v52 = vmul.f32 %v6543_v47, %v204_v49  ;;  %v224_v55 = vmul.f32 %v6541_v44, %v206_v50  ;;  %v225_v56 = vmul.f32 %v6543_v47, %v211_v54  ;;  %v197_v12 = vmul.f32 %v6555_v61, %v177_v53  ;;  %v480_v46 = vld [vmem:[%s7762_s2 + $0x90] sm:$0xff] }
 0x166   :  { %242 = vrot.lane.b32.xlu0 %v222_v48, %s6431_s9  ;;  %v198_v15 = vmul.f32 %v6557_v63, %v179_v51  ;;  %v6049_v34 = vpack.c.bf16 %v477_v33, %v476_v32  ;;  %v481_v48 = vld [vmem:[%s7762_s2 + $0x98] sm:$0xff]  ;;  %v5069_v51 = vld [vmem:[%s7763_s3 + $0x2] ss:$0 sm:$0xff] }
 0x167   :  { %244 = vrot.lane.b32.xlu1 %v223_v52, %s6431_s9  ;;  %v6057_v52 = vpack.c.bf16 %v481_v48, %v480_v46 }
 0x168   :  { %6050 = vmatprep.subr.bf16.mxu0 %v6049_v34 }
 0x169   :  { %6052 = vmatpush3.bf16.msra.mxu0 %v6049_v34 }
 0x16a   :  { %246 = vrot.lane.b32.xlu0 %v224_v55, %s6431_s9  ;;  %6054 = vmatprep.subr.bf16.mxu0 %v6053_v39 }
 0x16b   :  { %248 = vrot.lane.b32.xlu1 %v225_v56, %s6431_s9 }
 0x16d   :  { %6056 = vmatpush3.bf16.msra.mxu0 %v6053_v39 }
 0x16e   :  { %6058 = vmatprep.subr.bf16.mxu0 %v6057_v52 }
 0x171   :  { %6060 = vmatpush3.bf16.msra.mxu0 %v6057_v52 }
 0x1cf   :  { %v229_v58 = vpop.permute.xlu1 %228 }
 0x1d0   :  { %v227_v59 = vpop.permute.xlu0 %226  ;;  %v256_v5 = vsel %vm254_vm10, %v196_v2, %v229_v58 }
 0x1d1   :  { %v255_v3 = vsel %vm254_vm10, %v195_v1, %v227_v59 }
 0x1d3   :  { %v233_v0 = vpop.permute.xlu1 %232 }
 0x1d4   :  { %v231_v62 = vpop.permute.xlu0 %230  ;;  %v258_v19 = vsel %vm254_vm10, %v198_v15, %v233_v0 }
 0x1d5   :  { %v257_v16 = vsel %vm254_vm10, %v197_v12, %v231_v62 }
 0x1d8   :  { %v243_v4 = vpop.permute.xlu0 %242 }
 0x1d9   :  { %v245_v8 = vpop.permute.xlu1 %244  ;;  %v260_v9 = vsel %vm259_vm11, %v255_v3, %v243_v4 }
 0x1da   :  { %v261_v13 = vsel %vm259_vm11, %v256_v5, %v245_v8  ;;  %5486 = vmatprep.mubr.msk.f32.mxu1 %vm272_vm12, %v260_v9 }
 0x1db   :  { %5487 = vmatmul.mubr.msk.f32.vlgmr.msra.gmra.mrb[0].mxu1 %vm272_vm12, %v261_v13 }
 0x1dc   :  { %v247_v17 = vpop.permute.xlu0 %246 }
 0x1dd   :  { %v262_v20 = vsel %vm259_vm11, %v257_v16, %v247_v17  ;;  %v249_v21 = vpop.permute.xlu1 %248 }
 0x1de   :  { %v263_v22 = vsel %vm259_vm11, %v258_v19, %v249_v21  ;;  %5489 = vmatprep.mubr.msk.f32.mxu1 %vm272_vm12, %v262_v20 }
 0x1df   :  { %5490 = vmatmul.mubr.msk.f32.gmra.mrb[2].mxu1 %vm272_vm12, %v263_v22 }
 0x2ae   :  { %v5488_v38 = vpop.f32.mrb[0].mxu1 }
 0x2af   :  { %v357_v40 = vadd.f32 %v5488_v38, %v5063_v35  ;;  %v351_v41 = vpop.f32.mrb[1].mxu1 }
 0x2b0   :  { %v352_v43 = vadd.f32 %v5063_v35, %v351_v41 }
 0x2b1   :  { %v371_v45 = vmax.f32 %v357_v40, 0.0 }
 0x2b2   :  { %v370_v49 = vmax.f32 %v352_v43, 0.0  ;;  %v5491_v50 = vpop.f32.mrb[2].mxu1 }
 0x2b3   :  { %v380_v53 = vmul.f32 %v5068_v42, %v371_v45  ;;  %v367_v54 = vadd.f32 %v5491_v50, %v5063_v35  ;;  %v361_v55 = vpop.f32.mrb[3].mxu1 }
 0x2b4   :  { %v379_v56 = vmul.f32 %v5068_v42, %v370_v49  ;;  %v362_v57 = vadd.f32 %v5063_v35, %v361_v55 }
 0x2b5   :  { %v373_v58 = vmax.f32 %v367_v54, 0.0  ;;  %v389_v59 = vadd.f32 %v5069_v51, %v380_v53 }
 0x2b6   :  { %v372_v60 = vmax.f32 %v362_v57, 0.0  ;;  %v388_v62 = vadd.f32 %v5069_v51, %v379_v56  ;;  %v661_v56 = vld [vmem:[%s7762_s2 + $0xa0] sm:$0xff]  ;;  %v662_v57 = vld [vmem:[%s7762_s2 + $0xa8] sm:$0xff] }
 0x2b7   :  { %v382_v0 = vmul.f32 %v5068_v42, %v373_v58  ;;  %v393_v1 = vmax.f32 %v389_v59, 0.0  ;;  %v663_v58 = vld [vmem:[%s7762_s2 + $0xb0] sm:$0xff]  ;;  %v6061_v59 = vpack.c.bf16 %v662_v57, %v661_v56 }
 0x2b8   :  { %v381_v2 = vmul.f32 %v5068_v42, %v372_v60  ;;  %v392_v3 = vmax.f32 %v388_v62, 0.0  ;;  %v664_v60 = vld [vmem:[%s7762_s2 + $0xb8] sm:$0xff] }
 0x2b9   :  { %434 = vrot.lane.b32.xlu1 %v393_v1, %s6432_s13  ;;  %v401_v4 = vrot.slane %v393_v1, 7  ;;  %v417_v5 = vrot.slane %v393_v1, 1  ;;  %v391_v8 = vadd.f32 %v5069_v51, %v382_v0  ;;  %v6065_v62 = vpack.c.bf16 %v664_v60, %v663_v58  ;;  %v665_v0 = vld [vmem:[%s7762_s2 + $0xc0] sm:$0xff]  ;;  %v666_v1 = vld [vmem:[%s7762_s2 + $0xc8] sm:$0xff]  ;;  %6062 = vmatprep.subr.bf16.mxu1 %v6061_v59 }
 0x2ba   :  { %432 = vrot.lane.b32.xlu0 %v392_v3, %s6432_s13  ;;  %v400_v9 = vrot.slane %v392_v3, 7  ;;  %v416_v12 = vrot.slane %v392_v3, 1  ;;  %v390_v13 = vadd.f32 %v5069_v51, %v381_v2  ;;  %6064 = vmatpush3.bf16.msra.mxu1 %v6061_v59  ;;  %v6069_v2 = vpack.c.bf16 %v666_v1, %v665_v0  ;;  %v667_v3 = vld [vmem:[%s7762_s2 + $0xd0] sm:$0xff] }
 0x2bb   :  { %v395_v15 = vmax.f32 %v391_v8, 0.0  ;;  %6066 = vmatprep.subr.bf16.mxu1 %v6065_v62  ;;  %v669_v8 = vld [vmem:[%s7762_s2 + $0xe0] sm:$0xff] }
 0x2bc   :  { %v394_v16 = vmax.f32 %v390_v13, 0.0  ;;  %v418_v17 = vsel %vm199_vm9, %v416_v12, %v417_v5  ;;  %v402_v19 = vsel %vm172_vm8, %v400_v9, %v401_v4  ;;  %v411_v35 = vsel %vm172_vm8, 0.0, %v400_v9  ;;  %v670_v9 = vld [vmem:[%s7762_s2 + $0xe8] sm:$0xff]  ;;  %v671_v13 = vld [vmem:[%s7762_s2 + $0xf0] sm:$0xff] }
 0x2bd   :  { %438 = vrot.lane.b32.xlu1 %v395_v15, %s6432_s13  ;;  %v405_v20 = vrot.slane %v395_v15, 7  ;;  %v421_v21 = vrot.slane %v395_v15, 1  ;;  %v428_v24 = vmul.f32 %v6541_v44, %v418_v17  ;;  %v412_v38 = vmul.f32 %v6555_v61, %v411_v35  ;;  %v672_v15 = vld [vmem:[%s7762_s2 + $0xf8] sm:$0xff] }
 0x2be   :  { %436 = vrot.lane.b32.xlu0 %v394_v16, %s6432_s13  ;;  %v403_v22 = vrot.slane %v394_v16, 7  ;;  %v419_v23 = vrot.slane %v394_v16, 1  ;;  %v413_v39 = vmul.f32 %v6557_v63, %v402_v19  ;;  %6068 = vmatpush3.bf16.msra.mxu1 %v6065_v62  ;;  %v6077_v12 = vpack.c.bf16 %v670_v9, %v669_v8  ;;  %v5070_v16 = vld [vmem:[%s7763_s3 + $0x3] ss:$0 sm:$0xff] }
 0x2bf   :  { %v427_v30 = vsel %vm199_vm9, %v421_v21, 0.0  ;;  %6070 = vmatprep.subr.bf16.mxu1 %v6069_v2  ;;  %v6081_v17 = vpack.c.bf16 %v672_v15, %v671_v13 }
 0x2c0   :  { %v420_v25 = vsel %vm199_vm9, %v417_v5, %v419_v23  ;;  %v422_v26 = vsel %vm199_vm9, %v419_v23, %v421_v21  ;;  %v406_v27 = vsel %vm172_vm8, %v403_v22, %v405_v20  ;;  %v404_v29 = vsel %vm172_vm8, %v401_v4, %v403_v22  ;;  %v668_v4 = vld [vmem:[%s7762_s2 + $0xd8] sm:$0xff] }
 0x2c1   :  { %v429_v28 = vmul.f32 %v6543_v47, %v420_v25  ;;  %v430_v31 = vmul.f32 %v6541_v44, %v422_v26  ;;  %v431_v32 = vmul.f32 %v6543_v47, %v427_v30  ;;  %v414_v46 = vmul.f32 %v6555_v61, %v404_v29 }
 0x2c2   :  { %448 = vrot.lane.b32.xlu0 %v428_v24, %s6433_s14  ;;  %v415_v49 = vmul.f32 %v6557_v63, %v406_v27  ;;  %v6073_v5 = vpack.c.bf16 %v668_v4, %v667_v3  ;;  %6072 = vmatpush3.bf16.msra.mxu1 %v6069_v2 }
 0x2c3   :  { %450 = vrot.lane.b32.xlu1 %v429_v28, %s6433_s14 }
 0x2c4   :  { %6074 = vmatprep.subr.bf16.mxu1 %v6073_v5 }
 0x2c6   :  { %452 = vrot.lane.b32.xlu0 %v430_v31, %s6433_s14  ;;  %6076 = vmatpush3.bf16.msra.mxu1 %v6073_v5 }
 0x2c7   :  { %454 = vrot.lane.b32.xlu1 %v431_v32, %s6433_s14  ;;  %6078 = vmatprep.subr.bf16.mxu1 %v6077_v12 }
 0x2ca   :  { %6080 = vmatpush3.bf16.msra.mxu1 %v6077_v12 }
 0x2cb   :  { %6082 = vmatprep.subr.bf16.mxu1 %v6081_v17 }
 0x2ce   :  { %6084 = vmatpush3.bf16.msra.mxu1 %v6081_v17 }
 0x32b   :  { %v435_v33 = vpop.permute.xlu1 %434 }
 0x32c   :  { %v433_v34 = vpop.permute.xlu0 %432  ;;  %v462_v42 = vsel %vm460_vm13, %v413_v39, %v435_v33 }
 0x32d   :  { %v461_v40 = vsel %vm460_vm13, %v412_v38, %v433_v34 }
 0x32f   :  { %v439_v37 = vpop.permute.xlu1 %438 }
 0x330   :  { %v437_v36 = vpop.permute.xlu0 %436  ;;  %v464_v52 = vsel %vm460_vm13, %v415_v49, %v439_v37 }
 0x331   :  { %v463_v50 = vsel %vm460_vm13, %v414_v46, %v437_v36 }
 0x334   :  { %v449_v41 = vpop.permute.xlu0 %448 }
 0x335   :  { %v466_v43 = vsel %vm465_vm14, %v461_v40, %v449_v41  ;;  %v451_v45 = vpop.permute.xlu1 %450 }
 0x336   :  { %v467_v48 = vsel %vm465_vm14, %v462_v42, %v451_v45  ;;  %5516 = vmatprep.mubr.msk.f32.mxu0 %vm487_vm15, %v466_v43 }
 0x337   :  { %5517 = vmatmul.mubr.msk.f32.vlgmr.msra.gmra.mrb[4].mxu0 %vm487_vm15, %v467_v48 }
 0x338   :  { %v453_v51 = vpop.permute.xlu0 %452 }
 0x339   :  { %v468_v53 = vsel %vm465_vm14, %v463_v50, %v453_v51  ;;  %v455_v54 = vpop.permute.xlu1 %454  ;;  %v5080_v50 = vsel %vm805_vm0, 1.0, %v6428_v11 }
 0x33a   :  { %v469_v55 = vsel %vm465_vm14, %v464_v52, %v455_v54  ;;  %5519 = vmatprep.mubr.msk.f32.mxu0 %vm487_vm15, %v468_v53  ;;  %v5083_v52 = vsel %vm854_vm2, 1.0, %v6428_v11  ;;  %v6357_v54 = vpack.i.bf16 %v5080_v50, %v6429_v14 }
 0x33b   :  { %5520 = vmatmul.mubr.msk.f32.gmra.mrb[6].mxu0 %vm487_vm15, %v469_v55  ;;  %v6362_v55 = vpack.i.bf16 %v6429_v14, %v5083_v52 }
 0x40a   :  { %v5518_v19 = vpop.f32.mrb[4].mxu0 }
 0x40b   :  { %v572_v20 = vadd.f32 %v5518_v19, %v5070_v16  ;;  %v566_v21 = vpop.f32.mrb[5].mxu0  ;;  %v945_v19 = vld [vmem:[%s7762_s2 + $0x110] sm:$0xff] }
 0x40c   :  { %v567_v22 = vadd.f32 %v5070_v16, %v566_v21  ;;  %v946_v21 = vld [vmem:[%s7762_s2 + $0x118] sm:$0xff] }
 0x40d   :  { %v586_v23 = vmax.f32 %v572_v20, 0.0 }
 0x40e   :  { %v585_v24 = vmax.f32 %v567_v22, 0.0  ;;  %v5521_v25 = vpop.f32.mrb[6].mxu0  ;;  %v6089_v22 = vpack.c.bf16 %v946_v21, %v945_v19 }
 0x40f   :  { %v594_v26 = vrot.slane %v586_v23, 7  ;;  %v610_v27 = vrot.slane %v586_v23, 1  ;;  %v582_v28 = vadd.f32 %v5521_v25, %v5070_v16  ;;  %627 = vrot.lane.b32.xlu1 %v586_v23, %s6432_s13  ;;  %v576_v29 = vpop.f32.mrb[7].mxu0  ;;  %v947_v23 = vld [vmem:[%s7762_s2 + $0x120] sm:$0xff] }
 0x410   :  { %v593_v30 = vrot.slane %v585_v24, 7  ;;  %v609_v31 = vrot.slane %v585_v24, 1  ;;  %v577_v32 = vadd.f32 %v5070_v16, %v576_v29  ;;  %625 = vrot.lane.b32.xlu0 %v585_v24, %s6432_s13  ;;  %v948_v24 = vld [vmem:[%s7762_s2 + $0x128] sm:$0xff] }
 0x411   :  { %v588_v33 = vmax.f32 %v582_v28, 0.0  ;;  %v6093_v25 = vpack.c.bf16 %v948_v24, %v947_v23 }
 0x412   :  { %v587_v34 = vmax.f32 %v577_v32, 0.0  ;;  %v611_v35 = vsel %vm199_vm9, %v609_v31, %v610_v27  ;;  %v595_v36 = vsel %vm172_vm8, %v593_v30, %v594_v26  ;;  %v604_v58 = vsel %vm172_vm8, 0.0, %v593_v30  ;;  %v949_v32 = vld [vmem:[%s7762_s2 + $0x130] sm:$0xff] }
 0x413   :  { %v598_v37 = vrot.slane %v588_v33, 7  ;;  %v614_v38 = vrot.slane %v588_v33, 1  ;;  %631 = vrot.lane.b32.xlu1 %v588_v33, %s6432_s13  ;;  %v621_v41 = vmul.f32 %v6541_v44, %v611_v35  ;;  %v605_v60 = vmul.f32 %v6555_v61, %v604_v58  ;;  %v950_v33 = vld [vmem:[%s7762_s2 + $0x138] sm:$0xff] }
 0x414   :  { %v596_v39 = vrot.slane %v587_v34, 7  ;;  %v612_v40 = vrot.slane %v587_v34, 1  ;;  %629 = vrot.lane.b32.xlu0 %v587_v34, %s6432_s13 }
 0x415   :  { %v620_v49 = vsel %vm199_vm9, %v614_v38, 0.0 }
 0x416   :  { %v613_v42 = vsel %vm199_vm9, %v610_v27, %v612_v40  ;;  %v615_v43 = vsel %vm199_vm9, %v612_v40, %v614_v38  ;;  %v599_v45 = vsel %vm172_vm8, %v596_v39, %v598_v37  ;;  %v597_v48 = vsel %vm172_vm8, %v594_v26, %v596_v39  ;;  %v5075_v26 = vld [vmem:[%s7763_s3 + $0x4] ss:$0 sm:$0xff] }
 0x417   :  { %v622_v46 = vmul.f32 %v6543_v47, %v613_v42  ;;  %v623_v51 = vmul.f32 %v6541_v44, %v615_v43  ;;  %v624_v53 = vmul.f32 %v6543_v47, %v620_v49  ;;  %v606_v47 = vmul.f32 %v6557_v63, %v595_v36 }
 0x418   :  { %641 = vrot.lane.b32.xlu0 %v621_v41, %s6433_s14  ;;  %v607_v4 = vmul.f32 %v6555_v61, %v597_v48  ;;  %v608_v8 = vmul.f32 %v6557_v63, %v599_v45  ;;  %v943_v61 = vld [vmem:[%s7762_s2 + $0x100] sm:$0xff]  ;;  %v944_v63 = vld [vmem:[%s7762_s2 + $0x108] sm:$0xff]  ;;  %v6097_v36 = vpack.c.bf16 %v950_v33, %v949_v32 }
 0x419   :  { %643 = vrot.lane.b32.xlu1 %v622_v46, %s6433_s14  ;;  %v6085_v20 = vpack.c.bf16 %v944_v63, %v943_v61 }
 0x41b   :  { %6086 = vmatprep.subr.bf16.mxu0 %v6085_v20 }
 0x41c   :  { %645 = vrot.lane.b32.xlu0 %v623_v51, %s6433_s14  ;;  %6088 = vmatpush3.bf16.msra.mxu0 %v6085_v20 }
 0x41d   :  { %647 = vrot.lane.b32.xlu1 %v624_v53, %s6433_s14  ;;  %6090 = vmatprep.subr.bf16.mxu0 %v6089_v22 }
 0x420   :  { %6358 = vperm.xlu0 %6345, %v6357_v54   ;;  %6092 = vmatpush3.bf16.msra.mxu0 %v6089_v22 }
 0x421   :  { %6363 = vperm.xlu1 %6346, %v6362_v55   ;;  %6094 = vmatprep.subr.bf16.mxu0 %v6093_v25  ;;  %v5081_v55 = vld [vmem:[%s7763_s3 + $0x5] ss:$0 sm:$0xff] }
 0x424   :  { %6096 = vmatpush3.bf16.msra.mxu0 %v6093_v25 }
 0x425   :  { %6098 = vmatprep.subr.bf16.mxu0 %v6097_v36 }
 0x428   :  { %6100 = vmatpush3.bf16.msra.mxu0 %v6097_v36 }
 0x481   :  { %v628_v56 = vpop.permute.xlu1 %627 }
 0x482   :  { %v626_v57 = vpop.permute.xlu0 %625  ;;  %v654_v1 = vsel %vm460_vm13, %v606_v47, %v628_v56  ;;  %v951_v56 = vld [vmem:[%s7762_s2 + $0x140] sm:$0xff] }
 0x483   :  { %v653_v62 = vsel %vm460_vm13, %v605_v60, %v626_v57  ;;  %v952_v57 = vld [vmem:[%s7762_s2 + $0x148] sm:$0xff] }
 0x484   :  { %v6101_v60 = vpack.c.bf16 %v952_v57, %v951_v56 }
 0x485   :  { %v632_v44 = vpop.permute.xlu1 %631 }
 0x486   :  { %v630_v59 = vpop.permute.xlu0 %629  ;;  %v656_v13 = vsel %vm460_vm13, %v608_v8, %v632_v44  ;;  %6102 = vmatprep.subr.bf16.mxu0 %v6101_v60 }
 0x487   :  { %v655_v9 = vsel %vm460_vm13, %v607_v4, %v630_v59  ;;  %6104 = vmatpush3.bf16.msra.mxu0 %v6101_v60 }
 0x48a   :  { %v642_v0 = vpop.permute.xlu0 %641 }
 0x48b   :  { %v657_v2 = vsel %vm465_vm14, %v653_v62, %v642_v0  ;;  %v644_v3 = vpop.permute.xlu1 %643 }
 0x48c   :  { %v658_v5 = vsel %vm465_vm14, %v654_v1, %v644_v3  ;;  %5546 = vmatprep.mubr.msk.f32.mxu1 %vm487_vm15, %v657_v2  ;;  %v5082_v2 = vld [vmem:[%s7763_s3 + $0x6] ss:$0 sm:$0xff] }
 0x48d   :  { %5547 = vmatmul.mubr.msk.f32.vlgmr.msra.gmra.mrb[4].mxu1 %vm487_vm15, %v658_v5 }
 0x48e   :  { %v646_v12 = vpop.permute.xlu0 %645 }
 0x48f   :  { %v659_v15 = vsel %vm465_vm14, %v655_v9, %v646_v12  ;;  %v648_v16 = vpop.permute.xlu1 %647  ;;  %v953_v9 = vld [vmem:[%s7762_s2 + $0x150] sm:$0xff]  ;;  %v954_v12 = vld [vmem:[%s7762_s2 + $0x158] sm:$0xff] }
 0x490   :  { %v660_v17 = vsel %vm465_vm14, %v656_v13, %v648_v16  ;;  %5549 = vmatprep.mubr.msk.f32.mxu1 %vm487_vm15, %v659_v15  ;;  %v6105_v63 = vpack.c.bf16 %v954_v12, %v953_v9 }
 0x491   :  { %5550 = vmatmul.mubr.msk.f32.gmra.mrb[6].mxu1 %vm487_vm15, %v660_v17 }
 0x492   :  { %6106 = vmatprep.subr.bf16.mxu0 %v6105_v63 }
 0x493   :  { %6108 = vmatpush3.bf16.msra.mxu0 %v6105_v63 }
 0x49f   :  { %v6359_v30 = vpop.permute.xlu0 %6358 }
 0x4a0   :  { %v6764_v40 = vunpack.i.l.bf16 %v6359_v30  ;;  %v6769_v52 = vunpack.i.h.bf16 %v6359_v30 }
 0x560   :  { %v5548_v27 = vpop.f32.mrb[4].mxu1 }
 0x561   :  { %v762_v28 = vadd.f32 %v5548_v27, %v5075_v26  ;;  %v756_v29 = vpop.f32.mrb[5].mxu1 }
 0x562   :  { %v757_v31 = vadd.f32 %v5075_v26, %v756_v29 }
 0x563   :  { %v780_v34 = vrot.slane %v762_v28, 1  ;;  %v793_v35 = vrot.slane %v762_v28, 2 }
 0x564   :  { %v779_v37 = vrot.slane %v757_v31, 1  ;;  %v792_v38 = vrot.slane %v757_v31, 2  ;;  %v5551_v39 = vpop.f32.mrb[6].mxu1 }
 0x565   :  { %v772_v41 = vadd.f32 %v5551_v39, %v5075_v26  ;;  %v766_v42 = vpop.f32.mrb[7].mxu1 }
 0x566   :  { %v781_v43 = vsel %vm199_vm9, %v779_v37, %v780_v34  ;;  %v794_v45 = vsel %vm791_vm4, %v792_v38, %v793_v35  ;;  %v767_v46 = vadd.f32 %v5075_v26, %v766_v42 }
 0x567   :  { %v820_v48 = vmul.f32 %v6764_v40, %v794_v45  ;;  %v824_v49 = vmax.f32 %v757_v31, %v781_v43  ;;  %v784_v50 = vrot.slane %v772_v41, 1  ;;  %v797_v51 = vrot.slane %v772_v41, 2 }
 0x568   :  { %v782_v53 = vrot.slane %v767_v46, 1  ;;  %v795_v54 = vrot.slane %v767_v46, 2 }
 0x569   :  { %v6780_v58 = vmax.f32 %v824_v49, %v820_v48  ;;  %v790_v59 = vsel %vm199_vm9, %v784_v50, 0.0  ;;  %v803_v44 = vsel %vm791_vm4, %v797_v51, 0.0 }
 0x56a   :  { %v823_v47 = vmul.f32 %v6769_v52, %v803_v44  ;;  %v827_v62 = vmax.f32 %v772_v41, %v790_v59  ;;  %v783_v0 = vsel %vm199_vm9, %v780_v34, %v782_v53  ;;  %v785_v1 = vsel %vm199_vm9, %v782_v53, %v784_v50 }
 0x56b   :  { %v796_v3 = vsel %vm791_vm4, %v793_v35, %v795_v54  ;;  %v798_v4 = vsel %vm791_vm4, %v795_v54, %v797_v51  ;;  %v826_v5 = vmax.f32 %v767_v46, %v785_v1  ;;  %v837_v8 = vmul.f32 %v5081_v55, %v6780_v58  ;;  %v6364_v54 = vpop.permute.xlu1 %6363 }
 0x56c   :  { %v6799_v13 = vmax.f32 %v827_v62, %v823_v47  ;;  %v822_v15 = vmul.f32 %v6764_v40, %v798_v4  ;;  %v821_v16 = vmul.f32 %v6769_v52, %v796_v3  ;;  %v825_v17 = vmax.f32 %v762_v28, %v783_v0 }
 0x56d   :  { %v846_v61 = vadd.f32 %v5082_v2, %v837_v8  ;;  %v6830_v44 = vunpack.i.l.bf16 %v6364_v54  ;;  %v6832_v60 = vunpack.i.h.bf16 %v6364_v54  ;;  %vm6438_vm9 = vmmov 0  }
 0x56e   :  { %v6803_v19 = vmax.f32 %v826_v5, %v822_v15  ;;  %v840_v20 = vmul.f32 %v5081_v55, %v6799_v13  ;;  %v6806_v21 = vmax.f32 %v825_v17, %v821_v16 }
 0x56f   :  { %v850_v22 = vmax.f32 %v846_v61, 0.0 }
 0x570   :  { %v849_v23 = vadd.f32 %v5082_v2, %v840_v20  ;;  %v839_v24 = vmul.f32 %v5081_v55, %v6803_v19  ;;  %v838_v25 = vmul.f32 %v5081_v55, %v6806_v21 }
 0x571   :  { %907 = vrot.lane.b32.xlu0 %v850_v22, %s6432_s13  ;;  %v891_v31 = vrot.slane %v850_v22, 2  ;;  %v865_v38 = vrot.slane %v850_v22, 6  ;;  %v1133_v22 = vld [vmem:[%s7762_s2 + $0x160] sm:$0xff] }
 0x572   :  { %v853_v26 = vmax.f32 %v849_v23, 0.0  ;;  %v848_v27 = vadd.f32 %v5082_v2, %v839_v24  ;;  %v847_v28 = vadd.f32 %v5082_v2, %v838_v25  ;;  %v1134_v23 = vld [vmem:[%s7762_s2 + $0x168] sm:$0xff]  ;;  %v1135_v24 = vld [vmem:[%s7762_s2 + $0x170] sm:$0xff] }
 0x573   :  { %v876_v57 = vsel %vm864_vm5, 0.0, %v865_v38  ;;  %v6109_v25 = vpack.c.bf16 %v1134_v23, %v1133_v22 }
 0x574   :  { %913 = vrot.lane.b32.xlu1 %v853_v26, %s6432_s13  ;;  %v852_v29 = vmax.f32 %v848_v27, 0.0  ;;  %v851_v30 = vmax.f32 %v847_v28, 0.0  ;;  %v870_v32 = vrot.slane %v853_v26, 6  ;;  %v896_v33 = vrot.slane %v853_v26, 2  ;;  %v1136_v26 = vld [vmem:[%s7762_s2 + $0x178] sm:$0xff]  ;;  %v1137_v28 = vld [vmem:[%s7762_s2 + $0x180] sm:$0xff] }
 0x575   :  { %v887_v62 = vmul.f32 %v6830_v44, %v876_v57  ;;  %v6113_v27 = vpack.c.bf16 %v1136_v26, %v1135_v24  ;;  %6110 = vmatprep.subr.bf16.mxu1 %v6109_v25 }
 0x576   :  { %v868_v34 = vrot.slane %v852_v29, 6  ;;  %v894_v35 = vrot.slane %v852_v29, 2  ;;  %911 = vrot.lane.b32.xlu0 %v852_v29, %s6432_s13  ;;  %v866_v36 = vrot.slane %v851_v30, 6  ;;  %v892_v37 = vrot.slane %v851_v30, 2  ;;  %v1138_v29 = vld [vmem:[%s7762_s2 + $0x188] sm:$0xff]  ;;  %6112 = vmatpush3.bf16.msra.mxu1 %v6109_v25 }
 0x577   :  { %v902_v50 = vsel %vm791_vm4, %v896_v33, 0.0  ;;  %6114 = vmatprep.subr.bf16.mxu1 %v6113_v27 }
 0x578   :  { %909 = vrot.lane.b32.xlu1 %v851_v30, %s6432_s13  ;;  %v893_v39 = vsel %vm791_vm4, %v891_v31, %v892_v37  ;;  %v895_v41 = vsel %vm791_vm4, %v892_v37, %v894_v35  ;;  %v871_v43 = vsel %vm864_vm5, %v868_v34, %v870_v32  ;;  %v897_v46 = vsel %vm791_vm4, %v894_v35, %v896_v33  ;;  %v1139_v31 = vld [vmem:[%s7762_s2 + $0x190] sm:$0xff]  ;;  %v1140_v32 = vld [vmem:[%s7762_s2 + $0x198] sm:$0xff]  ;;  %v1142_v35 = vld [vmem:[%s7762_s2 + $0x1a8] sm:$0xff] }
 0x579   :  { %v903_v42 = vmul.f32 %v6764_v40, %v893_v39  ;;  %v904_v45 = vmul.f32 %v6769_v52, %v895_v41  ;;  %v869_v48 = vsel %vm864_vm5, %v866_v36, %v868_v34  ;;  %v867_v49 = vsel %vm864_vm5, %v865_v38, %v866_v36  ;;  %v1141_v34 = vld [vmem:[%s7762_s2 + $0x1a0] sm:$0xff]  ;;  %v1143_v37 = vld [vmem:[%s7762_s2 + $0x1b0] sm:$0xff]  ;;  %v1144_v38 = vld [vmem:[%s7762_s2 + $0x1b8] sm:$0xff] }
 0x57a   :  { %v905_v51 = vmul.f32 %v6764_v40, %v897_v46  ;;  %v906_v53 = vmul.f32 %v6769_v52, %v902_v50  ;;  %v888_v0 = vmul.f32 %v6832_v60, %v867_v49  ;;  %v889_v8 = vmul.f32 %v6830_v44, %v869_v48  ;;  %6116 = vmatpush3.bf16.msra.mxu1 %v6113_v27  ;;  %v5084_v39 = vld [vmem:[%s7763_s3 + $0x7] ss:$0 sm:$0xff] }
 0x57b   :  { %923 = vrot.lane.b32.xlu0 %v903_v42, %s6433_s14  ;;  %v890_v12 = vmul.f32 %v6832_v60, %v871_v43  ;;  %v6117_v30 = vpack.c.bf16 %v1138_v29, %v1137_v28  ;;  %v6121_v33 = vpack.c.bf16 %v1140_v32, %v1139_v31  ;;  %v6125_v36 = vpack.c.bf16 %v1142_v35, %v1141_v34 }
 0x57c   :  { %925 = vrot.lane.b32.xlu1 %v904_v45, %s6433_s14  ;;  %v6129_v41 = vpack.c.bf16 %v1144_v38, %v1143_v37 }
 0x57d   :  { %6118 = vmatprep.subr.bf16.mxu1 %v6117_v30 }
 0x57e   :  { %6120 = vmatpush3.bf16.msra.mxu1 %v6117_v30 }
 0x57f   :  { %927 = vrot.lane.b32.xlu0 %v905_v51, %s6433_s14  ;;  %6122 = vmatprep.subr.bf16.mxu1 %v6121_v33 }
 0x580   :  { %929 = vrot.lane.b32.xlu1 %v906_v53, %s6433_s14 }
 0x582   :  { %6124 = vmatpush3.bf16.msra.mxu1 %v6121_v33 }
 0x583   :  { %6126 = vmatprep.subr.bf16.mxu1 %v6125_v36 }
 0x586   :  { %6128 = vmatpush3.bf16.msra.mxu1 %v6125_v36 }
 0x587   :  { %6130 = vmatprep.subr.bf16.mxu1 %v6129_v41 }
 0x58a   :  { %6132 = vmatpush3.bf16.msra.mxu1 %v6129_v41 }
 0x5e3   :  { %v908_v55 = vpop.permute.xlu0 %907 }
 0x5e4   :  { %v935_v1 = vsel %vm460_vm13, %v887_v62, %v908_v55 }
 0x5e6   :  { %v914_v56 = vpop.permute.xlu1 %913 }
 0x5e7   :  { %v938_v17 = vsel %vm460_vm13, %v890_v12, %v914_v56 }
 0x5e8   :  { %v912_v59 = vpop.permute.xlu0 %911 }
 0x5e9   :  { %v937_v15 = vsel %vm460_vm13, %v889_v8, %v912_v59 }
 0x5ea   :  { %v910_v47 = vpop.permute.xlu1 %909 }
 0x5eb   :  { %v936_v3 = vsel %vm460_vm13, %v888_v0, %v910_v47 }
 0x5ed   :  { %v924_v2 = vpop.permute.xlu0 %923 }
 0x5ee   :  { %v939_v4 = vsel %vm465_vm14, %v935_v1, %v924_v2  ;;  %v926_v5 = vpop.permute.xlu1 %925 }
 0x5ef   :  { %v940_v9 = vsel %vm465_vm14, %v936_v3, %v926_v5  ;;  %5576 = vmatprep.mubr.msk.f32.mxu0 %vm487_vm15, %v939_v4 }
 0x5f0   :  { %5577 = vmatmul.mubr.msk.f32.vlgmr.msra.gmra.mrb[8].mxu0 %vm487_vm15, %v940_v9 }
 0x5f1   :  { %v928_v16 = vpop.permute.xlu0 %927 }
 0x5f2   :  { %v941_v61 = vsel %vm465_vm14, %v937_v15, %v928_v16  ;;  %v930_v63 = vpop.permute.xlu1 %929 }
 0x5f3   :  { %v942_v20 = vsel %vm465_vm14, %v938_v17, %v930_v63  ;;  %5579 = vmatprep.mubr.msk.f32.mxu0 %vm487_vm15, %v941_v61 }
 0x5f4   :  { %5580 = vmatmul.mubr.msk.f32.gmra.mrb[10].mxu0 %vm487_vm15, %v942_v20  ;;  %v5097_v20 = vsel %vm1329_vm7, 1.0, %v6428_v11 }
 0x5f5   :  { %v6372_v23 = vpack.i.bf16 %v6429_v14, %v5097_v20 }
 0x6c3   :  { %v5578_v42 = vpop.f32.mrb[8].mxu0 }
 0x6c4   :  { %v1044_v43 = vadd.f32 %v5578_v42, %v5084_v39  ;;  %v1038_v45 = vpop.f32.mrb[9].mxu0 }
 0x6c5   :  { %v1039_v46 = vadd.f32 %v5084_v39, %v1038_v45  ;;  %v1409_v45 = vld [vmem:[%s7762_s2 + $0x1d0] sm:$0xff] }
 0x6c6   :  { %v1058_v48 = vmax.f32 %v1044_v43, 0.0 }
 0x6c7   :  { %v1057_v49 = vmax.f32 %v1039_v46, 0.0  ;;  %v5581_v50 = vpop.f32.mrb[10].mxu0 }
 0x6c8   :  { %v1066_v51 = vrot.slane %v1058_v48, 6  ;;  %v1082_v53 = vrot.slane %v1058_v48, 2  ;;  %v1054_v54 = vadd.f32 %v5581_v50, %v5084_v39  ;;  %1099 = vrot.lane.b32.xlu1 %v1058_v48, %s6432_s13  ;;  %v1048_v55 = vpop.f32.mrb[11].mxu0  ;;  %v1410_v48 = vld [vmem:[%s7762_s2 + $0x1d8] sm:$0xff]  ;;  %v1411_v50 = vld [vmem:[%s7762_s2 + $0x1e0] sm:$0xff] }
 0x6c9   :  { %v1065_v56 = vrot.slane %v1057_v49, 6  ;;  %v1081_v57 = vrot.slane %v1057_v49, 2  ;;  %v1049_v59 = vadd.f32 %v5084_v39, %v1048_v55  ;;  %1097 = vrot.lane.b32.xlu0 %v1057_v49, %s6432_s13  ;;  %v6137_v49 = vpack.c.bf16 %v1410_v48, %v1409_v45 }
 0x6ca   :  { %v1060_v47 = vmax.f32 %v1054_v54, 0.0  ;;  %v5089_v54 = vld [vmem:[%s7763_s3 + $0x8] ss:$0 sm:$0xff] }
 0x6cb   :  { %v1059_v62 = vmax.f32 %v1049_v59, 0.0  ;;  %v1083_v0 = vsel %vm791_vm4, %v1081_v57, %v1082_v53  ;;  %v1067_v1 = vsel %vm864_vm5, %v1065_v56, %v1066_v51  ;;  %v1076_v26 = vsel %vm864_vm5, 0.0, %v1065_v56 }
 0x6cc   :  { %v1070_v2 = vrot.slane %v1060_v47, 6  ;;  %v1086_v3 = vrot.slane %v1060_v47, 2  ;;  %1103 = vrot.lane.b32.xlu1 %v1060_v47, %s6432_s13  ;;  %v1093_v8 = vmul.f32 %v6764_v40, %v1083_v0  ;;  %v1077_v28 = vmul.f32 %v6830_v44, %v1076_v26 }
 0x6cd   :  { %v1068_v4 = vrot.slane %v1059_v62, 6  ;;  %v1084_v5 = vrot.slane %v1059_v62, 2  ;;  %1101 = vrot.lane.b32.xlu0 %v1059_v62, %s6432_s13 }
 0x6ce   :  { %v1092_v61 = vsel %vm791_vm4, %v1086_v3, 0.0 }
 0x6cf   :  { %v1085_v9 = vsel %vm791_vm4, %v1082_v53, %v1084_v5  ;;  %v1087_v12 = vsel %vm791_vm4, %v1084_v5, %v1086_v3  ;;  %v1071_v15 = vsel %vm864_vm5, %v1068_v4, %v1070_v2  ;;  %v1069_v17 = vsel %vm864_vm5, %v1066_v51, %v1068_v4  ;;  %v1412_v51 = vld [vmem:[%s7762_s2 + $0x1e8] sm:$0xff] }
 0x6d0   :  { %v1094_v16 = vmul.f32 %v6769_v52, %v1085_v9  ;;  %v1095_v63 = vmul.f32 %v6764_v40, %v1087_v12  ;;  %v1096_v22 = vmul.f32 %v6769_v52, %v1092_v61  ;;  %v1078_v52 = vmul.f32 %v6832_v60, %v1067_v1 }
 0x6d1   :  { %1113 = vrot.lane.b32.xlu0 %v1093_v8, %s6433_s14  ;;  %v1079_v34 = vmul.f32 %v6830_v44, %v1069_v17  ;;  %v1080_v36 = vmul.f32 %v6832_v60, %v1071_v15  ;;  %v1407_v44 = vld [vmem:[%s7762_s2 + $0x1c0] sm:$0xff]  ;;  %v1408_v60 = vld [vmem:[%s7762_s2 + $0x1c8] sm:$0xff]  ;;  %v6141_v53 = vpack.c.bf16 %v1412_v51, %v1411_v50  ;;  %v1413_v15 = vld [vmem:[%s7762_s2 + $0x1f0] sm:$0xff] }
 0x6d2   :  { %1115 = vrot.lane.b32.xlu1 %v1094_v16, %s6433_s14  ;;  %v6133_v46 = vpack.c.bf16 %v1408_v60, %v1407_v44  ;;  %v1414_v16 = vld [vmem:[%s7762_s2 + $0x1f8] sm:$0xff] }
 0x6d3   :  { %v6145_v17 = vpack.c.bf16 %v1414_v16, %v1413_v15 }
 0x6d4   :  { %6134 = vmatprep.subr.bf16.mxu0 %v6133_v46 }
 0x6d5   :  { %1117 = vrot.lane.b32.xlu0 %v1095_v63, %s6433_s14  ;;  %6136 = vmatpush3.bf16.msra.mxu0 %v6133_v46 }
 0x6d6   :  { %1119 = vrot.lane.b32.xlu1 %v1096_v22, %s6433_s14  ;;  %6138 = vmatprep.subr.bf16.mxu0 %v6137_v49 }
 0x6d9   :  { %6368 = vperm.xlu0 %6345, %v6367_v6   ;;  %6140 = vmatpush3.bf16.msra.mxu0 %v6137_v49 }
 0x6da   :  { %6373 = vperm.xlu1 %6346, %v6372_v23   ;;  %6142 = vmatprep.subr.bf16.mxu0 %v6141_v53 }
 0x6dd   :  { %6144 = vmatpush3.bf16.msra.mxu0 %v6141_v53 }
 0x6de   :  { %6146 = vmatprep.subr.bf16.mxu0 %v6145_v17 }
 0x6e1   :  { %6148 = vmatpush3.bf16.msra.mxu0 %v6145_v17 }
 0x73a   :  { %v1100_v24 = vpop.permute.xlu1 %1099 }
 0x73b   :  { %v1098_v25 = vpop.permute.xlu0 %1097  ;;  %v1126_v31 = vsel %vm460_vm13, %v1078_v52, %v1100_v24 }
 0x73c   :  { %v1125_v29 = vsel %vm460_vm13, %v1077_v28, %v1098_v25 }
 0x73e   :  { %v1104_v40 = vpop.permute.xlu1 %1103 }
 0x73f   :  { %v1102_v27 = vpop.permute.xlu0 %1101  ;;  %v1128_v39 = vsel %vm460_vm13, %v1080_v36, %v1104_v40 }
 0x740   :  { %v1127_v37 = vsel %vm460_vm13, %v1079_v34, %v1102_v27  ;;  %v1416_v27 = vld [vmem:[%s7762_s2 + $0x208] sm:$0xff] }
 0x743   :  { %v1114_v30 = vpop.permute.xlu0 %1113 }
 0x744   :  { %v1129_v32 = vsel %vm465_vm14, %v1125_v29, %v1114_v30  ;;  %v1116_v33 = vpop.permute.xlu1 %1115 }
 0x745   :  { %v1130_v35 = vsel %vm465_vm14, %v1126_v31, %v1116_v33  ;;  %5606 = vmatprep.mubr.msk.f32.mxu1 %vm487_vm15, %v1129_v32  ;;  %v5096_v33 = vld [vmem:[%s7763_s3 + $0xa] ss:$0 sm:$0xff] }
 0x746   :  { %5607 = vmatmul.mubr.msk.f32.vlgmr.msra.gmra.mrb[8].mxu1 %vm487_vm15, %v1130_v35 }
 0x747   :  { %v1118_v38 = vpop.permute.xlu0 %1117 }
 0x748   :  { %v1131_v41 = vsel %vm465_vm14, %v1127_v37, %v1118_v38  ;;  %v1120_v42 = vpop.permute.xlu1 %1119 }
 0x749   :  { %v1132_v43 = vsel %vm465_vm14, %v1128_v39, %v1120_v42  ;;  %5609 = vmatprep.mubr.msk.f32.mxu1 %vm487_vm15, %v1131_v41  ;;  %v1417_v39 = vld [vmem:[%s7762_s2 + $0x210] sm:$0xff]  ;;  %v1418_v41 = vld [vmem:[%s7762_s2 + $0x218] sm:$0xff] }
 0x74a   :  { %5610 = vmatmul.mubr.msk.f32.gmra.mrb[10].mxu1 %vm487_vm15, %v1132_v43  ;;  %v6153_v60 = vpack.c.bf16 %v1418_v41, %v1417_v39  ;;  %v1588_v39 = vld [vmem:[%s7762_s2 + $0x228] sm:$0xff]  ;;  %v1589_v41 = vld [vmem:[%s7762_s2 + $0x230] sm:$0xff] }
 0x758   :  { %v6369_v62 = vpop.permute.xlu0 %6368 }
 0x759   :  { %v6967_v24 = vunpack.i.h.bf16 %v6369_v62  ;;  %v6374_v17 = vpop.permute.xlu1 %6373 }
 0x819   :  { %v5608_v55 = vpop.f32.mrb[8].mxu1 }
 0x81a   :  { %v1234_v56 = vadd.f32 %v5608_v55, %v5089_v54  ;;  %v1228_v57 = vpop.f32.mrb[9].mxu1 }
 0x81b   :  { %v1229_v59 = vadd.f32 %v5089_v54, %v1228_v57 }
 0x81c   :  { %v1248_v47 = vadd.f32 %v1234_v56, %v6806_v21  ;;  %v6960_v21 = vunpack.i.l.bf16 %v6369_v62 }
 0x81d   :  { %v1247_v0 = vadd.f32 %v1229_v59, %v6780_v58  ;;  %v5611_v1 = vpop.f32.mrb[10].mxu1 }
 0x81e   :  { %v1256_v2 = vrot.slane %v1248_v47, 2  ;;  %v1268_v3 = vrot.slane %v1248_v47, 4  ;;  %v1244_v4 = vadd.f32 %v5611_v1, %v5089_v54  ;;  %v1238_v5 = vpop.f32.mrb[11].mxu1 }
 0x81f   :  { %v1255_v8 = vrot.slane %v1247_v0, 2  ;;  %v1267_v9 = vrot.slane %v1247_v0, 4  ;;  %v1239_v12 = vadd.f32 %v5089_v54, %v1238_v5 }
 0x820   :  { %v1250_v58 = vadd.f32 %v1244_v4, %v6799_v13  ;;  %v5095_v13 = vld [vmem:[%s7763_s3 + $0x9] ss:$0 sm:$0xff] }
 0x821   :  { %v1257_v61 = vsel %vm791_vm4, %v1255_v8, %v1256_v2  ;;  %v1249_v10 = vadd.f32 %v1239_v12, %v6803_v19  ;;  %v1269_v63 = vsel %vm67_vm1, %v1267_v9, %v1268_v3  ;;  %v1415_v19 = vld [vmem:[%s7762_s2 + $0x200] sm:$0xff] }
 0x822   :  { %v1299_v20 = vmax.f32 %v1247_v0, %v1257_v61  ;;  %v1260_v22 = vrot.slane %v1250_v58, 2  ;;  %v1272_v6 = vrot.slane %v1250_v58, 4  ;;  %v1295_v23 = vmul.f32 %v6960_v21, %v1269_v63 }
 0x823   :  { %v1258_v25 = vrot.slane %v1249_v10, 2  ;;  %v1270_v26 = vrot.slane %v1249_v10, 4  ;;  %v6149_v29 = vpack.c.bf16 %v1416_v27, %v1415_v19 }
 0x824   :  { %v1266_v40 = vsel %vm791_vm4, %v1260_v22, 0.0  ;;  %v1278_v28 = vsel %vm67_vm1, %v1272_v6, 0.0  ;;  %v6980_v52 = vmax.f32 %v1299_v20, %v1295_v23 }
 0x825   :  { %v1298_v30 = vmul.f32 %v6967_v24, %v1278_v28  ;;  %v1302_v31 = vmax.f32 %v1250_v58, %v1266_v40  ;;  %v1261_v32 = vsel %vm791_vm4, %v1258_v25, %v1260_v22  ;;  %v1273_v34 = vsel %vm67_vm1, %v1270_v26, %v1272_v6  ;;  %6150 = vmatprep.subr.bf16.mxu0 %v6149_v29 }
 0x826   :  { %v1301_v35 = vmax.f32 %v1249_v10, %v1261_v32  ;;  %v1312_v36 = vmul.f32 %v5095_v13, %v6980_v52  ;;  %v1297_v37 = vmul.f32 %v6960_v21, %v1273_v34  ;;  %v1259_v38 = vsel %vm791_vm4, %v1256_v2, %v1258_v25  ;;  %6152 = vmatpush3.bf16.msra.mxu0 %v6149_v29 }
 0x827   :  { %v6997_v42 = vmax.f32 %v1302_v31, %v1298_v30  ;;  %v1271_v43 = vsel %vm67_vm1, %v1268_v3, %v1270_v26  ;;  %v1300_v44 = vmax.f32 %v1248_v47, %v1259_v38  ;;  %6154 = vmatprep.subr.bf16.mxu0 %v6153_v60  ;;  %v7025_v22 = vunpack.i.h.bf16 %v6374_v17  ;;  %v1587_v38 = vld [vmem:[%s7762_s2 + $0x220] sm:$0xff] }
 0x828   :  { %v1321_v45 = vadd.f32 %v5096_v33, %v1312_v36  ;;  %v7000_v46 = vmax.f32 %v1301_v35, %v1297_v37  ;;  %v1296_v48 = vmul.f32 %v6967_v24, %v1271_v43  ;;  %v7027_v6 = vunpack.i.l.bf16 %v6374_v17 }
 0x829   :  { %v1315_v49 = vmul.f32 %v5095_v13, %v6997_v42  ;;  %v6157_v43 = vpack.c.bf16 %v1588_v39, %v1587_v38 }
 0x82a   :  { %v1325_v50 = vmax.f32 %v1321_v45, 0.0  ;;  %v1314_v51 = vmul.f32 %v5095_v13, %v7000_v46  ;;  %v7005_v53 = vmax.f32 %v1300_v44, %v1296_v48  ;;  %6156 = vmatpush3.bf16.msra.mxu0 %v6153_v60  ;;  %v1590_v44 = vld [vmem:[%s7762_s2 + $0x238] sm:$0xff]  ;;  %v1591_v45 = vld [vmem:[%s7762_s2 + $0x240] sm:$0xff]  ;;  %v1592_v48 = vld [vmem:[%s7762_s2 + $0x248] sm:$0xff] }
 0x82b   :  { %v1324_v54 = vadd.f32 %v5096_v33, %v1315_v49  ;;  %v6161_v60 = vpack.c.bf16 %v1590_v44, %v1589_v41  ;;  %6158 = vmatprep.subr.bf16.mxu1 %v6157_v43  ;;  %v6165_v49 = vpack.c.bf16 %v1592_v48, %v1591_v45 }
 0x82c   :  { %1371 = vrot.lane.b32.xlu0 %v1325_v50, %s6432_s13  ;;  %v1323_v55 = vadd.f32 %v5096_v33, %v1314_v51  ;;  %v1313_v56 = vmul.f32 %v5095_v13, %v7005_v53  ;;  %v1339_v1 = vrot.slane %v1325_v50, 4  ;;  %6160 = vmatpush3.bf16.msra.mxu1 %v6157_v43  ;;  %v1593_v50 = vld [vmem:[%s7762_s2 + $0x250] sm:$0xff]  ;;  %v1594_v51 = vld [vmem:[%s7762_s2 + $0x258] sm:$0xff] }
 0x82d   :  { %v1328_v57 = vmax.f32 %v1324_v54, 0.0  ;;  %6162 = vmatprep.subr.bf16.mxu1 %v6161_v60  ;;  %v6169_v54 = vpack.c.bf16 %v1594_v51, %v1593_v50  ;;  %v1836_v50 = vld [vmem:[%s7762_s2 + $0x290] sm:$0xff] }
 0x82e   :  { %v1327_v59 = vmax.f32 %v1323_v55, 0.0  ;;  %v1322_v47 = vadd.f32 %v5096_v33, %v1313_v56  ;;  %v1350_v20 = vsel %vm67_vm1, 0.0, %v1339_v1  ;;  %v1595_v55 = vld [vmem:[%s7762_s2 + $0x260] sm:$0xff]  ;;  %v1596_v56 = vld [vmem:[%s7762_s2 + $0x268] sm:$0xff] }
 0x82f   :  { %1377 = vrot.lane.b32.xlu1 %v1328_v57, %s6432_s13  ;;  %v1344_v2 = vrot.slane %v1328_v57, 4  ;;  %v1361_v26 = vmul.f32 %v7027_v6, %v1350_v20  ;;  %v6173_v57 = vpack.c.bf16 %v1596_v56, %v1595_v55  ;;  %v1838_v56 = vld [vmem:[%s7762_s2 + $0x2a0] sm:$0xff] }
 0x830   :  { %v1342_v62 = vrot.slane %v1327_v59, 4  ;;  %1375 = vrot.lane.b32.xlu0 %v1327_v59, %s6432_s13  ;;  %v1326_v0 = vmax.f32 %v1322_v47, 0.0  ;;  %6164 = vmatpush3.bf16.msra.mxu1 %v6161_v60  ;;  %v1597_v59 = vld [vmem:[%s7762_s2 + $0x270] sm:$0xff]  ;;  %v1598_v47 = vld [vmem:[%s7762_s2 + $0x278] sm:$0xff] }
 0x831   :  { %v1366_v15 = vsel %vm67_vm1, %v1344_v2, 0.0  ;;  %6166 = vmatprep.subr.bf16.mxu1 %v6165_v49 }
 0x832   :  { %v1340_v3 = vrot.slane %v1326_v0, 4  ;;  %v1345_v12 = vsel %vm67_vm1, %v1342_v62, %v1344_v2  ;;  %v1370_v58 = vmul.f32 %v6967_v24, %v1366_v15 }
 0x833   :  { %1373 = vrot.lane.b32.xlu1 %v1326_v0, %s6432_s13  ;;  %v1369_v16 = vmul.f32 %v6960_v21, %v1345_v12  ;;  %v1364_v31 = vmul.f32 %v7025_v22, %v1345_v12  ;;  %v6177_v0 = vpack.c.bf16 %v1598_v47, %v1597_v59  ;;  %v5103_v47 = vld [vmem:[%s7763_s3 + $0xc] ss:$0 sm:$0xff] }
 0x834   :  { %v1341_v4 = vsel %vm67_vm1, %v1339_v1, %v1340_v3  ;;  %v1343_v5 = vsel %vm67_vm1, %v1340_v3, %v1342_v62  ;;  %6168 = vmatpush3.bf16.msra.mxu1 %v6165_v49  ;;  %v5098_v62 = vld [vmem:[%s7763_s3 + $0xb] ss:$0 sm:$0xff] }
 0x835   :  { %v1367_v8 = vmul.f32 %v6960_v21, %v1341_v4  ;;  %v1368_v9 = vmul.f32 %v6967_v24, %v1343_v5  ;;  %v1362_v25 = vmul.f32 %v7025_v22, %v1341_v4  ;;  %v1363_v30 = vmul.f32 %v7027_v6, %v1343_v5  ;;  %6170 = vmatprep.subr.bf16.mxu1 %v6169_v54 }
 0x837   :  { %1387 = vrot.lane.b32.xlu0 %v1367_v8, %s6433_s14  ;;  %1389 = vrot.lane.b32.xlu1 %v1368_v9, %s6433_s14 }
 0x838   :  { %6172 = vmatpush3.bf16.msra.mxu1 %v6169_v54  ;;  %v1837_v54 = vld [vmem:[%s7762_s2 + $0x298] sm:$0xff] }
 0x839   :  { %6174 = vmatprep.subr.bf16.mxu1 %v6173_v57  ;;  %v6185_v55 = vpack.c.bf16 %v1837_v54, %v1836_v50 }
 0x83b   :  { %1391 = vrot.lane.b32.xlu0 %v1369_v16, %s6433_s14  ;;  %1393 = vrot.lane.b32.xlu1 %v1370_v58, %s6433_s14 }
 0x83c   :  { %6176 = vmatpush3.bf16.msra.mxu1 %v6173_v57  ;;  %v1839_v57 = vld [vmem:[%s7762_s2 + $0x2a8] sm:$0xff] }
 0x83d   :  { %6178 = vmatprep.subr.bf16.mxu1 %v6177_v0  ;;  %v6189_v59 = vpack.c.bf16 %v1839_v57, %v1838_v56 }
 0x840   :  { %6180 = vmatpush3.bf16.msra.mxu1 %v6177_v0 }
 0x89e   :  { %v1372_v61 = vpop.permute.xlu0 %1371 }
 0x89f   :  { %v1399_v13 = vsel %vm460_vm13, %v1361_v26, %v1372_v61 }
 0x8a1   :  { %v1378_v10 = vpop.permute.xlu1 %1377 }
 0x8a2   :  { %v1376_v63 = vpop.permute.xlu0 %1375  ;;  %v1402_v32 = vsel %vm460_vm13, %v1364_v31, %v1378_v10 }
 0x8a3   :  { %v1401_v33 = vsel %vm460_vm13, %v1363_v30, %v1376_v63 }
 0x8a5   :  { %v1374_v23 = vpop.permute.xlu1 %1373 }
 0x8a6   :  { %v1400_v19 = vsel %vm460_vm13, %v1362_v25, %v1374_v23 }
 0x8a9   :  { %v1388_v27 = vpop.permute.xlu0 %1387  ;;  %v1390_v40 = vpop.permute.xlu1 %1389 }
 0x8aa   :  { %v1403_v28 = vsel %vm465_vm14, %v1399_v13, %v1388_v27  ;;  %v1404_v29 = vsel %vm465_vm14, %v1400_v19, %v1390_v40 }
 0x8ab   :  { %5636 = vmatprep.mubr.msk.f32.mxu0 %vm487_vm15, %v1403_v28 }
 0x8ac   :  { %5637 = vmatmul.mubr.msk.f32.vlgmr.msra.gmra.mrb[12].mxu0 %vm487_vm15, %v1404_v29 }
 0x8ad   :  { %v1392_v34 = vpop.permute.xlu0 %1391  ;;  %v1394_v35 = vpop.permute.xlu1 %1393 }
 0x8ae   :  { %v1405_v36 = vsel %vm465_vm14, %v1401_v33, %v1392_v34  ;;  %v1406_v37 = vsel %vm465_vm14, %v1402_v32, %v1394_v35 }
 0x8af   :  { %5639 = vmatprep.mubr.msk.f32.mxu0 %vm487_vm15, %v1405_v36 }
 0x8b0   :  { %5640 = vmatmul.mubr.msk.f32.gmra.mrb[14].mxu0 %vm487_vm15, %v1406_v37 }
 0x97f   :  { %v5638_v1 = vpop.f32.mrb[12].mxu0 }
 0x980   :  { %v1508_v2 = vadd.f32 %v5638_v1, %v5098_v62  ;;  %v1502_v3 = vpop.f32.mrb[13].mxu0 }
 0x981   :  { %v1503_v4 = vadd.f32 %v5098_v62, %v1502_v3 }
 0x982   :  { %v1522_v5 = vmax.f32 %v1508_v2, 0.0 }
 0x983   :  { %v1521_v8 = vmax.f32 %v1503_v4, 0.0  ;;  %v5641_v9 = vpop.f32.mrb[14].mxu0 }
 0x984   :  { %v1530_v12 = vrot.slane %v1522_v5, 4  ;;  %v1518_v15 = vadd.f32 %v5641_v9, %v5098_v62  ;;  %1553 = vrot.lane.b32.xlu1 %v1522_v5, %s6432_s13  ;;  %v1512_v16 = vpop.f32.mrb[15].mxu0 }
 0x985   :  { %v1529_v58 = vrot.slane %v1521_v8, 4  ;;  %v1513_v17 = vadd.f32 %v5098_v62, %v1512_v16  ;;  %1551 = vrot.lane.b32.xlu0 %v1521_v8, %s6432_s13  ;;  %v1840_v16 = vld [vmem:[%s7762_s2 + $0x2b0] sm:$0xff] }
 0x986   :  { %v1524_v61 = vmax.f32 %v1518_v15, 0.0 }
 0x987   :  { %v1523_v10 = vmax.f32 %v1513_v17, 0.0  ;;  %v1531_v63 = vsel %vm67_vm1, %v1529_v58, %v1530_v12  ;;  %v1540_v31 = vsel %vm67_vm1, 0.0, %v1529_v58  ;;  %v1841_v58 = vld [vmem:[%s7762_s2 + $0x2b8] sm:$0xff] }
 0x988   :  { %v1534_v20 = vrot.slane %v1524_v61, 4  ;;  %1557 = vrot.lane.b32.xlu1 %v1524_v61, %s6432_s13  ;;  %v1547_v25 = vmul.f32 %v6960_v21, %v1531_v63  ;;  %v1541_v34 = vmul.f32 %v7027_v6, %v1540_v31 }
 0x989   :  { %v1532_v23 = vrot.slane %v1523_v10, 4  ;;  %1555 = vrot.lane.b32.xlu0 %v1523_v10, %s6432_s13  ;;  %v6193_v10 = vpack.c.bf16 %v1841_v58, %v1840_v16 }
 0x98a   :  { %v1546_v27 = vsel %vm67_vm1, %v1534_v20, 0.0 }
 0x98b   :  { %v1533_v26 = vsel %vm67_vm1, %v1530_v12, %v1532_v23  ;;  %v1535_v13 = vsel %vm67_vm1, %v1532_v23, %v1534_v20  ;;  %v1550_v28 = vmul.f32 %v6967_v24, %v1546_v27  ;;  %v1843_v27 = vld [vmem:[%s7762_s2 + $0x2c8] sm:$0xff] }
 0x98c   :  { %v1548_v19 = vmul.f32 %v6967_v24, %v1533_v26  ;;  %v1549_v40 = vmul.f32 %v6960_v21, %v1535_v13  ;;  %v1542_v21 = vmul.f32 %v7025_v22, %v1531_v63  ;;  %v1544_v41 = vmul.f32 %v7025_v22, %v1535_v13  ;;  %v1834_v22 = vld [vmem:[%s7762_s2 + $0x280] sm:$0xff] }
 0x98d   :  { %1567 = vrot.lane.b32.xlu0 %v1547_v25, %s6433_s14 }
 0x98e   :  { %1569 = vrot.lane.b32.xlu1 %v1548_v19, %s6433_s14  ;;  %v1842_v19 = vld [vmem:[%s7762_s2 + $0x2c0] sm:$0xff] }
 0x991   :  { %1571 = vrot.lane.b32.xlu0 %v1549_v40, %s6433_s14 }
 0x992   :  { %1573 = vrot.lane.b32.xlu1 %v1550_v28, %s6433_s14 }
 0x995   :  { %6378 = vperm.xlu0 %6345, %v6429_v14  }
 0x996   :  { %6383 = vperm.xlu1 %6346, %v6429_v14   ;;  %v1543_v14 = vmul.f32 %v7027_v6, %v1533_v26  ;;  %v1835_v6 = vld [vmem:[%s7762_s2 + $0x288] sm:$0xff] }
 0x997   :  { %v6181_v51 = vpack.c.bf16 %v1835_v6, %v1834_v22 }
 0x999   :  { %6182 = vmatprep.subr.bf16.mxu0 %v6181_v51 }
 0x99a   :  { %6184 = vmatpush3.bf16.msra.mxu0 %v6181_v51 }
 0x99b   :  { %6186 = vmatprep.subr.bf16.mxu0 %v6185_v55 }
 0x99e   :  { %6188 = vmatpush3.bf16.msra.mxu0 %v6185_v55 }
 0x99f   :  { %6190 = vmatprep.subr.bf16.mxu0 %v6189_v59 }
 0x9a2   :  { %6192 = vmatpush3.bf16.msra.mxu0 %v6189_v59 }
 0x9a3   :  { %6194 = vmatprep.subr.bf16.mxu0 %v6193_v10 }
 0x9a6   :  { %6196 = vmatpush3.bf16.msra.mxu0 %v6193_v10 }
 0x9f6   :  { %v1554_v29 = vpop.permute.xlu1 %1553 }
 0x9f7   :  { %v1552_v30 = vpop.permute.xlu0 %1551  ;;  %v1580_v36 = vsel %vm460_vm13, %v1542_v21, %v1554_v29 }
 0x9f8   :  { %v1579_v24 = vsel %vm460_vm13, %v1541_v34, %v1552_v30  ;;  %v5109_v34 = vld [vmem:[%s7763_s3 + $0xe] ss:$0 sm:$0xff] }
 0x9fa   :  { %v1558_v33 = vpop.permute.xlu1 %1557 }
 0x9fb   :  { %v1556_v32 = vpop.permute.xlu0 %1555  ;;  %v1582_v60 = vsel %vm460_vm13, %v1544_v41, %v1558_v33 }
 0x9fc   :  { %v1581_v43 = vsel %vm460_vm13, %v1543_v14, %v1556_v32  ;;  %v1845_v14 = vld [vmem:[%s7762_s2 + $0x2d8] sm:$0xff] }
 0x9ff   :  { %v1568_v35 = vpop.permute.xlu0 %1567 }
 0xa00   :  { %v1583_v37 = vsel %vm465_vm14, %v1579_v24, %v1568_v35  ;;  %v1570_v38 = vpop.permute.xlu1 %1569 }
 0xa01   :  { %v1584_v39 = vsel %vm465_vm14, %v1580_v36, %v1570_v38  ;;  %5666 = vmatprep.mubr.msk.f32.mxu1 %vm487_vm15, %v1583_v37  ;;  %v1844_v38 = vld [vmem:[%s7762_s2 + $0x2d0] sm:$0xff] }
 0xa02   :  { %5667 = vmatmul.mubr.msk.f32.vlgmr.msra.gmra.mrb[12].mxu1 %vm487_vm15, %v1584_v39  ;;  %v6201_v41 = vpack.c.bf16 %v1845_v14, %v1844_v38  ;;  %v2000_v38 = vld [vmem:[%s7762_s2 + $0x310] sm:$0xff]  ;;  %v2001_v14 = vld [vmem:[%s7762_s2 + $0x318] sm:$0xff] }
 0xa03   :  { %v1572_v44 = vpop.permute.xlu0 %1571 }
 0xa04   :  { %v1585_v45 = vsel %vm465_vm14, %v1581_v43, %v1572_v44  ;;  %v1574_v48 = vpop.permute.xlu1 %1573 }
 0xa05   :  { %v1586_v49 = vsel %vm465_vm14, %v1582_v60, %v1574_v48  ;;  %5669 = vmatprep.mubr.msk.f32.mxu1 %vm487_vm15, %v1585_v45 }
 0xa06   :  { %5670 = vmatmul.mubr.msk.f32.gmra.mrb[14].mxu1 %vm487_vm15, %v1586_v49 }
 0xa14   :  { %v6379_v4 = vpop.permute.xlu0 %6378 }
 0xa15   :  { %v7148_v63 = vunpack.i.h.bf16 %v6379_v4 }
 0xad5   :  { %v5668_v62 = vpop.f32.mrb[12].mxu1 }
 0xad6   :  { %v1688_v0 = vadd.f32 %v5668_v62, %v5103_v47  ;;  %v1682_v1 = vpop.f32.mrb[13].mxu1 }
 0xad7   :  { %v1683_v2 = vadd.f32 %v5103_v47, %v1682_v1  ;;  %v6384_v1 = vpop.permute.xlu1 %6383 }
 0xad8   :  { %v1702_v3 = vadd.f32 %v1688_v0, %v7005_v53  ;;  %v7150_v53 = vunpack.i.l.bf16 %v6379_v4 }
 0xad9   :  { %v1701_v5 = vadd.f32 %v1683_v2, %v6980_v52  ;;  %v5671_v8 = vpop.f32.mrb[14].mxu1 }
 0xada   :  { %v1710_v9 = vrot.slane %v1702_v3, 4  ;;  %v1698_v12 = vadd.f32 %v5671_v8, %v5103_v47  ;;  %v1692_v15 = vpop.f32.mrb[15].mxu1  ;;  %v1737_v25 = vmul.f32 %v7148_v63, %v1702_v3  ;;  %v1740_v28 = vmul.f32 0.0, %v7150_v53 }
 0xadb   :  { %v1709_v17 = vrot.slane %v1701_v5, 4  ;;  %v1693_v61 = vadd.f32 %v5103_v47, %v1692_v15  ;;  %v2213_v47 = vld [vmem:[%s7761_s1] sm:$0x3]  ;;  %s6452_s1 = smov [#allocation2]  }
 0xadc   :  { %v1704_v52 = vadd.f32 %v1698_v12, %v6997_v42  ;;  %v5108_v42 = vld [vmem:[%s7763_s3 + $0xd] ss:$0 sm:$0xff]  ;;  %v2230_v0 = vrot.slane %v2213_v47, 6  ;;  %s5044_s9 = sshll.u32 %s6452_s1, 4  ;;  %s5045_s9 = int_to_ptr.vmem [resolvable:$true] %s5044_s9 }
 0xadd   :  { %v1711_v20 = vsel %vm67_vm1, %v1709_v17, %v1710_v9  ;;  %v1703_v23 = vadd.f32 %v1693_v61, %v7000_v46  ;;  %v6197_v46 = vpack.c.bf16 %v1843_v27, %v1842_v19  ;;  %p6408_p1 = scmp.lt.s32.totalorder %s5045_s9, %s5045_s9 }
 0xade   :  { %v1741_v26 = vmax.f32 %v1701_v5, %v1711_v20  ;;  %v1714_v13 = vrot.slane %v1704_v52, 4  ;;  %v1739_v31 = vmul.f32 %v7148_v63, %v1704_v52 }
 0xadf   :  { %v1712_v40 = vrot.slane %v1703_v23, 4  ;;  %6198 = vmatprep.subr.bf16.mxu0 %v6197_v46  ;;  %v1738_v24 = vmul.f32 %v7150_v53, %v1703_v23 }
 0xae0   :  { %v7166_v29 = vmax.f32 %v1741_v26, %v1737_v25  ;;  %v1720_v30 = vsel %vm67_vm1, %v1714_v13, 0.0  ;;  %6200 = vmatpush3.bf16.msra.mxu0 %v6197_v46 }
 0xae1   :  { %v1744_v32 = vmax.f32 %v1704_v52, %v1720_v30  ;;  %v1715_v33 = vsel %vm67_vm1, %v1712_v40, %v1714_v13  ;;  %v1713_v21 = vsel %vm67_vm1, %v1710_v9, %v1712_v40  ;;  %6202 = vmatprep.subr.bf16.mxu0 %v6201_v41  ;;  %v7211_v9 = vunpack.i.h.bf16 %v6384_v1 }
 0xae2   :  { %v1743_v35 = vmax.f32 %v1703_v23, %v1715_v33  ;;  %v1754_v36 = vmul.f32 %v5108_v42, %v7166_v29  ;;  %v1742_v37 = vmax.f32 %v1702_v3, %v1713_v21  ;;  %v7206_v3 = vunpack.i.l.bf16 %v6384_v1  ;;  %v1996_v33 = vld [vmem:[%s7762_s2 + $0x2f0] sm:$0xff]  ;;  %v1997_v21 = vld [vmem:[%s7762_s2 + $0x2f8] sm:$0xff] }
 0xae3   :  { %v7183_v39 = vmax.f32 %v1744_v32, %v1740_v28  ;;  %v6436_v30 = vmov 2   ;;  %v1995_v32 = vld [vmem:[%s7762_s2 + $0x2e8] sm:$0xff]  ;;  %v6437_v1 = vmov 0.0|0.0  }
 0xae4   :  { %v1763_v43 = vadd.f32 %v5109_v34, %v1754_v36  ;;  %v7185_v44 = vmax.f32 %v1743_v35, %v1739_v31  ;;  %v7187_v60 = vmax.f32 %v1742_v37, %v1738_v24  ;;  %6204 = vmatpush3.bf16.msra.mxu0 %v6201_v41  ;;  %v7209_v8 = vmul.f32 0.0, %v7206_v3  ;;  %6388 = vset.pattern.permute.xlu0 %v6436_v30  ;;  %v1994_v31 = vld [vmem:[%s7762_s2 + $0x2e0] sm:$0xff]  ;;  %v1999_v36 = vld [vmem:[%s7762_s2 + $0x308] sm:$0xff] }
 0xae5   :  { %v1757_v45 = vmul.f32 %v5108_v42, %v7183_v39  ;;  %v6209_v24 = vpack.c.bf16 %v1997_v21, %v1996_v33  ;;  %v1998_v35 = vld [vmem:[%s7762_s2 + $0x300] sm:$0xff]  ;;  %v6217_v41 = vpack.c.bf16 %v2001_v14, %v2000_v38  ;;  %6229 = vmatprep.subr.bf16.mxu0 %v6437_v1  ;;  %v2127_v14 = vld [vmem:[%s7762_s2 + $0x348] sm:$0xff] }
 0xae6   :  { %v1767_v48 = vmax.f32 %v1763_v43, 0.0  ;;  %v1756_v49 = vmul.f32 %v5108_v42, %v7185_v44  ;;  %v1755_v22 = vmul.f32 %v5108_v42, %v7187_v60  ;;  %v6213_v37 = vpack.c.bf16 %v1999_v36, %v1998_v35  ;;  %v2002_v43 = vld [vmem:[%s7762_s2 + $0x320] sm:$0xff]  ;;  %v2215_v36 = vld [vmem:[%s7762_s2 + $0x388] sm:$0xff] }
 0xae7   :  { %v1766_v6 = vadd.f32 %v5109_v34, %v1757_v45  ;;  %v2003_v45 = vld [vmem:[%s7762_s2 + $0x328] sm:$0xff]  ;;  %v2126_v38 = vld [vmem:[%s7762_s2 + $0x340] sm:$0xff] }
 0xae8   :  { %1798 = vrot.lane.b32.xlu0 %v1767_v48, %s6432_s13  ;;  %v1765_v50 = vadd.f32 %v5109_v34, %v1756_v49  ;;  %v1764_v51 = vadd.f32 %v5109_v34, %v1755_v22  ;;  %v1788_v58 = vmul.f32 %v7211_v9, %v1767_v48  ;;  %v6205_v34 = vpack.c.bf16 %v1995_v32, %v1994_v31  ;;  %v2004_v49 = vld [vmem:[%s7762_s2 + $0x330] sm:$0xff]  ;;  %v2005_v22 = vld [vmem:[%s7762_s2 + $0x338] sm:$0xff] }
 0xae9   :  { %v1770_v54 = vmax.f32 %v1766_v6, 0.0  ;;  %v6221_v48 = vpack.c.bf16 %v2003_v45, %v2002_v43  ;;  %v5110_v6 = vld [vmem:[%s7763_s3 + $0xf] ss:$0 sm:$0xff]  ;;  %v6230_v43 = vpack.c.bf16 %v2127_v14, %v2126_v38  ;;  %v2129_v45 = vld [vmem:[%s7762_s2 + $0x358] sm:$0xff] }
 0xaea   :  { %v1769_v55 = vmax.f32 %v1765_v50, 0.0  ;;  %v1768_v56 = vmax.f32 %v1764_v51, 0.0  ;;  %6206 = vmatprep.subr.bf16.mxu1 %v6205_v34  ;;  %v6225_v50 = vpack.c.bf16 %v2005_v22, %v2004_v49  ;;  %v2130_v49 = vld [vmem:[%s7762_s2 + $0x360] sm:$0xff]  ;;  %v2131_v22 = vld [vmem:[%s7762_s2 + $0x368] sm:$0xff] }
 0xaeb   :  { %1804 = vrot.lane.b32.xlu1 %v1770_v54, %s6432_s13  ;;  %v1793_v62 = vmul.f32 %v7148_v63, %v1770_v54  ;;  %6208 = vmatpush3.bf16.msra.mxu1 %v6205_v34 }
 0xaec   :  { %1802 = vrot.lane.b32.xlu0 %v1769_v55, %s6432_s13  ;;  %v1791_v57 = vmul.f32 %v7148_v63, %v1768_v56  ;;  %v1792_v59 = vmul.f32 %v7150_v53, %v1769_v55  ;;  %v1789_v61 = vmul.f32 %v7206_v3, %v1768_v56  ;;  %v1790_v26 = vmul.f32 %v7211_v9, %v1769_v55 }
 0xaed   :  { %6210 = vmatprep.subr.bf16.mxu1 %v6209_v24 }
 0xaef   :  { %1800 = vrot.lane.b32.xlu1 %v1768_v56, %s6432_s13  ;;  %6212 = vmatpush3.bf16.msra.mxu1 %v6209_v24 }
 0xaf0   :  { %1814 = vrot.lane.b32.xlu0 %v1791_v57, %s6433_s14  ;;  %6214 = vmatprep.subr.bf16.mxu1 %v6213_v37 }
 0xaf3   :  { %1816 = vrot.lane.b32.xlu1 %v1792_v59, %s6433_s14  ;;  %6216 = vmatpush3.bf16.msra.mxu1 %v6213_v37  ;;  %v6444_v37 = vmov 4  }
 0xaf4   :  { %1818 = vrot.lane.b32.xlu0 %v1793_v62, %s6433_s14  ;;  %6218 = vmatprep.subr.bf16.mxu1 %v6217_v41 }
 0xaf7   :  { %1820 = vrot.lane.b32.xlu1 %v1740_v28, %s6433_s14  ;;  %v6435_v28 = vmov 1   ;;  %6220 = vmatpush3.bf16.msra.mxu1 %v6217_v41  ;;  %v2128_v41 = vld [vmem:[%s7762_s2 + $0x350] sm:$0xff] }
 0xaf8   :  { %2231 = vrot.lane.b32.xlu0 %v2230_v0, %s6434_s8  ;;  %6222 = vmatprep.subr.bf16.mxu1 %v6221_v48 }
 0xafb   :  { %6224 = vmatpush3.bf16.msra.mxu1 %v6221_v48  ;;  %v6233_v48 = vpack.c.bf16 %v2129_v45, %v2128_v41 }
 0xafc   :  { %6226 = vmatprep.subr.bf16.mxu1 %v6225_v50 }
 0xaff   :  { %6228 = vmatpush3.bf16.msra.mxu1 %v6225_v50  ;;  %v2132_v50 = vld [vmem:[%s7762_s2 + $0x370] sm:$0xff] }
 0xb00   :  { %6241 = vmatprep.subr.bf16.mxu1 %v6437_v1 }
 0xb5a   :  { %v1799_v2 = vpop.permute.xlu0 %1798 }
 0xb5b   :  { %v1826_v15 = vsel %vm460_vm13, %v7209_v8, %v1799_v2 }
 0xb5d   :  { %v1805_v4 = vpop.permute.xlu1 %1804 }
 0xb5e   :  { %v1803_v5 = vpop.permute.xlu0 %1802  ;;  %v1829_v19 = vsel %vm460_vm13, %v1790_v26, %v1805_v4 }
 0xb5f   :  { %v1828_v20 = vsel %vm460_vm13, %v1789_v61, %v1803_v5  ;;  %v6442_v61 = vmov 12  }
 0xb61   :  { %v1801_v12 = vpop.permute.xlu1 %1800 }
 0xb62   :  { %v1815_v16 = vpop.permute.xlu0 %1814  ;;  %v1827_v10 = vsel %vm460_vm13, %v1788_v58, %v1801_v12  ;;  %v6439_v58 = vmov 3  }
 0xb63   :  { %v1830_v17 = vsel %vm465_vm14, %v1826_v15, %v1815_v16 }
 0xb64   :  { %5696 = vmatprep.mubr.msk.f32.mxu0 %vm487_vm15, %v1830_v17  ;;  %v6440_v17 = vmov 6  }
 0xb65   :  { %v1817_v52 = vpop.permute.xlu1 %1816 }
 0xb66   :  { %v1831_v23 = vsel %vm465_vm14, %v1827_v10, %v1817_v52  ;;  %v1819_v25 = vpop.permute.xlu0 %1818 }
 0xb67   :  { %v1832_v13 = vsel %vm465_vm14, %v1828_v20, %v1819_v25  ;;  %5697 = vmatmul.mubr.msk.f32.vlgmr.msra.gmra.mrb[16].mxu0 %vm487_vm15, %v1831_v23 }
 0xb68   :  { %5699 = vmatprep.mubr.msk.f32.mxu0 %vm487_vm15, %v1832_v13  ;;  %6231 = vmatpush3.bf16.msra.mxu0 %v6230_v43 }
 0xb69   :  { %v7227_v27 = vpop.permute.xlu1 %1820  ;;  %6232 = vmatprep.subr.bf16.mxu0 %v6437_v1 }
 0xb6a   :  { %v1833_v40 = vsel %vm465_vm14, %v1829_v19, %v7227_v27  ;;  %v2232_v42 = vpop.permute.xlu0 %2231 }
 0xb6b   :  { %v7232_v46 = vsel %vm864_vm5, %v2213_v47, %v2232_v42  ;;  %5700 = vmatmul.mubr.msk.f32.gmra.mrb[18].mxu0 %vm487_vm15, %v1833_v40 }
 0xb6c   :  { %2235 = vperm.xlu1 %6346, %v7232_v46   ;;  %5748 = vmatprep.mubr.msk.f32.mxu0 %vm6438_vm9, %v6428_v11 }
 0xb6d   :  { %6234 = vmatpush3.bf16.msra.mxu0 %v6233_v48 }
 0xb6e   :  { %6235 = vmatprep.subr.bf16.mxu0 %v6437_v1 }
 0xb70   :  { %6387 = vset.pattern.permute.xlu1 %v6435_v28 }
 0xbeb   :  { %v2236_v10 = vpop.permute.xlu1 %2235 }
 0xbec   :  { %vm2237_vm11 = vcmp.eq.s32.totalorder %v6516_v18, %v2236_v10  ;;  %v6448_v10 = vmov 10  }
 0xbed   :  { %v5122_v24 = vsel %vm2237_vm11, 1.0, %v6428_v11 }
 0xc3a   :  { %v5698_v51 = vpop.f32.mrb[16].mxu0 }
 0xc3b   :  { %v1935_v54 = vadd.f32 %v5698_v51, %v5110_v6  ;;  %v1929_v55 = vpop.f32.mrb[17].mxu0  ;;  %v2133_v51 = vld [vmem:[%s7762_s2 + $0x378] sm:$0xff] }
 0xc3c   :  { %v1930_v56 = vadd.f32 %v5110_v6, %v1929_v55  ;;  %v6239_v55 = vpack.c.bf16 %v2133_v51, %v2132_v50 }
 0xc3d   :  { %v1949_v57 = vmax.f32 %v1935_v54, 0.0  ;;  %v5115_v54 = vld [vmem:[%s7763_s3 + $0x10] ss:$0 sm:$0xff] }
 0xc3e   :  { %v1948_v59 = vmax.f32 %v1930_v56, 0.0  ;;  %v5701_v47 = vpop.f32.mrb[18].mxu0 }
 0xc3f   :  { %1964 = vrot.lane.b32.xlu0 %v1949_v57, %s6432_s13  ;;  %v1939_v62 = vpop.f32.mrb[19].mxu0  ;;  %v1945_v2 = vadd.f32 %v5701_v47, %v5110_v6  ;;  %v1955_v5 = vmul.f32 %v7148_v63, %v1949_v57  ;;  %v1953_v32 = vmul.f32 %v7206_v3, %v1949_v57  ;;  %v7319_v3 = vld [vmem:[%s7762_s2 + $0x10] sm:$0xf] }
 0xc40   :  { %v1940_v0 = vadd.f32 %v5110_v6, %v1939_v62  ;;  %1962 = vrot.lane.b32.xlu1 %v1948_v59, %s6432_s13  ;;  %v1952_v19 = vmul.f32 %v7211_v9, %v1948_v59  ;;  %v6236_v6 = vpack.c.bf16 %v2131_v22, %v2130_v49  ;;  %v2218_v49 = vld [vmem:[%s7762_s2 + $0x3a0] sm:$0xff] }
 0xc41   :  { %v1951_v12 = vmax.f32 %v1945_v2, 0.0 }
 0xc42   :  { %v1950_v4 = vmax.f32 %v1940_v0, 0.0  ;;  %6237 = vmatpush3.bf16.msra.mxu0 %v6236_v6 }
 0xc43   :  { %v1957_v16 = vmul.f32 %v7148_v63, %v1951_v12  ;;  %v6443_v63 = vmov 15   ;;  %6238 = vmatprep.subr.bf16.mxu0 %v6437_v1 }
 0xc44   :  { %1966 = vrot.lane.b32.xlu0 %v1950_v4, %s6432_s13  ;;  %1977 = vrot.lane.b32.xlu1 %v1955_v5, %s6433_s14  ;;  %v1956_v15 = vmul.f32 %v7150_v53, %v1950_v4  ;;  %v6441_v53 = vmov 9   ;;  %v1954_v30 = vmul.f32 %v7211_v9, %v1950_v4 }
 0xc46   :  { %6240 = vmatpush3.bf16.msra.mxu0 %v6239_v55 }
 0xc47   :  { %5774 = vmatprep.subr.mxu0 %v6428_v11 }
 0xc48   :  { %1979 = vrot.lane.b32.xlu0 %v1956_v15, %s6433_s14  ;;  %1968 = vrot.lane.b32.xlu1 %v1951_v12, %s6432_s13 }
 0xc4c   :  { %1981 = vrot.lane.b32.xlu0 %v1957_v16, %s6433_s14  ;;  %2314 = vperm.xlu1 %6387, %v7232_v46  }
 0xc50   :  { %2539 = vperm.xlu0 %6388, %v7232_v46   ;;  %6390 = vset.pattern.permute.xlu1 %v6444_v37 }
 0xc54   :  { %6389 = vset.pattern.permute.xlu0 %v6439_v58 }
 0xc55   :  { %2692 = vperm.xlu0 %6389, %v7232_v46  }
 0xc59   :  { %6392 = vset.pattern.permute.xlu0 %v6440_v17 }
 0xc5a   :  { %3151 = vperm.xlu0 %6392, %v7232_v46  }
 0xc5e   :  { %6395 = vset.pattern.permute.xlu0 %v6441_v53 }
 0xc5f   :  { %3610 = vperm.xlu0 %6395, %v7232_v46  }
 0xc63   :  { %6398 = vset.pattern.permute.xlu0 %v6442_v61  ;;  %v6446_v61 = vmov 7  }
 0xc64   :  { %4069 = vperm.xlu0 %6398, %v7232_v46  }
 0xc68   :  { %6401 = vset.pattern.permute.xlu0 %v6443_v63  ;;  %v6447_v63 = vmov 8  }
 0xc69   :  { %4528 = vperm.xlu0 %6401, %v7232_v46  }
 0xcb1   :  { %v1965_v52 = vpop.permute.xlu0 %1964 }
 0xcb2   :  { %v1963_v20 = vpop.permute.xlu1 %1962  ;;  %v1987_v40 = vsel %vm460_vm13, %v1952_v19, %v1965_v52  ;;  %v6449_v52 = vmov 11  }
 0xcb3   :  { %v1986_v23 = vsel %vm460_vm13, %v7209_v8, %v1963_v20  ;;  %v6450_v20 = vmov 13  }
 0xcb6   :  { %v1967_v25 = vpop.permute.xlu0 %1966  ;;  %v1978_v26 = vpop.permute.xlu1 %1977 }
 0xcb7   :  { %v1990_v13 = vsel %vm465_vm14, %v1986_v23, %v1978_v26  ;;  %v1988_v33 = vsel %vm460_vm13, %v1953_v32, %v1967_v25  ;;  %v6451_v23 = vmov 14  }
 0xcb8   :  { %5726 = vmatprep.mubr.msk.f32.mxu1 %vm487_vm15, %v1990_v13 }
 0xcba   :  { %v1980_v42 = vpop.permute.xlu0 %1979  ;;  %v1969_v28 = vpop.permute.xlu1 %1968 }
 0xcbb   :  { %v1991_v31 = vsel %vm465_vm14, %v1987_v40, %v1980_v42  ;;  %v1989_v8 = vsel %vm460_vm13, %v1954_v30, %v1969_v28  ;;  %v2214_v30 = vld [vmem:[%s7762_s2 + $0x380] sm:$0xff] }
 0xcbc   :  { %5727 = vmatmul.mubr.msk.f32.vlgmr.msra.gmra.mrb[16].mxu1 %vm487_vm15, %v1991_v31  ;;  %v1993_v9 = vsel %vm465_vm14, %v1989_v8, %v7227_v27 }
 0xcbd   :  { %6243 = vmatpush3.bf16.msra.mxu1 %v6492_v7 }
 0xcbe   :  { %v1982_v34 = vpop.permute.xlu0 %1981  ;;  %5755 = vmatprep.subr.mxu1 %v6428_v11 }
 0xcbf   :  { %v1992_v21 = vsel %vm465_vm14, %v1988_v33, %v1982_v34 }
 0xcc0   :  { %5729 = vmatprep.mubr.msk.f32.mxu1 %vm487_vm15, %v1992_v21  ;;  %v2217_v21 = vld [vmem:[%s7762_s2 + $0x398] sm:$0xff] }
 0xcc1   :  { %5730 = vmatmul.mubr.msk.f32.gmra.mrb[18].mxu1 %vm487_vm15, %v1993_v9 }
 0xcc2   :  { %5756 = vmatpush3.msk.msra.mxu1 %vm67_vm1, %v7319_v3  ;;  %5757 = vmatprep.mubr.msk.f32.mxu1 %vm6438_vm9, %v6428_v11 }
 0xcc3   :  { %6244 = vmatprep.subr.bf16.mxu1 %v6437_v1 }
 0xcc5   :  { %5758 = vmatmul.mubr.msk.f32.vlgmr.msra.gmra.mrb[20].mxu1 %vm54_vm3, %v5122_v24 }
 0xcc6   :  { %6246 = vmatpush3.bf16.msra.mxu1 %v6492_v7  ;;  %5766 = vmatprep.mubr.msk.f32.mxu1 %vm6438_vm9, %v6428_v11 }
 0xcc7   :  { %5764 = vmatprep.subr.mxu1 %v6428_v11 }
 0xcca   :  { %5765 = vmatpush3.msk.msra.mxu1 %vm67_vm1, %v7319_v3 }
 0xccb   :  { %v2315_v27 = vpop.permute.xlu1 %2314  ;;  %5769 = vmatprep.subr.mxu1 %v6428_v11 }
 0xccc   :  { %vm2316_vm12 = vcmp.eq.s32.totalorder %v6516_v18, %v2315_v27 }
 0xccd   :  { %v5125_v35 = vsel %vm2316_vm12, 1.0, %v6428_v11 }
 0xcce   :  { %5767 = vmatmul.mubr.msk.f32.vlgmr.msra.gmra.mrb[22].mxu1 %vm54_vm3, %v5125_v35 }
 0xccf   :  { %5771 = vmatprep.mubr.msk.f32.mxu1 %vm6438_vm9, %v6428_v11  ;;  %5770 = vmatpush3.msra.mxu1 %v2215_v36  ;;  %v2540_v58 = vpop.permute.xlu0 %2539 }
 0xcd0   :  { %6247 = vmatprep.subr.bf16.mxu1 %v6437_v1  ;;  %vm2541_vm0 = vcmp.eq.s32.totalorder %v6516_v18, %v2540_v58 }
 0xcd4   :  { %v2693_v32 = vpop.permute.xlu0 %2692 }
 0xd8f   :  { %v5728_v56 = vpop.f32.mrb[16].mxu1 }
 0xd90   :  { %v2089_v57 = vpop.f32.mrb[17].mxu1  ;;  %v2095_v4 = vadd.f32 %v5728_v56, %v5115_v54 }
 0xd91   :  { %v2090_v59 = vadd.f32 %v5115_v54, %v2089_v57  ;;  %v2219_v57 = vld [vmem:[%s7762_s2 + $0x3a8] sm:$0xff] }
 0xd92   :  { %v2109_v16 = vadd.f32 %v2095_v4, %v7187_v60  ;;  %v5130_v60 = vsel %vm2541_vm0, 1.0, %v6428_v11 }
 0xd93   :  { %v2108_v19 = vadd.f32 %v2090_v59, %v7166_v29  ;;  %v2216_v29 = vld [vmem:[%s7762_s2 + $0x390] sm:$0xff] }
 0xd94   :  { %v5731_v47 = vpop.f32.mrb[18].mxu1 }
 0xd95   :  { %v2105_v62 = vadd.f32 %v5731_v47, %v5115_v54  ;;  %v2099_v0 = vpop.f32.mrb[19].mxu1 }
 0xd96   :  { %v2100_v2 = vadd.f32 %v5115_v54, %v2099_v0  ;;  %v3152_v0 = vpop.permute.xlu0 %3151 }
 0xd97   :  { %v2111_v5 = vadd.f32 %v2105_v62, %v7183_v39  ;;  %v6445_v39 = vmov 5   ;;  %vm3153_vm5 = vcmp.eq.s32.totalorder %v6516_v18, %v3152_v0 }
 0xd98   :  { %v2309_v12 = vpop.f32.mrb[20].mxu1  ;;  %v2110_v25 = vadd.f32 %v2100_v2, %v7185_v44 }
 0xd99   :  { %2118 = vrot.lane.b32.xlu1 %v2111_v5, %s6432_s13  ;;  %v5759_v15 = vpop.f32.mrb[21].mxu1  ;;  %v5146_v5 = vsel %vm3153_vm5, 1.0, %v6428_v11 }
 0xd9d   :  { %2113 = vrot.lane.b32.xlu1 %v2109_v16, %s6432_s13 }
 0xda1   :  { %2845 = vperm.xlu1 %6390, %v7232_v46   ;;  %v2388_v17 = vpop.f32.mrb[22].mxu1 }
 0xda2   :  { %v5768_v53 = vpop.f32.mrb[23].mxu1  ;;  %5772 = vmatmul.mubr.msk.f32.vlgmr.msra.gmra.mrb[24].mxu1 %vm254_vm10, %v2388_v17 }
 0xda3   :  { %6249 = vmatpush3.bf16.msra.mxu1 %v6492_v7  ;;  %5785 = vmatprep.mubr.msk.f32.mxu1 %vm6438_vm9, %v6428_v11 }
 0xda4   :  { %5783 = vmatprep.subr.mxu1 %v6428_v11 }
 0xda5   :  { %6391 = vset.pattern.permute.xlu1 %v6445_v39 }
 0xda6   :  { %2998 = vperm.xlu1 %6391, %v7232_v46  }
 0xda7   :  { %5784 = vmatpush3.msk.msra.mxu1 %vm67_vm1, %v7319_v3 }
 0xda8   :  { %5786 = vmatmul.mubr.msk.f32.vlgmr.msra.gmra.mrb[26].mxu1 %vm54_vm3, %v5130_v60  ;;  %5802 = vmatprep.subr.mxu1 %v6428_v11 }
 0xda9   :  { %5804 = vmatprep.mubr.msk.f32.mxu1 %vm6438_vm9, %v6428_v11  ;;  %5803 = vmatpush3.msra.mxu1 %v2217_v21 }
 0xdaa   :  { %6393 = vset.pattern.permute.xlu1 %v6446_v61  ;;  %6253 = vmatprep.subr.bf16.mxu1 %v6437_v1  ;;  %v2221_v61 = vld [vmem:[%s7762_s2 + $0x3b8] sm:$0xff] }
 0xdab   :  { %3304 = vperm.xlu1 %6393, %v7232_v46  }
 0xdaf   :  { %6394 = vset.pattern.permute.xlu1 %v6447_v63 }
 0xdb0   :  { %3457 = vperm.xlu1 %6394, %v7232_v46  }
 0xdb4   :  { %6396 = vset.pattern.permute.xlu1 %v6448_v10 }
 0xdb5   :  { %3763 = vperm.xlu1 %6396, %v7232_v46  }
 0xdb9   :  { %6397 = vset.pattern.permute.xlu1 %v6449_v52 }
 0xdba   :  { %3916 = vperm.xlu1 %6397, %v7232_v46  }
 0xdbe   :  { %6399 = vset.pattern.permute.xlu1 %v6450_v20 }
 0xdbf   :  { %4222 = vperm.xlu1 %6399, %v7232_v46  }
 0xdc3   :  { %6400 = vset.pattern.permute.xlu1 %v6451_v23 }
 0xdc4   :  { %4375 = vperm.xlu1 %6400, %v7232_v46  }
 0xe0b   :  { %v2119_v26 = vpop.permute.xlu1 %2118 }
 0xe0c   :  { %v2121_v13 = vsel %vm460_vm13, %v2110_v25, %v2119_v26 }
 0xe0d   :  { %v2123_v40 = vrot.slane %v2121_v13, 7  ;;  %v2222_v13 = vld [vmem:[%s7762_s2 + $0x3c0] sm:$0xff] }
 0xe0f   :  { %v2114_v42 = vpop.permute.xlu1 %2113 }
 0xe10   :  { %v2116_v28 = vsel %vm460_vm13, %v2108_v19, %v2114_v42 }
 0xe11   :  { %v2125_v31 = vsel %vm172_vm8, %v2116_v28, %v2123_v40  ;;  %vm2694_vm8 = vcmp.eq.s32.totalorder %v6516_v18, %v2693_v32  ;;  %v3611_v28 = vpop.permute.xlu0 %3610 }
 0xe12   :  { %5749 = vmatmul.mubr.msk.f32.vlgmr.msra.gmra.mrb[20].mxu0 %vm465_vm14, %v2125_v31  ;;  %v5134_v34 = vsel %vm2694_vm8, 1.0, %v6428_v11  ;;  %vm3612_vm11 = vcmp.eq.s32.totalorder %v6516_v18, %v3611_v28  ;;  %v4689_v28 = vld [vmem:[%s7762_s2 + $0x410] sm:$0xff] }
 0xe13   :  { %5775 = vmatpush3.msra.mxu0 %v2214_v30  ;;  %5776 = vmatprep.mubr.msk.f32.mxu0 %vm6438_vm9, %v6428_v11 }
 0xe14   :  { %5788 = vmatprep.subr.mxu0 %v6428_v11 }
 0xe16   :  { %5777 = vmatmul.mubr.msk.f32.vlgmr.msra.gmra.mrb[22].mxu0 %vm254_vm10, %v2309_v12  ;;  %v2220_v12 = vld [vmem:[%s7762_s2 + $0x3b0] sm:$0xff] }
 0xe17   :  { %5789 = vmatpush3.msra.mxu0 %v2216_v29  ;;  %5790 = vmatprep.mubr.msk.f32.mxu0 %vm6438_vm9, %v6428_v11  ;;  %v5158_v29 = vsel %vm3612_vm11, 1.0, %v6428_v11 }
 0xe18   :  { %6250 = vmatprep.subr.bf16.mxu0 %v6437_v1 }
 0xe20   :  { %v2846_v41 = vpop.permute.xlu1 %2845 }
 0xe21   :  { %vm2847_vm2 = vcmp.eq.s32.totalorder %v6516_v18, %v2846_v41 }
 0xe22   :  { %v5138_v48 = vsel %vm2847_vm2, 1.0, %v6428_v11 }
 0xe25   :  { %v2999_v51 = vpop.permute.xlu1 %2998 }
 0xe26   :  { %vm3000_vm4 = vcmp.eq.s32.totalorder %v6516_v18, %v2999_v51 }
 0xe27   :  { %v5142_v56 = vsel %vm3000_vm4, 1.0, %v6428_v11 }
 0xe2a   :  { %v3305_v17 = vpop.permute.xlu1 %3304 }
 0xe2b   :  { %vm3306_vm6 = vcmp.eq.s32.totalorder %v6516_v18, %v3305_v17 }
 0xe2c   :  { %v5150_v60 = vsel %vm3306_vm6, 1.0, %v6428_v11 }
 0xe2f   :  { %v3458_v20 = vpop.permute.xlu1 %3457 }
 0xe30   :  { %vm3459_vm7 = vcmp.eq.s32.totalorder %v6516_v18, %v3458_v20 }
 0xe31   :  { %v5154_v26 = vsel %vm3459_vm7, 1.0, %v6428_v11 }
 0xe75   :  { %v2461_v44 = vpop.f32.mrb[24].mxu1 }
 0xe76   :  { %v5773_v46 = vpop.f32.mrb[25].mxu1 }
 0xe7b   :  { %v2613_v8 = vpop.f32.mrb[26].mxu1 }
 0xe7c   :  { %v5787_v33 = vpop.f32.mrb[27].mxu1  ;;  %5791 = vmatmul.mubr.msk.f32.vlgmr.msra.gmra.mrb[24].mxu0 %vm254_vm10, %v2613_v8 }
 0xe7d   :  { %6252 = vmatpush3.bf16.msra.mxu0 %v6492_v7  ;;  %5799 = vmatprep.mubr.msk.f32.mxu0 %vm6438_vm9, %v6428_v11  ;;  %v3764_v33 = vpop.permute.xlu1 %3763 }
 0xe7e   :  { %5797 = vmatprep.subr.mxu0 %v6428_v11  ;;  %vm3765_vm12 = vcmp.eq.s32.totalorder %v6516_v18, %v3764_v33  ;;  %v4771_v33 = vld [vmem:[%s7762_s2 + $0x428] sm:$0xff] }
 0xe81   :  { %5798 = vmatpush3.msk.msra.mxu0 %vm67_vm1, %v7319_v3 }
 0xe82   :  { %5800 = vmatmul.mubr.msk.f32.vlgmr.msra.gmra.mrb[26].mxu0 %vm54_vm3, %v5134_v34  ;;  %5816 = vmatprep.subr.mxu0 %v6428_v11 }
 0xe83   :  { %5818 = vmatprep.mubr.msk.f32.mxu0 %vm6438_vm9, %v6428_v11  ;;  %5817 = vmatpush3.msra.mxu0 %v2218_v49 }
 0xe84   :  { %6256 = vmatprep.subr.bf16.mxu0 %v6437_v1 }
 0xee5   :  { %v7436_v9 = vpop.f32.mrb[20].mxu0 }
 0xee6   :  { %v5750_v24 = vpop.f32.mrb[21].mxu0 }
 0xee7   :  { %v5162_v24 = vsel %vm3765_vm12, 1.0, %v6428_v11 }
 0xee9   :  { %v2534_v27 = vpop.f32.mrb[22].mxu0 }
 0xeea   :  { %v2535_v35 = vadd.f32 %v2534_v27, %v2461_v44  ;;  %v5778_v36 = vpop.f32.mrb[23].mxu0  ;;  %v2223_v44 = vld [vmem:[%s7762_s2 + $0x3c8] sm:$0xff]  ;;  %v2224_v27 = vld [vmem:[%s7762_s2 + $0x3d0] sm:$0xff] }
 0xf4f   :  { %v2686_v37 = vpop.f32.mrb[24].mxu0 }
 0xf50   :  { %v2690_v38 = vadd.f32 %v2686_v37, %v2535_v35  ;;  %v5792_v14 = vpop.f32.mrb[25].mxu0 }
 0xf55   :  { %v2766_v43 = vpop.f32.mrb[26].mxu0 }
 0xf56   :  { %v5801_v45 = vpop.f32.mrb[27].mxu0  ;;  %5805 = vmatmul.mubr.msk.f32.vlgmr.msra.gmra.mrb[28].mxu1 %vm254_vm10, %v2766_v43 }
 0xf57   :  { %6255 = vmatpush3.bf16.msra.mxu1 %v6492_v7  ;;  %5813 = vmatprep.mubr.msk.f32.mxu1 %vm6438_vm9, %v6428_v11  ;;  %v2225_v45 = vld [vmem:[%s7762_s2 + $0x3d8] sm:$0xff] }
 0xf58   :  { %5811 = vmatprep.subr.mxu1 %v6428_v11 }
 0xf5b   :  { %5812 = vmatpush3.msk.msra.mxu1 %vm67_vm1, %v7319_v3 }
 0xf5c   :  { %5814 = vmatmul.mubr.msk.f32.vlgmr.msra.gmra.mrb[30].mxu1 %vm54_vm3, %v5138_v48  ;;  %5830 = vmatprep.subr.mxu1 %v6428_v11 }
 0xf5d   :  { %5832 = vmatprep.mubr.msk.f32.mxu1 %vm6438_vm9, %v6428_v11  ;;  %5831 = vmatpush3.msra.mxu1 %v2219_v57 }
 0xf5e   :  { %6259 = vmatprep.subr.bf16.mxu1 %v6437_v1 }
0x1029   :  { %v2839_v22 = vpop.f32.mrb[28].mxu1 }
0x102a   :  { %v2843_v6 = vadd.f32 %v2839_v22, %v2690_v38  ;;  %v5806_v50 = vpop.f32.mrb[29].mxu1  ;;  %v3917_v38 = vpop.permute.xlu1 %3916 }
0x102b   :  { %vm3918_vm0 = vcmp.eq.s32.totalorder %v6516_v18, %v3917_v38 }
0x102c   :  { %v5166_v43 = vsel %vm3918_vm0, 1.0, %v6428_v11 }
0x102f   :  { %v2919_v54 = vpop.f32.mrb[30].mxu1 }
0x1030   :  { %v5815_v55 = vpop.f32.mrb[31].mxu1  ;;  %5819 = vmatmul.mubr.msk.f32.vlgmr.msra.gmra.mrb[28].mxu0 %vm254_vm10, %v2919_v54 }
0x1031   :  { %6258 = vmatpush3.bf16.msra.mxu0 %v6492_v7  ;;  %5827 = vmatprep.mubr.msk.f32.mxu0 %vm6438_vm9, %v6428_v11  ;;  %v2226_v55 = vld [vmem:[%s7762_s2 + $0x3e0] sm:$0xff] }
0x1032   :  { %5825 = vmatprep.subr.mxu0 %v6428_v11 }
0x1035   :  { %5826 = vmatpush3.msk.msra.mxu0 %vm67_vm1, %v7319_v3 }
0x1036   :  { %5828 = vmatmul.mubr.msk.f32.vlgmr.msra.gmra.mrb[30].mxu0 %vm54_vm3, %v5142_v56  ;;  %5844 = vmatprep.subr.mxu0 %v6428_v11 }
0x1037   :  { %5846 = vmatprep.mubr.msk.f32.mxu0 %vm6438_vm9, %v6428_v11  ;;  %5845 = vmatpush3.msra.mxu0 %v2220_v12 }
0x1038   :  { %6262 = vmatprep.subr.bf16.mxu0 %v6437_v1 }
0x1103   :  { %v2992_v59 = vpop.f32.mrb[28].mxu0 }
0x1104   :  { %v2996_v47 = vadd.f32 %v2992_v59, %v2843_v6  ;;  %v5820_v62 = vpop.f32.mrb[29].mxu0  ;;  %v4070_v6 = vpop.permute.xlu0 %4069 }
0x1105   :  { %vm4071_vm8 = vcmp.eq.s32.totalorder %v6516_v18, %v4070_v6  ;;  %v4865_v6 = vld [vmem:[%s7762_s2 + $0x458] sm:$0xff] }
0x1106   :  { %v5170_v54 = vsel %vm4071_vm8, 1.0, %v6428_v11 }
0x1109   :  { %v3072_v2 = vpop.f32.mrb[30].mxu0 }
0x110a   :  { %v5829_v4 = vpop.f32.mrb[31].mxu0  ;;  %5833 = vmatmul.mubr.msk.f32.vlgmr.msra.gmra.mrb[32].mxu1 %vm254_vm10, %v3072_v2 }
0x110b   :  { %6261 = vmatpush3.bf16.msra.mxu1 %v6492_v7  ;;  %5841 = vmatprep.mubr.msk.f32.mxu1 %vm6438_vm9, %v6428_v11  ;;  %v2227_v4 = vld [vmem:[%s7762_s2 + $0x3e8] sm:$0xff] }
0x110c   :  { %5839 = vmatprep.subr.mxu1 %v6428_v11 }
0x110f   :  { %5840 = vmatpush3.msk.msra.mxu1 %vm67_vm1, %v7319_v3 }
0x1110   :  { %5842 = vmatmul.mubr.msk.f32.vlgmr.msra.gmra.mrb[34].mxu1 %vm54_vm3, %v5146_v5  ;;  %5858 = vmatprep.subr.mxu1 %v6428_v11 }
0x1111   :  { %5860 = vmatprep.mubr.msk.f32.mxu1 %vm6438_vm9, %v6428_v11  ;;  %5859 = vmatpush3.msra.mxu1 %v2221_v61 }
0x1112   :  { %6265 = vmatprep.subr.bf16.mxu1 %v6437_v1 }
0x11dd   :  { %v3145_v15 = vpop.f32.mrb[32].mxu1 }
0x11de   :  { %v3149_v16 = vadd.f32 %v3145_v15, %v2996_v47  ;;  %v5834_v58 = vpop.f32.mrb[33].mxu1  ;;  %v4223_v47 = vpop.permute.xlu1 %4222 }
0x11df   :  { %vm4224_vm2 = vcmp.eq.s32.totalorder %v6516_v18, %v4223_v47  ;;  %v4871_v47 = vld [vmem:[%s7762_s2 + $0x488] sm:$0xff] }
0x11e0   :  { %v5174_v2 = vsel %vm4224_vm2, 1.0, %v6428_v11 }
0x11e3   :  { %v3225_v53 = vpop.f32.mrb[34].mxu1 }
0x11e4   :  { %v5843_v39 = vpop.f32.mrb[35].mxu1  ;;  %5847 = vmatmul.mubr.msk.f32.vlgmr.msra.gmra.mrb[32].mxu0 %vm254_vm10, %v3225_v53 }
0x11e5   :  { %6264 = vmatpush3.bf16.msra.mxu0 %v6492_v7  ;;  %5855 = vmatprep.mubr.msk.f32.mxu0 %vm6438_vm9, %v6428_v11  ;;  %v2228_v39 = vld [vmem:[%s7762_s2 + $0x3f0] sm:$0xff] }
0x11e6   :  { %5853 = vmatprep.subr.mxu0 %v6428_v11 }
0x11e9   :  { %5854 = vmatpush3.msk.msra.mxu0 %vm67_vm1, %v7319_v3 }
0x11ea   :  { %5856 = vmatmul.mubr.msk.f32.vlgmr.msra.gmra.mrb[34].mxu0 %vm54_vm3, %v5150_v60  ;;  %5872 = vmatprep.subr.mxu0 %v6428_v11 }
0x11eb   :  { %5874 = vmatprep.mubr.msk.f32.mxu0 %vm6438_vm9, %v6428_v11  ;;  %5873 = vmatpush3.msra.mxu0 %v2222_v13 }
0x11ec   :  { %6268 = vmatprep.subr.bf16.mxu0 %v6437_v1 }
0x12b7   :  { %v3298_v63 = vpop.f32.mrb[32].mxu0 }
0x12b8   :  { %v3302_v10 = vadd.f32 %v3298_v63, %v3149_v16  ;;  %v5848_v52 = vpop.f32.mrb[33].mxu0  ;;  %v4376_v16 = vpop.permute.xlu1 %4375 }
0x12b9   :  { %vm4377_vm4 = vcmp.eq.s32.totalorder %v6516_v18, %v4376_v16 }
0x12ba   :  { %v5178_v53 = vsel %vm4377_vm4, 1.0, %v6428_v11 }
0x12bd   :  { %v3378_v23 = vpop.f32.mrb[34].mxu0 }
0x12be   :  { %v5857_v25 = vpop.f32.mrb[35].mxu0  ;;  %5861 = vmatmul.mubr.msk.f32.vlgmr.msra.gmra.mrb[36].mxu1 %vm254_vm10, %v3378_v23 }
0x12bf   :  { %6267 = vmatpush3.bf16.msra.mxu1 %v6492_v7  ;;  %5869 = vmatprep.mubr.msk.f32.mxu1 %vm6438_vm9, %v6428_v11 }
0x12c0   :  { %5867 = vmatprep.subr.mxu1 %v6428_v11 }
0x12c3   :  { %5868 = vmatpush3.msk.msra.mxu1 %vm67_vm1, %v7319_v3 }
0x12c4   :  { %5870 = vmatmul.mubr.msk.f32.vlgmr.msra.gmra.mrb[38].mxu1 %vm54_vm3, %v5154_v26  ;;  %5886 = vmatprep.subr.mxu1 %v6428_v11 }
0x12c5   :  { %5888 = vmatprep.mubr.msk.f32.mxu1 %vm6438_vm9, %v6428_v11  ;;  %5887 = vmatpush3.msra.mxu1 %v2223_v44  ;;  %v5186_v44 = vld [vmem:[%s7763_s3 + $0x12] ss:$0 sm:$0xff] }
0x12c6   :  { %6271 = vmatprep.subr.bf16.mxu1 %v6437_v1 }
0x1391   :  { %v3451_v19 = vpop.f32.mrb[36].mxu1 }
0x1392   :  { %v3455_v40 = vadd.f32 %v3451_v19, %v3302_v10  ;;  %v5862_v42 = vpop.f32.mrb[37].mxu1  ;;  %v4529_v10 = vpop.permute.xlu0 %4528 }
0x1393   :  { %vm4530_vm5 = vcmp.eq.s32.totalorder %v6516_v18, %v4529_v10  ;;  %v4953_v10 = vld [vmem:[%s7762_s2 + $0x4a0] sm:$0xf] }
0x1394   :  { %v5182_v23 = vsel %vm4530_vm5, 1.0, %v6428_v11 }
0x1397   :  { %v3531_v30 = vpop.f32.mrb[38].mxu1 }
0x1398   :  { %v5871_v31 = vpop.f32.mrb[39].mxu1  ;;  %5875 = vmatmul.mubr.msk.f32.vlgmr.msra.gmra.mrb[36].mxu0 %vm254_vm10, %v3531_v30  ;;  %v4690_v30 = vld [vmem:[%s7762_s2 + $0x418] sm:$0xff] }
0x1399   :  { %6270 = vmatpush3.bf16.msra.mxu0 %v6492_v7  ;;  %5883 = vmatprep.mubr.msk.f32.mxu0 %vm6438_vm9, %v6428_v11  ;;  %v6293_v31 = vpack.c.bf16 %v4690_v30, %v4689_v28 }
0x139a   :  { %5881 = vmatprep.subr.mxu0 %v6428_v11 }
0x139d   :  { %5882 = vmatpush3.msk.msra.mxu0 %vm67_vm1, %v7319_v3 }
0x139e   :  { %5884 = vmatmul.mubr.msk.f32.vlgmr.msra.gmra.mrb[38].mxu0 %vm54_vm3, %v5158_v29  ;;  %5900 = vmatprep.subr.mxu0 %v6428_v11 }
0x139f   :  { %5902 = vmatprep.mubr.msk.f32.mxu0 %vm6438_vm9, %v6428_v11  ;;  %5901 = vmatpush3.msra.mxu0 %v2224_v27  ;;  %v4772_v27 = vld [vmem:[%s7762_s2 + $0x430] sm:$0xff] }
0x13a0   :  { %6274 = vmatprep.subr.bf16.mxu0 %v6437_v1 }
0x146b   :  { %v3604_v46 = vpop.f32.mrb[36].mxu0 }
0x146c   :  { %v3608_v32 = vadd.f32 %v3604_v46, %v3455_v40  ;;  %v5876_v8 = vpop.f32.mrb[37].mxu0  ;;  %v4688_v40 = vld [vmem:[%s7762_s2 + $0x408] sm:$0xff] }
0x146d   :  { %v4770_v8 = vld [vmem:[%s7762_s2 + $0x420] sm:$0xff] }
0x1471   :  { %v3684_v34 = vpop.f32.mrb[38].mxu0 }
0x1472   :  { %v5885_v21 = vpop.f32.mrb[39].mxu0  ;;  %5889 = vmatmul.mubr.msk.f32.vlgmr.msra.gmra.mrb[40].mxu1 %vm254_vm10, %v3684_v34 }
0x1473   :  { %6273 = vmatpush3.bf16.msra.mxu1 %v6492_v7  ;;  %5897 = vmatprep.mubr.msk.f32.mxu1 %vm6438_vm9, %v6428_v11  ;;  %v6296_v21 = vpack.c.bf16 %v4771_v33, %v4770_v8 }
0x1474   :  { %5895 = vmatprep.subr.mxu1 %v6428_v11 }
0x1477   :  { %5896 = vmatpush3.msk.msra.mxu1 %vm67_vm1, %v7319_v3 }
0x1478   :  { %5898 = vmatmul.mubr.msk.f32.vlgmr.msra.gmra.mrb[42].mxu1 %vm54_vm3, %v5162_v24  ;;  %5914 = vmatprep.subr.mxu1 %v6428_v11 }
0x1479   :  { %5916 = vmatprep.mubr.msk.f32.mxu1 %vm6438_vm9, %v6428_v11  ;;  %5915 = vmatpush3.msra.mxu1 %v2225_v45  ;;  %v4862_v45 = vld [vmem:[%s7762_s2 + $0x440] sm:$0xff] }
0x147a   :  { %6277 = vmatprep.subr.bf16.mxu1 %v6437_v1 }
0x1545   :  { %v3757_v35 = vpop.f32.mrb[40].mxu1 }
0x1546   :  { %v3761_v36 = vadd.f32 %v3757_v35, %v3608_v32  ;;  %v5890_v37 = vpop.f32.mrb[41].mxu1  ;;  %v4773_v35 = vld [vmem:[%s7762_s2 + $0x438] sm:$0xff] }
0x1547   :  { %v5187_v37 = vld [vmem:[%s7763_s3 + $0x13] ss:$0 sm:$0xff] }
0x154b   :  { %v3837_v14 = vpop.f32.mrb[42].mxu1 }
0x154c   :  { %v5899_v41 = vpop.f32.mrb[43].mxu1  ;;  %5903 = vmatmul.mubr.msk.f32.vlgmr.msra.gmra.mrb[40].mxu0 %vm254_vm10, %v3837_v14 }
0x154d   :  { %6276 = vmatpush3.bf16.msra.mxu0 %v6492_v7  ;;  %5911 = vmatprep.mubr.msk.f32.mxu0 %vm6438_vm9, %v6428_v11 }
0x154e   :  { %5909 = vmatprep.subr.mxu0 %v6428_v11 }
0x1551   :  { %5910 = vmatpush3.msk.msra.mxu0 %vm67_vm1, %v7319_v3 }
0x1552   :  { %5912 = vmatmul.mubr.msk.f32.vlgmr.msra.gmra.mrb[42].mxu0 %vm54_vm3, %v5166_v43  ;;  %5928 = vmatprep.subr.mxu0 %v6428_v11 }
0x1553   :  { %5930 = vmatprep.mubr.msk.f32.mxu0 %vm6438_vm9, %v6428_v11  ;;  %5929 = vmatpush3.msra.mxu0 %v2226_v55  ;;  %v4868_v55 = vld [vmem:[%s7762_s2 + $0x470] sm:$0xff] }
0x1554   :  { %6280 = vmatprep.subr.bf16.mxu0 %v6437_v1 }
0x161f   :  { %v3910_v48 = vpop.f32.mrb[40].mxu0 }
0x1620   :  { %v3914_v49 = vadd.f32 %v3910_v48, %v3761_v36  ;;  %v5904_v22 = vpop.f32.mrb[41].mxu0  ;;  %v6299_v36 = vpack.c.bf16 %v4773_v35, %v4772_v27  ;;  %v4863_v48 = vld [vmem:[%s7762_s2 + $0x448] sm:$0xff] }
0x1621   :  { %v6302_v22 = vpack.c.bf16 %v4863_v48, %v4862_v45 }
0x1625   :  { %v3990_v50 = vpop.f32.mrb[42].mxu0 }
0x1626   :  { %v5913_v51 = vpop.f32.mrb[43].mxu0  ;;  %5917 = vmatmul.mubr.msk.f32.vlgmr.msra.gmra.mrb[44].mxu1 %vm254_vm10, %v3990_v50 }
0x1627   :  { %6279 = vmatpush3.bf16.msra.mxu1 %v6492_v7  ;;  %5925 = vmatprep.mubr.msk.f32.mxu1 %vm6438_vm9, %v6428_v11  ;;  %v4867_v51 = vld [vmem:[%s7762_s2 + $0x468] sm:$0xff] }
0x1628   :  { %5923 = vmatprep.subr.mxu1 %v6428_v11 }
0x162b   :  { %5924 = vmatpush3.msk.msra.mxu1 %vm67_vm1, %v7319_v3 }
0x162c   :  { %5926 = vmatmul.mubr.msk.f32.vlgmr.msra.gmra.mrb[46].mxu1 %vm54_vm3, %v5170_v54  ;;  %5942 = vmatprep.subr.mxu1 %v6428_v11 }
0x162d   :  { %5944 = vmatprep.mubr.msk.f32.mxu1 %vm6438_vm9, %v6428_v11  ;;  %5943 = vmatpush3.msra.mxu1 %v2227_v4 }
0x162e   :  { %6283 = vmatprep.subr.bf16.mxu1 %v6437_v1 }
0x16f9   :  { %v4063_v56 = vpop.f32.mrb[44].mxu1 }
0x16fa   :  { %v4067_v57 = vadd.f32 %v4063_v56, %v3914_v49  ;;  %v5918_v59 = vpop.f32.mrb[45].mxu1  ;;  %v4864_v49 = vld [vmem:[%s7762_s2 + $0x450] sm:$0xff]  ;;  %v4869_v56 = vld [vmem:[%s7762_s2 + $0x478] sm:$0xff] }
0x16fb   :  { %v6305_v50 = vpack.c.bf16 %v4865_v6, %v4864_v49  ;;  %v4870_v59 = vld [vmem:[%s7762_s2 + $0x480] sm:$0xff] }
0x16ff   :  { %v4143_v62 = vpop.f32.mrb[46].mxu1 }
0x1700   :  { %v5927_v0 = vpop.f32.mrb[47].mxu1  ;;  %5931 = vmatmul.mubr.msk.f32.vlgmr.msra.gmra.mrb[44].mxu0 %vm254_vm10, %v4143_v62  ;;  %v6314_v62 = vpack.c.bf16 %v4871_v47, %v4870_v59 }
0x1701   :  { %6282 = vmatpush3.bf16.msra.mxu0 %v6492_v7  ;;  %5939 = vmatprep.mubr.msk.f32.mxu0 %vm6438_vm9, %v6428_v11  ;;  %v4872_v0 = vld [vmem:[%s7762_s2 + $0x490] sm:$0xff] }
0x1702   :  { %5937 = vmatprep.subr.mxu0 %v6428_v11 }
0x1705   :  { %5938 = vmatpush3.msk.msra.mxu0 %vm67_vm1, %v7319_v3 }
0x1706   :  { %5940 = vmatmul.mubr.msk.f32.vlgmr.msra.gmra.mrb[46].mxu0 %vm54_vm3, %v5174_v2  ;;  %5956 = vmatprep.subr.mxu0 %v6428_v11  ;;  %v4873_v2 = vld [vmem:[%s7762_s2 + $0x498] sm:$0xff] }
0x1707   :  { %5958 = vmatprep.mubr.msk.f32.mxu0 %vm6438_vm9, %v6428_v11  ;;  %5957 = vmatpush3.msra.mxu0 %v2228_v39  ;;  %v6317_v4 = vpack.c.bf16 %v4873_v2, %v4872_v0 }
0x1708   :  { %6286 = vmatprep.subr.bf16.mxu0 %v6437_v1 }
0x17d3   :  { %v4216_v5 = vpop.f32.mrb[44].mxu0 }
0x17d4   :  { %v4220_v12 = vadd.f32 %v4216_v5, %v4067_v57  ;;  %v5932_v15 = vpop.f32.mrb[45].mxu0  ;;  %v6311_v57 = vpack.c.bf16 %v4869_v56, %v4868_v55  ;;  %v5189_v5 = vld [vmem:[%s7763_s3 + $0x14] ss:$0 sm:$0xff] }
0x17d9   :  { %v4296_v58 = vpop.f32.mrb[46].mxu0 }
0x17da   :  { %v5941_v17 = vpop.f32.mrb[47].mxu0  ;;  %5945 = vmatmul.mubr.msk.f32.vlgmr.msra.gmra.mrb[48].mxu1 %vm254_vm10, %v4296_v58  ;;  %v5120_v58 = vld [vmem:[%s7763_s3 + $0x11] ss:$0 sm:$0xff] }
0x17db   :  { %6285 = vmatpush3.bf16.msra.mxu1 %v6492_v7  ;;  %5953 = vmatprep.mubr.msk.f32.mxu1 %vm6438_vm9, %v6428_v11  ;;  %v2209_v17 = vadd.f32 %v5120_v58, %v7436_v9 }
0x17dc   :  { %5951 = vmatprep.subr.mxu1 %v6428_v11 }
0x17dd   :  { %v2212_v39 = vmax.f32 %v2209_v17, 0.0 }
0x17df   :  { %5952 = vmatpush3.msk.msra.mxu1 %vm67_vm1, %v7319_v3 }
0x17e0   :  { %5954 = vmatmul.mubr.msk.f32.vlgmr.msra.gmra.mrb[50].mxu1 %vm54_vm3, %v5178_v53  ;;  %5970 = vmatprep.subr.mxu1 %v6428_v11 }
0x17e1   :  { %5972 = vmatprep.mubr.msk.f32.mxu1 %vm6438_vm9, %v6428_v11 }
0x18ad   :  { %v4369_v60 = vpop.f32.mrb[48].mxu1 }
0x18ae   :  { %v4373_v61 = vadd.f32 %v4369_v60, %v4220_v12  ;;  %v5946_v63 = vpop.f32.mrb[49].mxu1 }
0x18b3   :  { %v4449_v52 = vpop.f32.mrb[50].mxu1 }
0x18b4   :  { %v5955_v20 = vpop.f32.mrb[51].mxu1  ;;  %5959 = vmatmul.mubr.msk.f32.vlgmr.msra.gmra.mrb[48].mxu0 %vm254_vm10, %v4449_v52  ;;  %v5191_v52 = vld [vmem:[%s7763_s3 + $0x15] ss:$0 sm:$0xff] }
0x18b5   :  { %6288 = vmatpush3.bf16.msra.mxu0 %v6492_v7  ;;  %5967 = vmatprep.mubr.msk.f32.mxu0 %vm6438_vm9, %v6428_v11  ;;  %v2229_v7 = vld [vmem:[%s7762_s2 + $0x3f8] sm:$0xff] }
0x18b6   :  { %5965 = vmatprep.subr.mxu0 %v6428_v11  ;;  %5971 = vmatpush3.msra.mxu1 %v2229_v7 }
0x18b7   :  { %6301 = vmatprep.subr.bf16.mxu1 %v6437_v1 }
0x18b9   :  { %5966 = vmatpush3.msk.msra.mxu0 %vm67_vm1, %v7319_v3  ;;  %v4687_v3 = vld [vmem:[%s7762_s2 + $0x400] sm:$0xff] }
0x18ba   :  { %5968 = vmatmul.mubr.msk.f32.vlgmr.msra.gmra.mrb[50].mxu0 %vm54_vm3, %v5182_v23  ;;  %6289 = vmatprep.subr.bf16.mxu0 %v6437_v1  ;;  %v6290_v42 = vpack.c.bf16 %v4688_v40, %v4687_v3  ;;  %vm4959_vm3 = vcmask 31744  }
0x18bb   :  { %5983 = vmatprep.mubr.msk.f32.mxu0 %vm6438_vm9, %v6428_v11 }
0x18bc   :  { %6291 = vmatpush3.bf16.msra.mxu0 %v6290_v42 }
0x18bd   :  { %6292 = vmatprep.subr.bf16.mxu0 %v6437_v1 }
0x18c0   :  { %6294 = vmatpush3.bf16.msra.mxu0 %v6293_v31 }
0x18c1   :  { %6295 = vmatprep.subr.bf16.mxu0 %v6437_v1 }
0x1987   :  { %v4522_v18 = vpop.f32.mrb[48].mxu0 }
0x1988   :  { %v4526_v25 = vadd.f32 %v4522_v18, %v4373_v61  ;;  %v5960_v26 = vpop.f32.mrb[49].mxu0  ;;  %v5193_v18 = vld [vmem:[%s7763_s3 + $0x16] ss:$0 sm:$0xff] }
0x198d   :  { %v4602_v13 = vpop.f32.mrb[50].mxu0 }
0x198e   :  { %v5969_v19 = vpop.f32.mrb[51].mxu0  ;;  %5973 = vmatmul.mubr.msk.f32.vlgmr.msra.gmra.mrb[52].mxu1 %vm254_vm10, %v4602_v13  ;;  %vm5036_vm10 = vcmask 25600  }
0x198f   :  { %6021 = vmatprep.mubr.msk.f32.mxu1 %vm6438_vm9, %v6428_v11  ;;  %6303 = vmatpush3.bf16.msra.mxu1 %v6302_v22 }
0x1990   :  { %6304 = vmatprep.subr.bf16.mxu1 %v6437_v1 }
0x1993   :  { %6306 = vmatpush3.bf16.msra.mxu1 %v6305_v50 }
0x1994   :  { %6307 = vmatprep.subr.bf16.mxu1 %v6437_v1 }
0x1a61   :  { %v4675_v29 = vpop.f32.mrb[52].mxu1 }
0x1a62   :  { %v4679_v46 = vadd.f32 %v4675_v29, %v4526_v25  ;;  %v5974_v32 = vpop.f32.mrb[53].mxu1 }
0x1a64   :  { %v4685_v34 = vadd.f32 %v5186_v44, %v4679_v46 }
0x1a66   :  { %v4686_v24 = vmax.f32 %v4685_v34, 0.0 }
0x1a68   :  { %5984 = vmatmul.mubr.msk.f32.vlgmr.msra.gmra.mrb[52].mxu0 %vm460_vm13, %v4686_v24 }
0x1a69   :  { %6297 = vmatpush3.bf16.msra.mxu0 %v6296_v21  ;;  %5994 = vmatprep.mubr.msk.f32.mxu0 %vm6438_vm9, %v6428_v11 }
0x1a6a   :  { %6298 = vmatprep.subr.bf16.mxu0 %v6437_v1 }
0x1a6d   :  { %6300 = vmatpush3.bf16.msra.mxu0 %v6299_v36 }
0x1a6e   :  { %6024 = vmatprep.subr.mxu0 %v6428_v11 }
0x1b3b   :  { %v4765_v38 = vpop.f32.mrb[52].mxu0 }
0x1b3c   :  { %v4766_v14 = vadd.f32 %v5187_v37, %v4765_v38  ;;  %v5985_v41 = vpop.f32.mrb[53].mxu0 }
0x1b3e   :  { %v4769_v43 = vmax.f32 %v4766_v14, 0.0 }
0x1b40   :  { %5995 = vmatmul.mubr.msk.f32.vlgmr.msra.gmra.mrb[54].mxu0 %vm460_vm13, %v4769_v43 }
0x1b41   :  { %6026 = vmatprep.mubr.msk.f32.mxu0 %vm6438_vm9, %v6428_v11  ;;  %v4866_v11 = vld [vmem:[%s7762_s2 + $0x460] sm:$0xff]  ;;  %6025 = vmatpush3.msk.msra.mxu0 %vm67_vm1, %v4953_v10  ;;  %s6403_s2 = scalar_lea.vmem %s5045_s9, 32 }
0x1b42   :  { %v6308_v54 = vpack.c.bf16 %v4867_v51, %v4866_v11  ;;  %p6404_p0 = scmp.ne.s32.totalorder %s5045_s9, %s6403_s2  ;;  %p6409_p2 = scmp.lt.s32.totalorder %s6403_s2, %s6403_s2 }
0x1b44   :  { %6309 = vmatpush3.bf16.msra.mxu1 %v6308_v54  ;;  %p6410_p3 = por %p6409_p2, %p6408_p1 }
0x1b45   :  { %6310 = vmatprep.subr.bf16.mxu1 %v6437_v1 }
0x1b46   :  { %p6411_p4 = pnand %p6410_p3, %p6404_p0 }
0x1b48   :  { %6312 = vmatpush3.bf16.msra.mxu1 %v6311_v57 }
0x1b49   :  { %6313 = vmatprep.subr.bf16.mxu1 %v6437_v1 }
0x1b4c   :  { %6315 = vmatpush3.bf16.msra.mxu1 %v6314_v62 }
0x1b4d   :  { %6316 = vmatprep.subr.bf16.mxu1 %v6437_v1 }
0x1b50   :  { %6318 = vmatpush3.bf16.msra.mxu1 %v6317_v4 }
0x1c13   :  { %v4848_v12 = vpop.f32.mrb[54].mxu0 }
0x1c14   :  { %v4849_v15 = vadd.f32 %v5189_v5, %v4848_v12  ;;  %v5996_v16 = vpop.f32.mrb[55].mxu0 }
0x1c16   :  { %4853 = vrot.lane.b32.xlu1 %v4849_v15, %s6432_s13  ;;  %v4856_v1 = vrot.slane %v4849_v15, 2 }
0x1c1a   :  { %4857 = vrot.lane.b32.xlu1 %v4856_v1, %s6433_s14 }
0x1c88   :  { %v4854_v53 = vpop.permute.xlu1 %4853 }
0x1c89   :  { %v4860_v60 = vsel %vm460_vm13, %v2212_v39, %v4854_v53 }
0x1c8c   :  { %v4858_v61 = vpop.permute.xlu1 %4857 }
0x1c8d   :  { %v4861_v63 = vsel %vm465_vm14, %v4860_v60, %v4858_v61 }
0x1c8e   :  { %6022 = vmatmul.mubr.msk.f32.vlgmr.msra.gmra.mrb[54].mxu1 %vm487_vm15, %v4861_v63 }
0x1d61   :  { %v4948_v9 = vpop.f32.mrb[54].mxu1 }
0x1d62   :  { %v4949_v20 = vadd.f32 %v5191_v52, %v4948_v9  ;;  %v6023_v23 = vpop.f32.mrb[55].mxu1 }
0x1d64   :  { %v4952_v7 = vmax.f32 %v4949_v20, 0.0 }
0x1d66   :  { %6027 = vmatmul.mubr.msk.f32.vlgmr.msra.gmra.mrb[56].mxu0 %vm4959_vm3, %v4952_v7 }
0x1e39   :  { %v5032_v25 = vpop.f32.mrb[56].mxu0 }
0x1e3a   :  { %v5033_v26 = vadd.f32 %v5193_v18, %v5032_v25  ;;  %v6028_v13 = vpop.f32.mrb[57].mxu0 }
0x1e3c   :  { %5037 = vst.msk [vmem:[#allocation2] sm:$0x3] %vm5036_vm10, %v5033_v26 }
0x1e3d   :  { %6414 = shalt.err (!%p6411_p4)
}
0x1e3e   :  { %s6415_s12 = scalar_lea.hbm %s7764_s4, 32 }
0x1e3f   :  { %p6416_p5 = scmp.ne.s32.totalorder %s7764_s4, %s6415_s12  ;;  %p6419_p6 = scmp.lt.u32.totalorder %s6415_s12, %s7764_s4 }
0x1e41   :  { %p6421_p7 = pnand %p6419_p6, %p6416_p5 }
0x1e43   :  { %6424 = shalt.err (!%p6421_p7)
}
0x1e44   :  { %5047 = dma.vmem_to_hbm [thread:$0]  %s5045_s9, 32, %s7764_s4, [#allocation3]  }
0x1e45   :  { %6425 = dma.done.wait [#allocation3], 32  }
0x1e46   :  { %6426 = vsyncadd [#allocation3], 4294967264 }
0x1e47   :  { %5051 = vsyncpa [#allocation3], 1 }

</bundles_post_ra>
